<compile_context>
chip_gen: v5e
topology: v5e:2x2
jax: 0.10.0
libtpu: 0.0.40
codegen_flags: <defaults>
</compile_context>

<pallas_src>
import functools

import numpy as np

import jax
import jax.numpy as jnp
from jax import lax
from jax.experimental import pallas as pl
from jax.experimental.pallas import tpu as pltpu


def _layer_norm(v, eps):
    mu = jnp.mean(v, axis=-1, keepdims=True)
    var = jnp.mean((v - mu) ** 2, axis=-1, keepdims=True)
    return (v - mu) * lax.rsqrt(var + eps)


def _silu(v):
    return v * jax.nn.sigmoid(v)


def _jamba_kernel(Bt, L, d_inner, d_state, d_conv, pad, eps,
                  # inputs
                  x_ref,
                  w_in_x_ref, w_in_z_ref,
                  conv_w_ref, conv_b_ref,
                  w_x_dt_ref, w_x_b_ref, w_x_c_ref,
                  w_dt_ref, b_dt_ref,
                  d_param_ref, w_out_ref,
                  w_moe_a_ref, b_moe_a_ref, w_moe_b_ref, b_moe_b_ref,
                  a_rep_ref, sel_r_ref, sel_m_ref, sel_s_ref,
                  # output
                  o_ref,
                  # scratch
                  xp_s, dA_s, dBu_s, hh_s):
    f32 = jnp.float32
    bf16 = jnp.bfloat16
    n = d_state
    di = d_inner
    BL = Bt * L

    x = x_ref[...]                 # (BL, D) f32, rows ordered b*L + t
    skip = x
    x_ln = _layer_norm(x, eps)
    x_bf = x_ln.astype(bf16)

    # ---------------- Mamba in_proj (bf16 operands, f32 accumulation) ------
    xm = jnp.dot(x_bf, w_in_x_ref[...], preferred_element_type=f32)   # (BL, di)
    res = jnp.dot(x_bf, w_in_z_ref[...], preferred_element_type=f32)  # (BL, di)

    # ---------------- depthwise causal conv1d (channels-last) --------------
    # Pad rows [0, pad) are zero; xm is written at the sublane-aligned offset
    # `pad`.  The per-row (t = row % L) mask zeroes the causal left edge and
    # also prevents leakage between batch elements folded into this block.
    xp_s[0:pad, :] = jnp.zeros((pad, di), f32)
    xp_s[pad:, :] = xm
    row_in_seq = lax.broadcasted_iota(jnp.int32, (BL, 1), 0) % L
    acc = jnp.zeros((BL, di), f32)
    for k in range(d_conv):                     # static unroll (d_conv small)
        s = d_conv - 1 - k
        tap = xp_s[pad - s:pad - s + BL, :]     # == xm shifted down by s rows
        if s > 0:
            tap = jnp.where(row_in_seq >= s, tap, 0.0)
        acc = acc + tap * conv_w_ref[k:k + 1, :]
    u = _silu(acc + conv_b_ref[...])            # (BL, di) f32
    u_bf = u.astype(bf16)

    # ---------------- SSM parameterization (x_proj / dt_proj) --------------
    dt_in = jnp.dot(u_bf, w_x_dt_ref[...], preferred_element_type=f32)  # (BL, r)
    Bmat = jnp.dot(u_bf, w_x_b_ref[...], preferred_element_type=f32)    # (BL, n)
    Cmat = jnp.dot(u_bf, w_x_c_ref[...], preferred_element_type=f32)    # (BL, n)
    delta = jax.nn.softplus(
        jnp.dot(dt_in.astype(bf16), w_dt_ref[...],
                preferred_element_type=f32) + b_dt_ref[...])            # (BL, di)

    # ---------------- hoisted scan precompute ------------------------------
    # Expanded row index q = (t*Bt + b)*n + s (time-major).  Row replication,
    # state-dim selection and the final per-step C-reduction are expressed as
    # host-precomputed 0/1 matrices + MXU matmuls so everything stays 2-D,
    # lane-dense over d_inner, with no per-step XLU relayouts.
    R = sel_r_ref[...]          # (Q, BL)  one-hot: q -> source token row
    M = sel_m_ref[...]          # (Q, n)   one-hot: q -> state index s
    S = sel_s_ref[...]          # (BL, Q)  == R.T (groups-of-n block sum)
    A_rep = a_rep_ref[...]      # (Q, di)  == -exp(A_log)[:, q % n].T (exact)

    delta_rep = jnp.dot(R, delta, preferred_element_type=f32)           # (Q, di)
    du_rep = jnp.dot(R, delta * u, preferred_element_type=f32)          # (Q, di)
    b_col = jnp.sum(jnp.dot(R, Bmat, preferred_element_type=f32) * M,
                    axis=-1, keepdims=True)                             # (Q, 1)
    c_col = jnp.sum(jnp.dot(R, Cmat, preferred_element_type=f32) * M,
                    axis=-1, keepdims=True)                             # (Q, 1)

    dA_s[...] = jnp.exp(delta_rep * A_rep)      # all EUP exp hoisted off the scan
    dBu_s[...] = du_rep * b_col

    # ---------------- selective scan: minimal serial recurrence ------------
    bn = Bt * n

    def body(t, h):                              # h: (Bt*n, di) f32
        idx = pl.ds(pl.multiple_of(t * bn, bn), bn)
        h = dA_s[idx, :] * h + dBu_s[idx, :]
        hh_s[idx, :] = h
        return h

    if L <= 64:
        scan_unroll = True
    else:
        scan_unroll = next(uf for uf in (8, 4, 2, 1) if L % uf == 0)
    lax.fori_loop(0, L, body, jnp.zeros((bn, di), f32), unroll=scan_unroll)

    # y_t[c] = sum_s h_t[s, c] * C_t[s], for all t/b at once via one matmul.
    y = jnp.dot(S, hh_s[...] * c_col, preferred_element_type=f32)       # (BL, di)
    y = y + u * d_param_ref[...]
    y = y * _silu(res)
    mamba_out = jnp.dot(y.astype(bf16), w_out_ref[...],
                        preferred_element_type=f32)                     # (BL, D)

    # ---------------- residual + LN + fused first-2-experts MoE ------------
    x2 = mamba_out + x_ln
    x3 = _layer_norm(x2, eps)
    h_moe = jnp.maximum(
        jnp.dot(x3.astype(bf16), w_moe_a_ref[...],
                preferred_element_type=f32) + b_moe_a_ref[...], 0.0)    # (BL, 4D)
    moe = (jnp.dot(h_moe.astype(bf16), w_moe_b_ref[...],
                   preferred_element_type=f32) + b_moe_b_ref[...]) * 0.5
    o_ref[...] = (moe + skip).astype(o_ref.dtype)


def pack_params(params):
    """Fuse / cast module parameters into the kernel operand layout."""
    f32, bf16 = jnp.float32, jnp.bfloat16
    return {
        "w_in_x": params["w_in_x"].astype(bf16),
        "w_in_z": params["w_in_z"].astype(bf16),
        "conv_w": params["conv_w"].astype(f32),
        "conv_b": params["conv_b"].astype(f32),
        "w_x_dt": params["w_x_dt"].astype(bf16),
        "w_x_b": params["w_x_b"].astype(bf16),
        "w_x_c": params["w_x_c"].astype(bf16),
        "w_dt": params["w_dt"].astype(bf16),
        "b_dt": params["b_dt"].astype(f32),
        "a_log_t": jnp.transpose(params["a_log"]).astype(f32),  # (n, d_inner)
        "d_param": params["d_param"].astype(f32),
        "w_out": params["w_out"].astype(bf16),
        # fused first-2 experts:  [w0a | w1a]  and  [w0b ; w1b]
        "w_moe_a": jnp.concatenate([params["w0a"], params["w1a"]], 1).astype(bf16),
        "b_moe_a": jnp.concatenate([params["b0a"], params["b1a"]], 1).astype(f32),
        "w_moe_b": jnp.concatenate([params["w0b"], params["w1b"]], 0).astype(bf16),
        "b_moe_b": (params["b0b"] + params["b1b"]).astype(f32),
    }


def _scan_selectors(Bt, L, n):
    """Host-precomputed one-hot gather matrices for the expanded scan rows."""
    Q = Bt * L * n
    q = np.arange(Q)
    src_row = ((q // n) % Bt) * L + q // (Bt * n)     # b*L + t
    sel_r = (src_row[:, None] == np.arange(Bt * L)[None, :]).astype(np.float32)
    sel_m = ((q % n)[:, None] == np.arange(n)[None, :]).astype(np.float32)
    sel_s = np.ascontiguousarray(sel_r.T)             # (BL, Q)
    return jnp.asarray(sel_r), jnp.asarray(sel_m), jnp.asarray(sel_s)


def jamba_block(x, params, *, d_state, d_conv, batch_tile=None):
    B, L, D = x.shape
    d_inner = params["w_in_x"].shape[1]
    dt_rank = params["w_x_dt"].shape[1]
    n = d_state

    # Fold batch elements per grid step until the matmul M dim is ~128 rows.
    if batch_tile is None:
        batch_tile = max(1, min(B, max(1, 128 // L)))
    while B % batch_tile:
        batch_tile -= 1
    Bt = batch_tile
    BL = Bt * L
    Q = BL * n
    pad = max(8, -(-(d_conv - 1) // 8) * 8)     # sublane-aligned conv pad

    kp = pack_params(params)
    # Host-side scan constants: tiled -exp(A_log) and the one-hot selectors.
    a_rep = jnp.tile(-jnp.exp(kp["a_log_t"]), (BL, 1))          # (Q, d_inner) f32
    sel_r, sel_m, sel_s = _scan_selectors(Bt, L, n)

    operand_names = ["w_in_x", "w_in_z", "conv_w", "conv_b",
                     "w_x_dt", "w_x_b", "w_x_c", "w_dt", "b_dt",
                     "d_param", "w_out",
                     "w_moe_a", "b_moe_a", "w_moe_b", "b_moe_b"]
    operands = [kp[nm] for nm in operand_names] + [a_rep, sel_r, sel_m, sel_s]

    kernel = functools.partial(_jamba_kernel, Bt, L, d_inner, n, d_conv,
                               pad, 1e-5)

    def const_spec(arr):
        nd = arr.ndim
        return pl.BlockSpec(arr.shape, lambda g, _nd=nd: (0,) * _nd)

    x2d = x.reshape(B * L, D)
    in_specs = ([pl.BlockSpec((BL, D), lambda g: (g, 0))]
                + [const_spec(w) for w in operands])
    out_spec = pl.BlockSpec((BL, D), lambda g: (g, 0))

    scratch = [
        pltpu.VMEM((pad + BL, d_inner), jnp.float32),   # padded conv input
        pltpu.VMEM((Q, d_inner), jnp.float32),          # dA   (time-major)
        pltpu.VMEM((Q, d_inner), jnp.float32),          # dB*u (time-major)
        pltpu.VMEM((Q, d_inner), jnp.float32),          # h history
    ]

    operand_bytes = sum(int(w.size) * w.dtype.itemsize for w in operands)
    flops = 2 * B * L * (2 * D * d_inner
                         + d_inner * (dt_rank + 2 * n)
                         + dt_rank * d_inner
                         + 2 * d_inner * n
                         + d_inner * D
                         + 2 * (D * 2 * D) * 2)
    cost = pl.CostEstimate(
        flops=int(flops),
        transcendentals=int(B * L * d_inner * (n + 4)),
        bytes_accessed=int(operand_bytes + 2 * x.size * x.dtype.itemsize),
    )

    out2d = pl.pallas_call(
        kernel,
        out_shape=jax.ShapeDtypeStruct((B * L, D), x.dtype),
        grid_spec=pltpu.PrefetchScalarGridSpec(
            num_scalar_prefetch=0,
            grid=(B // Bt,),
            in_specs=in_specs,
            out_specs=out_spec,
            scratch_shapes=scratch,
        ),
        compiler_params=pltpu.CompilerParams(
            dimension_semantics=("parallel",),      # batch tiles independent
            vmem_limit_bytes=32 * 1024 * 1024,
        ),
        cost_estimate=cost,
    )(x2d, *operands)
    return out2d.reshape(B, L, D)


def init_params(key, dim, d_state, d_conv):
    d_inner = 2 * dim                       # expand = 2
    dt_rank = -(-dim // 16)                 # ceil(dim / 16)
    n = d_state
    keys = jax.random.split(key, 14)
    s = 0.02

    def nrm(k, shape):
        return s * jax.random.normal(k, shape, jnp.float32)

    return {
        # Mamba in_proj (split into x / z halves), stored transposed (in, out)
        "w_in_x": nrm(keys[0], (dim, d_inner)),
        "w_in_z": nrm(keys[1], (dim, d_inner)),
        # depthwise conv: (d_conv, d_inner) == Conv1d(di, di, K, groups=di) w.T
        "conv_w": nrm(keys[2], (d_conv, d_inner)),
        "conv_b": nrm(keys[3], (1, d_inner)),
        # x_proj split into dt / B / C columns, transposed
        "w_x_dt": nrm(keys[4], (d_inner, dt_rank)),
        "w_x_b": nrm(keys[5], (d_inner, n)),
        "w_x_c": nrm(keys[6], (d_inner, n)),
        # dt_proj
        "w_dt": nrm(keys[7], (dt_rank, d_inner)),
        "b_dt": nrm(keys[8], (1, d_inner)),
        # SSM A (A_log = log(arange(1..n))) and D (ones), as in Mamba init
        "a_log": jnp.log(jnp.broadcast_to(
            jnp.arange(1, n + 1, dtype=jnp.float32), (d_inner, n))),
        "d_param": jnp.ones((1, d_inner), jnp.float32),
        # out_proj
        "w_out": nrm(keys[9], (d_inner, dim)),
        # MoE experts 0 and 1 (FeedForward: dim -> 2*dim -> dim, ReLU)
        "w0a": nrm(keys[10], (dim, 2 * dim)),
        "b0a": jnp.zeros((1, 2 * dim), jnp.float32),
        "w0b": nrm(keys[11], (2 * dim, dim)),
        "b0b": jnp.zeros((1, dim), jnp.float32),
        "w1a": nrm(keys[12], (dim, 2 * dim)),
        "b1a": jnp.zeros((1, 2 * dim), jnp.float32),
        "w1b": nrm(keys[13], (2 * dim, dim)),
        "b1b": jnp.zeros((1, dim), jnp.float32),
    }


if __name__ == "__main__":
    dim, d_state, d_conv, heads = 32, 16, 4, 4   # heads unused by forward
    B, L = 2, 8

    key = jax.random.PRNGKey(0)
    kx, kp = jax.random.split(key)
    x = jax.random.normal(kx, (B, L, dim), jnp.float32)
    params = init_params(kp, dim, d_state, d_conv)

    out = jamba_block(x, params, d_state=d_state, d_conv=d_conv)
    jax.block_until_ready(out)

    assert out.shape == (B, L, dim)
    assert bool(jnp.all(jnp.isfinite(out)))
    print("KERNEL_OK")
</pallas_src>

<mosaic_0001>
module attributes {stable_mosaic.version = 11 : i64} {
  func.func @_jamba_kernel(%arg0: i32, %arg1: memref<16x32xf32, #tpu.memory_space<vmem>>, %arg2: memref<32x64xbf16, #tpu.memory_space<vmem>>, %arg3: memref<32x64xbf16, #tpu.memory_space<vmem>>, %arg4: memref<4x64xf32, #tpu.memory_space<vmem>>, %arg5: memref<1x64xf32, #tpu.memory_space<vmem>>, %arg6: memref<64x2xbf16, #tpu.memory_space<vmem>>, %arg7: memref<64x16xbf16, #tpu.memory_space<vmem>>, %arg8: memref<64x16xbf16, #tpu.memory_space<vmem>>, %arg9: memref<2x64xbf16, #tpu.memory_space<vmem>>, %arg10: memref<1x64xf32, #tpu.memory_space<vmem>>, %arg11: memref<1x64xf32, #tpu.memory_space<vmem>>, %arg12: memref<64x32xbf16, #tpu.memory_space<vmem>>, %arg13: memref<32x128xbf16, #tpu.memory_space<vmem>>, %arg14: memref<1x128xf32, #tpu.memory_space<vmem>>, %arg15: memref<128x32xbf16, #tpu.memory_space<vmem>>, %arg16: memref<1x32xf32, #tpu.memory_space<vmem>>, %arg17: memref<256x64xf32, #tpu.memory_space<vmem>>, %arg18: memref<256x16xf32, #tpu.memory_space<vmem>>, %arg19: memref<256x16xf32, #tpu.memory_space<vmem>>, %arg20: memref<16x256xf32, #tpu.memory_space<vmem>>, %arg21: memref<16x32xf32, #tpu.memory_space<vmem>>, %arg22: memref<24x64xf32, #tpu.memory_space<vmem>>, %arg23: memref<256x64xf32, #tpu.memory_space<vmem>>, %arg24: memref<256x64xf32, #tpu.memory_space<vmem>>, %arg25: memref<256x64xf32, #tpu.memory_space<vmem>>) attributes {dimension_semantics = [#tpu.dimension_semantics<parallel>], iteration_bounds = array<i64: 1>, scalar_prefetch = 0 : i64, scratch_operands = 4 : i64, tpu.core_type = #tpu.core_type<tc>, window_params = [{transform_indices = @transform_0, window_bounds = array<i64: 16, 32>}, {pipeline_mode = #tpu.pipeline_mode<synchronous>, transform_indices = @transform_1, window_bounds = array<i64: 32, 64>}, {pipeline_mode = #tpu.pipeline_mode<synchronous>, transform_indices = @transform_2, window_bounds = array<i64: 32, 64>}, {pipeline_mode = #tpu.pipeline_mode<synchronous>, transform_indices = @transform_3, window_bounds = array<i64: 4, 64>}, {pipeline_mode = #tpu.pipeline_mode<synchronous>, transform_indices = @transform_4, window_bounds = array<i64: 1, 64>}, {pipeline_mode = #tpu.pipeline_mode<synchronous>, transform_indices = @transform_5, window_bounds = array<i64: 64, 2>}, {pipeline_mode = #tpu.pipeline_mode<synchronous>, transform_indices = @transform_6, window_bounds = array<i64: 64, 16>}, {pipeline_mode = #tpu.pipeline_mode<synchronous>, transform_indices = @transform_7, window_bounds = array<i64: 64, 16>}, {pipeline_mode = #tpu.pipeline_mode<synchronous>, transform_indices = @transform_8, window_bounds = array<i64: 2, 64>}, {pipeline_mode = #tpu.pipeline_mode<synchronous>, transform_indices = @transform_9, window_bounds = array<i64: 1, 64>}, {pipeline_mode = #tpu.pipeline_mode<synchronous>, transform_indices = @transform_10, window_bounds = array<i64: 1, 64>}, {pipeline_mode = #tpu.pipeline_mode<synchronous>, transform_indices = @transform_11, window_bounds = array<i64: 64, 32>}, {pipeline_mode = #tpu.pipeline_mode<synchronous>, transform_indices = @transform_12, window_bounds = array<i64: 32, 128>}, {pipeline_mode = #tpu.pipeline_mode<synchronous>, transform_indices = @transform_13, window_bounds = array<i64: 1, 128>}, {pipeline_mode = #tpu.pipeline_mode<synchronous>, transform_indices = @transform_14, window_bounds = array<i64: 128, 32>}, {pipeline_mode = #tpu.pipeline_mode<synchronous>, transform_indices = @transform_15, window_bounds = array<i64: 1, 32>}, {pipeline_mode = #tpu.pipeline_mode<synchronous>, transform_indices = @transform_16, window_bounds = array<i64: 256, 64>}, {pipeline_mode = #tpu.pipeline_mode<synchronous>, transform_indices = @transform_17, window_bounds = array<i64: 256, 16>}, {pipeline_mode = #tpu.pipeline_mode<synchronous>, transform_indices = @transform_18, window_bounds = array<i64: 256, 16>}, {pipeline_mode = #tpu.pipeline_mode<synchronous>, transform_indices = @transform_19, window_bounds = array<i64: 16, 256>}, {transform_indices = @transform_20, window_bounds = array<i64: 16, 32>}]} {
    %c0 = arith.constant 0 : index
    %c0_0 = arith.constant 0 : index
    %0 = vector.load %arg1[%c0, %c0_0] : memref<16x32xf32, #tpu.memory_space<vmem>>, vector<16x32xf32>
    %cst = arith.constant dense<0.000000e+00> : vector<16xf32>
    %1 = vector.multi_reduction <add>, %0, %cst [1] : vector<16x32xf32> to vector<16xf32>
    %2 = vector.shape_cast %1 : vector<16xf32> to vector<16x1xf32>
    %cst_1 = arith.constant 3.200000e+01 : f32
    %3 = vector.broadcast %cst_1 : f32 to vector<16x1xf32>
    %4 = arith.divf %2, %3 : vector<16x1xf32>
    %5 = vector.broadcast %4 : vector<16x1xf32> to vector<16x32xf32>
    %6 = arith.subf %0, %5 : vector<16x32xf32>
    %7 = arith.mulf %6, %6 : vector<16x32xf32>
    %cst_2 = arith.constant dense<0.000000e+00> : vector<16xf32>
    %8 = vector.multi_reduction <add>, %7, %cst_2 [1] : vector<16x32xf32> to vector<16xf32>
    %9 = vector.shape_cast %8 : vector<16xf32> to vector<16x1xf32>
    %cst_3 = arith.constant 3.200000e+01 : f32
    %10 = vector.broadcast %cst_3 : f32 to vector<16x1xf32>
    %11 = arith.divf %9, %10 : vector<16x1xf32>
    %12 = vector.broadcast %4 : vector<16x1xf32> to vector<16x32xf32>
    %13 = arith.subf %0, %12 : vector<16x32xf32>
    %cst_4 = arith.constant 9.99999974E-6 : f32
    %14 = vector.broadcast %cst_4 : f32 to vector<16x1xf32>
    %15 = arith.addf %11, %14 : vector<16x1xf32>
    %16 = math.rsqrt %15 : vector<16x1xf32>
    %17 = vector.broadcast %16 : vector<16x1xf32> to vector<16x32xf32>
    %18 = arith.mulf %13, %17 : vector<16x32xf32>
    %19 = arith.truncf %18 : vector<16x32xf32> to vector<16x32xbf16>
    %c0_5 = arith.constant 0 : index
    %c0_6 = arith.constant 0 : index
    %20 = vector.load %arg2[%c0_5, %c0_6] : memref<32x64xbf16, #tpu.memory_space<vmem>>, vector<32x64xbf16>
    %cst_7 = arith.constant dense<0.000000e+00> : vector<16x64xf32>
    %21 = tpu.matmul %19, %20, %cst_7 {dimension_numbers = #tpu.dot_dimension_numbers<[1], [0], [0], [1], [0, 0, 1, 1], [], []>} : vector<16x32xbf16>, vector<32x64xbf16>, vector<16x64xf32> -> vector<16x64xf32>
    %c0_8 = arith.constant 0 : index
    %c0_9 = arith.constant 0 : index
    %22 = vector.load %arg3[%c0_8, %c0_9] : memref<32x64xbf16, #tpu.memory_space<vmem>>, vector<32x64xbf16>
    %cst_10 = arith.constant dense<0.000000e+00> : vector<16x64xf32>
    %23 = tpu.matmul %19, %22, %cst_10 {dimension_numbers = #tpu.dot_dimension_numbers<[1], [0], [0], [1], [0, 0, 1, 1], [], []>} : vector<16x32xbf16>, vector<32x64xbf16>, vector<16x64xf32> -> vector<16x64xf32>
    %cst_11 = arith.constant 0.000000e+00 : f32
    %24 = vector.broadcast %cst_11 : f32 to vector<8x64xf32>
    %c0_12 = arith.constant 0 : index
    %c0_13 = arith.constant 0 : index
    %25 = vector.load %arg22[%c0_12, %c0_13] : memref<24x64xf32, #tpu.memory_space<vmem>>, vector<8x64xf32>
    tpu.vector_store %arg22[%c0_12, %c0_13], %24 {strides = array<i32>} : memref<24x64xf32, #tpu.memory_space<vmem>>, vector<8x64xf32>,
    %c8 = arith.constant 8 : index
    %c0_14 = arith.constant 0 : index
    %26 = vector.load %arg22[%c8, %c0_14] : memref<24x64xf32, #tpu.memory_space<vmem>>, vector<16x64xf32>
    tpu.vector_store %arg22[%c8, %c0_14], %21 {strides = array<i32>} : memref<24x64xf32, #tpu.memory_space<vmem>>, vector<16x64xf32>,
    %27 = tpu.iota {dimensions = array<i32: 0>} : vector<16x1xi32>
    %c8_i32 = arith.constant 8 : i32
    %c0_i32 = arith.constant 0 : i32
    %28 = arith.cmpi eq, %c8_i32, %c0_i32 : i32
    %c1_i32 = arith.constant 1 : i32
    %29 = arith.select %28, %c1_i32, %c8_i32 : i32
    %30 = vector.broadcast %29 : i32 to vector<16x1xi32>
    %31 = arith.remsi %27, %30 : vector<16x1xi32>
    %c0_i32_15 = arith.constant 0 : i32
    %32 = vector.broadcast %c0_i32_15 : i32 to vector<16x1xi32>
    %33 = arith.cmpi ne, %31, %32 : vector<16x1xi32>
    %c0_i32_16 = arith.constant 0 : i32
    %34 = vector.broadcast %c0_i32_16 : i32 to vector<16x1xi32>
    %35 = arith.cmpi slt, %31, %34 : vector<16x1xi32>
    %c0_i32_17 = arith.constant 0 : i32
    %36 = arith.cmpi slt, %29, %c0_i32_17 : i32
    %37 = vector.broadcast %36 : i1 to vector<16x1xi1>
    %38 = vector.broadcast %37 : vector<16x1xi1> to vector<16x1xi1>
    %39 = arith.xori %35, %38 : vector<16x1xi1>
    %40 = arith.andi %39, %33 : vector<16x1xi1>
    %41 = vector.broadcast %29 : i32 to vector<16x1xi32>
    %42 = arith.addi %31, %41 : vector<16x1xi32>
    %43 = arith.select %40, %42, %31 : vector<16x1xi1>, vector<16x1xi32>
    %cst_18 = arith.constant 0.000000e+00 : f32
    %44 = vector.broadcast %cst_18 : f32 to vector<16x64xf32>
    %c5 = arith.constant 5 : index
    %c0_19 = arith.constant 0 : index
    %45 = vector.load %arg22[%c5, %c0_19] : memref<24x64xf32, #tpu.memory_space<vmem>>, vector<16x64xf32>
    %c3_i32 = arith.constant 3 : i32
    %46 = vector.broadcast %c3_i32 : i32 to vector<16x1xi32>
    %47 = arith.cmpi sge, %43, %46 : vector<16x1xi32>
    %cst_20 = arith.constant 0.000000e+00 : f32
    %48 = vector.shape_cast %47 : vector<16x1xi1> to vector<16x1xi1>
    %49 = vector.broadcast %48 : vector<16x1xi1> to vector<16x64xi1>
    %50 = vector.broadcast %cst_20 : f32 to vector<16x64xf32>
    %51 = arith.select %49, %45, %50 : vector<16x64xi1>, vector<16x64xf32>
    %c0_21 = arith.constant 0 : index
    %c0_22 = arith.constant 0 : index
    %52 = vector.load %arg4[%c0_21, %c0_22] : memref<4x64xf32, #tpu.memory_space<vmem>>, vector<1x64xf32>
    %53 = vector.broadcast %52 : vector<1x64xf32> to vector<16x64xf32>
    %54 = arith.mulf %51, %53 : vector<16x64xf32>
    %55 = arith.addf %44, %54 : vector<16x64xf32>
    %c6 = arith.constant 6 : index
    %c0_23 = arith.constant 0 : index
    %56 = vector.load %arg22[%c6, %c0_23] : memref<24x64xf32, #tpu.memory_space<vmem>>, vector<16x64xf32>
    %c2_i32 = arith.constant 2 : i32
    %57 = vector.broadcast %c2_i32 : i32 to vector<16x1xi32>
    %58 = arith.cmpi sge, %43, %57 : vector<16x1xi32>
    %cst_24 = arith.constant 0.000000e+00 : f32
    %59 = vector.shape_cast %58 : vector<16x1xi1> to vector<16x1xi1>
    %60 = vector.broadcast %59 : vector<16x1xi1> to vector<16x64xi1>
    %61 = vector.broadcast %cst_24 : f32 to vector<16x64xf32>
    %62 = arith.select %60, %56, %61 : vector<16x64xi1>, vector<16x64xf32>
    %c1 = arith.constant 1 : index
    %c0_25 = arith.constant 0 : index
    %63 = vector.load %arg4[%c1, %c0_25] : memref<4x64xf32, #tpu.memory_space<vmem>>, vector<1x64xf32>
    %64 = vector.broadcast %63 : vector<1x64xf32> to vector<16x64xf32>
    %65 = arith.mulf %62, %64 : vector<16x64xf32>
    %66 = arith.addf %55, %65 : vector<16x64xf32>
    %c7 = arith.constant 7 : index
    %c0_26 = arith.constant 0 : index
    %67 = vector.load %arg22[%c7, %c0_26] : memref<24x64xf32, #tpu.memory_space<vmem>>, vector<16x64xf32>
    %c1_i32_27 = arith.constant 1 : i32
    %68 = vector.broadcast %c1_i32_27 : i32 to vector<16x1xi32>
    %69 = arith.cmpi sge, %43, %68 : vector<16x1xi32>
    %cst_28 = arith.constant 0.000000e+00 : f32
    %70 = vector.shape_cast %69 : vector<16x1xi1> to vector<16x1xi1>
    %71 = vector.broadcast %70 : vector<16x1xi1> to vector<16x64xi1>
    %72 = vector.broadcast %cst_28 : f32 to vector<16x64xf32>
    %73 = arith.select %71, %67, %72 : vector<16x64xi1>, vector<16x64xf32>
    %c2 = arith.constant 2 : index
    %c0_29 = arith.constant 0 : index
    %74 = vector.load %arg4[%c2, %c0_29] : memref<4x64xf32, #tpu.memory_space<vmem>>, vector<1x64xf32>
    %75 = vector.broadcast %74 : vector<1x64xf32> to vector<16x64xf32>
    %76 = arith.mulf %73, %75 : vector<16x64xf32>
    %77 = arith.addf %66, %76 : vector<16x64xf32>
    %c8_30 = arith.constant 8 : index
    %c0_31 = arith.constant 0 : index
    %78 = vector.load %arg22[%c8_30, %c0_31] : memref<24x64xf32, #tpu.memory_space<vmem>>, vector<16x64xf32>
    %c3 = arith.constant 3 : index
    %c0_32 = arith.constant 0 : index
    %79 = vector.load %arg4[%c3, %c0_32] : memref<4x64xf32, #tpu.memory_space<vmem>>, vector<1x64xf32>
    %80 = vector.broadcast %79 : vector<1x64xf32> to vector<16x64xf32>
    %81 = arith.mulf %78, %80 : vector<16x64xf32>
    %82 = arith.addf %77, %81 : vector<16x64xf32>
    %c0_33 = arith.constant 0 : index
    %c0_34 = arith.constant 0 : index
    %83 = vector.load %arg5[%c0_33, %c0_34] : memref<1x64xf32, #tpu.memory_space<vmem>>, vector<1x64xf32>
    %84 = vector.broadcast %83 : vector<1x64xf32> to vector<16x64xf32>
    %85 = arith.addf %82, %84 : vector<16x64xf32>
    %86 = arith.negf %85 : vector<16x64xf32>
    %87 = math.exp %86 : vector<16x64xf32>
    %cst_35 = arith.constant 1.000000e+00 : f32
    %88 = vector.broadcast %cst_35 : f32 to vector<16x64xf32>
    %89 = arith.addf %88, %87 : vector<16x64xf32>
    %90 = arith.divf %88, %89 : vector<16x64xf32>
    %91 = arith.mulf %85, %90 : vector<16x64xf32>
    %92 = arith.truncf %91 : vector<16x64xf32> to vector<16x64xbf16>
    %c0_36 = arith.constant 0 : index
    %c0_37 = arith.constant 0 : index
    %93 = vector.load %arg6[%c0_36, %c0_37] : memref<64x2xbf16, #tpu.memory_space<vmem>>, vector<64x2xbf16>
    %cst_38 = arith.constant dense<0.000000e+00> : vector<16x2xf32>
    %94 = tpu.matmul %92, %93, %cst_38 {dimension_numbers = #tpu.dot_dimension_numbers<[1], [0], [0], [1], [0, 0, 1, 1], [], []>} : vector<16x64xbf16>, vector<64x2xbf16>, vector<16x2xf32> -> vector<16x2xf32>
    %c0_39 = arith.constant 0 : index
    %c0_40 = arith.constant 0 : index
    %95 = vector.load %arg7[%c0_39, %c0_40] : memref<64x16xbf16, #tpu.memory_space<vmem>>, vector<64x16xbf16>
    %cst_41 = arith.constant dense<0.000000e+00> : vector<16x16xf32>
    %96 = tpu.matmul %92, %95, %cst_41 {dimension_numbers = #tpu.dot_dimension_numbers<[1], [0], [0], [1], [0, 0, 1, 1], [], []>} : vector<16x64xbf16>, vector<64x16xbf16>, vector<16x16xf32> -> vector<16x16xf32>
    %c0_42 = arith.constant 0 : index
    %c0_43 = arith.constant 0 : index
    %97 = vector.load %arg8[%c0_42, %c0_43] : memref<64x16xbf16, #tpu.memory_space<vmem>>, vector<64x16xbf16>
    %cst_44 = arith.constant dense<0.000000e+00> : vector<16x16xf32>
    %98 = tpu.matmul %92, %97, %cst_44 {dimension_numbers = #tpu.dot_dimension_numbers<[1], [0], [0], [1], [0, 0, 1, 1], [], []>} : vector<16x64xbf16>, vector<64x16xbf16>, vector<16x16xf32> -> vector<16x16xf32>
    %99 = arith.truncf %94 : vector<16x2xf32> to vector<16x2xbf16>
    %c0_45 = arith.constant 0 : index
    %c0_46 = arith.constant 0 : index
    %100 = vector.load %arg9[%c0_45, %c0_46] : memref<2x64xbf16, #tpu.memory_space<vmem>>, vector<2x64xbf16>
    %cst_47 = arith.constant dense<0.000000e+00> : vector<16x64xf32>
    %101 = tpu.matmul %99, %100, %cst_47 {dimension_numbers = #tpu.dot_dimension_numbers<[1], [0], [0], [1], [0, 0, 1, 1], [], []>} : vector<16x2xbf16>, vector<2x64xbf16>, vector<16x64xf32> -> vector<16x64xf32>
    %c0_48 = arith.constant 0 : index
    %c0_49 = arith.constant 0 : index
    %102 = vector.load %arg10[%c0_48, %c0_49] : memref<1x64xf32, #tpu.memory_space<vmem>>, vector<1x64xf32>
    %103 = vector.broadcast %102 : vector<1x64xf32> to vector<16x64xf32>
    %104 = arith.addf %101, %103 : vector<16x64xf32>
    %cst_50 = arith.constant 0.000000e+00 : f32
    %105 = vector.broadcast %cst_50 : f32 to vector<16x64xf32>
    %106 = arith.maximumf %104, %105 : vector<16x64xf32>
    %107 = vector.broadcast %cst_50 : f32 to vector<16x64xf32>
    %108 = arith.subf %104, %107 : vector<16x64xf32>
    %109 = arith.cmpf one, %108, %108 : vector<16x64xf32>
    %110 = vector.broadcast %cst_50 : f32 to vector<16x64xf32>
    %111 = arith.addf %104, %110 : vector<16x64xf32>
    %112 = math.absf %108 : vector<16x64xf32>
    %cst_51 = arith.constant 0.000000e+00 : f32
    %113 = vector.broadcast %cst_51 : f32 to vector<16x64xf32>
    %114 = arith.subf %113, %112 : vector<16x64xf32>
    %115 = math.exp %114 : vector<16x64xf32>
    %116 = math.log1p %115 : vector<16x64xf32>
    %117 = arith.addf %106, %116 : vector<16x64xf32>
    %118 = arith.select %109, %111, %117 : vector<16x64xi1>, vector<16x64xf32>
    %c0_52 = arith.constant 0 : index
    %c0_53 = arith.constant 0 : index
    %119 = vector.load %arg18[%c0_52, %c0_53] : memref<256x16xf32, #tpu.memory_space<vmem>>, vector<256x16xf32>
    %c0_54 = arith.constant 0 : index
    %c0_55 = arith.constant 0 : index
    %120 = vector.load %arg19[%c0_54, %c0_55] : memref<256x16xf32, #tpu.memory_space<vmem>>, vector<256x16xf32>
    %c0_56 = arith.constant 0 : index
    %c0_57 = arith.constant 0 : index
    %121 = vector.load %arg20[%c0_56, %c0_57] : memref<16x256xf32, #tpu.memory_space<vmem>>, vector<16x256xf32>
    %c0_58 = arith.constant 0 : index
    %c0_59 = arith.constant 0 : index
    %122 = vector.load %arg17[%c0_58, %c0_59] : memref<256x64xf32, #tpu.memory_space<vmem>>, vector<256x64xf32>
    %cst_60 = arith.constant dense<0.000000e+00> : vector<256x64xf32>
    %123 = tpu.matmul %119, %118, %cst_60 {dimension_numbers = #tpu.dot_dimension_numbers<[1], [0], [0], [1], [0, 0, 1, 1], [], []>} : vector<256x16xf32>, vector<16x64xf32>, vector<256x64xf32> -> vector<256x64xf32>
    %124 = arith.mulf %118, %91 : vector<16x64xf32>
    %cst_61 = arith.constant dense<0.000000e+00> : vector<256x64xf32>
    %125 = tpu.matmul %119, %124, %cst_61 {dimension_numbers = #tpu.dot_dimension_numbers<[1], [0], [0], [1], [0, 0, 1, 1], [], []>} : vector<256x16xf32>, vector<16x64xf32>, vector<256x64xf32> -> vector<256x64xf32>
    %cst_62 = arith.constant dense<0.000000e+00> : vector<256x16xf32>
    %126 = tpu.matmul %119, %96, %cst_62 {dimension_numbers = #tpu.dot_dimension_numbers<[1], [0], [0], [1], [0, 0, 1, 1], [], []>} : vector<256x16xf32>, vector<16x16xf32>, vector<256x16xf32> -> vector<256x16xf32>
    %127 = arith.mulf %126, %120 : vector<256x16xf32>
    %cst_63 = arith.constant dense<0.000000e+00> : vector<256xf32>
    %128 = vector.multi_reduction <add>, %127, %cst_63 [1] : vector<256x16xf32> to vector<256xf32>
    %129 = vector.shape_cast %128 : vector<256xf32> to vector<256x1xf32>
    %cst_64 = arith.constant dense<0.000000e+00> : vector<256x16xf32>
    %130 = tpu.matmul %119, %98, %cst_64 {dimension_numbers = #tpu.dot_dimension_numbers<[1], [0], [0], [1], [0, 0, 1, 1], [], []>} : vector<256x16xf32>, vector<16x16xf32>, vector<256x16xf32> -> vector<256x16xf32>
    %131 = arith.mulf %130, %120 : vector<256x16xf32>
    %cst_65 = arith.constant dense<0.000000e+00> : vector<256xf32>
    %132 = vector.multi_reduction <add>, %131, %cst_65 [1] : vector<256x16xf32> to vector<256xf32>
    %133 = vector.shape_cast %132 : vector<256xf32> to vector<256x1xf32>
    %134 = arith.mulf %123, %122 : vector<256x64xf32>
    %135 = math.exp %134 : vector<256x64xf32>
    %c0_66 = arith.constant 0 : index
    %c0_67 = arith.constant 0 : index
    %136 = vector.load %arg23[%c0_66, %c0_67] : memref<256x64xf32, #tpu.memory_space<vmem>>, vector<256x64xf32>
    tpu.vector_store %arg23[%c0_66, %c0_67], %135 {strides = array<i32>} : memref<256x64xf32, #tpu.memory_space<vmem>>, vector<256x64xf32>,
    %137 = vector.broadcast %129 : vector<256x1xf32> to vector<256x64xf32>
    %138 = arith.mulf %125, %137 : vector<256x64xf32>
    %c0_68 = arith.constant 0 : index
    %c0_69 = arith.constant 0 : index
    %139 = vector.load %arg24[%c0_68, %c0_69] : memref<256x64xf32, #tpu.memory_space<vmem>>, vector<256x64xf32>
    tpu.vector_store %arg24[%c0_68, %c0_69], %138 {strides = array<i32>} : memref<256x64xf32, #tpu.memory_space<vmem>>, vector<256x64xf32>,
    %cst_70 = arith.constant 0.000000e+00 : f32
    %140 = vector.broadcast %cst_70 : f32 to vector<32x64xf32>
    %c0_i32_71 = arith.constant 0 : i32
    %c32_i32 = arith.constant 32 : i32
    %141 = arith.muli %c0_i32_71, %c32_i32 : i32
    %142 = tpu.assume_multiple %141, 32 : i32
    %143 = arith.index_cast %142 : i32 to index
    %c0_72 = arith.constant 0 : index
    %144 = vector.load %arg23[%143, %c0_72] : memref<256x64xf32, #tpu.memory_space<vmem>>, vector<32x64xf32>
    %145 = arith.mulf %144, %140 : vector<32x64xf32>
    %146 = arith.index_cast %142 : i32 to index
    %c0_73 = arith.constant 0 : index
    %147 = vector.load %arg24[%146, %c0_73] : memref<256x64xf32, #tpu.memory_space<vmem>>, vector<32x64xf32>
    %148 = arith.addf %145, %147 : vector<32x64xf32>
    %149 = arith.index_cast %142 : i32 to index
    %c0_74 = arith.constant 0 : index
    %150 = vector.load %arg25[%149, %c0_74] : memref<256x64xf32, #tpu.memory_space<vmem>>, vector<32x64xf32>
    tpu.vector_store %arg25[%149, %c0_74], %148 {strides = array<i32>} : memref<256x64xf32, #tpu.memory_space<vmem>>, vector<32x64xf32>,
    %c1_i32_75 = arith.constant 1 : i32
    %c32_i32_76 = arith.constant 32 : i32
    %151 = arith.muli %c1_i32_75, %c32_i32_76 : i32
    %152 = tpu.assume_multiple %151, 32 : i32
    %153 = arith.index_cast %152 : i32 to index
    %c0_77 = arith.constant 0 : index
    %154 = vector.load %arg23[%153, %c0_77] : memref<256x64xf32, #tpu.memory_space<vmem>>, vector<32x64xf32>
    %155 = arith.mulf %154, %148 : vector<32x64xf32>
    %156 = arith.index_cast %152 : i32 to index
    %c0_78 = arith.constant 0 : index
    %157 = vector.load %arg24[%156, %c0_78] : memref<256x64xf32, #tpu.memory_space<vmem>>, vector<32x64xf32>
    %158 = arith.addf %155, %157 : vector<32x64xf32>
    %159 = arith.index_cast %152 : i32 to index
    %c0_79 = arith.constant 0 : index
    %160 = vector.load %arg25[%159, %c0_79] : memref<256x64xf32, #tpu.memory_space<vmem>>, vector<32x64xf32>
    tpu.vector_store %arg25[%159, %c0_79], %158 {strides = array<i32>} : memref<256x64xf32, #tpu.memory_space<vmem>>, vector<32x64xf32>,
    %c2_i32_80 = arith.constant 2 : i32
    %c32_i32_81 = arith.constant 32 : i32
    %161 = arith.muli %c2_i32_80, %c32_i32_81 : i32
    %162 = tpu.assume_multiple %161, 32 : i32
    %163 = arith.index_cast %162 : i32 to index
    %c0_82 = arith.constant 0 : index
    %164 = vector.load %arg23[%163, %c0_82] : memref<256x64xf32, #tpu.memory_space<vmem>>, vector<32x64xf32>
    %165 = arith.mulf %164, %158 : vector<32x64xf32>
    %166 = arith.index_cast %162 : i32 to index
    %c0_83 = arith.constant 0 : index
    %167 = vector.load %arg24[%166, %c0_83] : memref<256x64xf32, #tpu.memory_space<vmem>>, vector<32x64xf32>
    %168 = arith.addf %165, %167 : vector<32x64xf32>
    %169 = arith.index_cast %162 : i32 to index
    %c0_84 = arith.constant 0 : index
    %170 = vector.load %arg25[%169, %c0_84] : memref<256x64xf32, #tpu.memory_space<vmem>>, vector<32x64xf32>
    tpu.vector_store %arg25[%169, %c0_84], %168 {strides = array<i32>} : memref<256x64xf32, #tpu.memory_space<vmem>>, vector<32x64xf32>,
    %c3_i32_85 = arith.constant 3 : i32
    %c32_i32_86 = arith.constant 32 : i32
    %171 = arith.muli %c3_i32_85, %c32_i32_86 : i32
    %172 = tpu.assume_multiple %171, 32 : i32
    %173 = arith.index_cast %172 : i32 to index
    %c0_87 = arith.constant 0 : index
    %174 = vector.load %arg23[%173, %c0_87] : memref<256x64xf32, #tpu.memory_space<vmem>>, vector<32x64xf32>
    %175 = arith.mulf %174, %168 : vector<32x64xf32>
    %176 = arith.index_cast %172 : i32 to index
    %c0_88 = arith.constant 0 : index
    %177 = vector.load %arg24[%176, %c0_88] : memref<256x64xf32, #tpu.memory_space<vmem>>, vector<32x64xf32>
    %178 = arith.addf %175, %177 : vector<32x64xf32>
    %179 = arith.index_cast %172 : i32 to index
    %c0_89 = arith.constant 0 : index
    %180 = vector.load %arg25[%179, %c0_89] : memref<256x64xf32, #tpu.memory_space<vmem>>, vector<32x64xf32>
    tpu.vector_store %arg25[%179, %c0_89], %178 {strides = array<i32>} : memref<256x64xf32, #tpu.memory_space<vmem>>, vector<32x64xf32>,
    %c4_i32 = arith.constant 4 : i32
    %c32_i32_90 = arith.constant 32 : i32
    %181 = arith.muli %c4_i32, %c32_i32_90 : i32
    %182 = tpu.assume_multiple %181, 32 : i32
    %183 = arith.index_cast %182 : i32 to index
    %c0_91 = arith.constant 0 : index
    %184 = vector.load %arg23[%183, %c0_91] : memref<256x64xf32, #tpu.memory_space<vmem>>, vector<32x64xf32>
    %185 = arith.mulf %184, %178 : vector<32x64xf32>
    %186 = arith.index_cast %182 : i32 to index
    %c0_92 = arith.constant 0 : index
    %187 = vector.load %arg24[%186, %c0_92] : memref<256x64xf32, #tpu.memory_space<vmem>>, vector<32x64xf32>
    %188 = arith.addf %185, %187 : vector<32x64xf32>
    %189 = arith.index_cast %182 : i32 to index
    %c0_93 = arith.constant 0 : index
    %190 = vector.load %arg25[%189, %c0_93] : memref<256x64xf32, #tpu.memory_space<vmem>>, vector<32x64xf32>
    tpu.vector_store %arg25[%189, %c0_93], %188 {strides = array<i32>} : memref<256x64xf32, #tpu.memory_space<vmem>>, vector<32x64xf32>,
    %c5_i32 = arith.constant 5 : i32
    %c32_i32_94 = arith.constant 32 : i32
    %191 = arith.muli %c5_i32, %c32_i32_94 : i32
    %192 = tpu.assume_multiple %191, 32 : i32
    %193 = arith.index_cast %192 : i32 to index
    %c0_95 = arith.constant 0 : index
    %194 = vector.load %arg23[%193, %c0_95] : memref<256x64xf32, #tpu.memory_space<vmem>>, vector<32x64xf32>
    %195 = arith.mulf %194, %188 : vector<32x64xf32>
    %196 = arith.index_cast %192 : i32 to index
    %c0_96 = arith.constant 0 : index
    %197 = vector.load %arg24[%196, %c0_96] : memref<256x64xf32, #tpu.memory_space<vmem>>, vector<32x64xf32>
    %198 = arith.addf %195, %197 : vector<32x64xf32>
    %199 = arith.index_cast %192 : i32 to index
    %c0_97 = arith.constant 0 : index
    %200 = vector.load %arg25[%199, %c0_97] : memref<256x64xf32, #tpu.memory_space<vmem>>, vector<32x64xf32>
    tpu.vector_store %arg25[%199, %c0_97], %198 {strides = array<i32>} : memref<256x64xf32, #tpu.memory_space<vmem>>, vector<32x64xf32>,
    %c6_i32 = arith.constant 6 : i32
    %c32_i32_98 = arith.constant 32 : i32
    %201 = arith.muli %c6_i32, %c32_i32_98 : i32
    %202 = tpu.assume_multiple %201, 32 : i32
    %203 = arith.index_cast %202 : i32 to index
    %c0_99 = arith.constant 0 : index
    %204 = vector.load %arg23[%203, %c0_99] : memref<256x64xf32, #tpu.memory_space<vmem>>, vector<32x64xf32>
    %205 = arith.mulf %204, %198 : vector<32x64xf32>
    %206 = arith.index_cast %202 : i32 to index
    %c0_100 = arith.constant 0 : index
    %207 = vector.load %arg24[%206, %c0_100] : memref<256x64xf32, #tpu.memory_space<vmem>>, vector<32x64xf32>
    %208 = arith.addf %205, %207 : vector<32x64xf32>
    %209 = arith.index_cast %202 : i32 to index
    %c0_101 = arith.constant 0 : index
    %210 = vector.load %arg25[%209, %c0_101] : memref<256x64xf32, #tpu.memory_space<vmem>>, vector<32x64xf32>
    tpu.vector_store %arg25[%209, %c0_101], %208 {strides = array<i32>} : memref<256x64xf32, #tpu.memory_space<vmem>>, vector<32x64xf32>,
    %c7_i32 = arith.constant 7 : i32
    %c32_i32_102 = arith.constant 32 : i32
    %211 = arith.muli %c7_i32, %c32_i32_102 : i32
    %212 = tpu.assume_multiple %211, 32 : i32
    %213 = arith.index_cast %212 : i32 to index
    %c0_103 = arith.constant 0 : index
    %214 = vector.load %arg23[%213, %c0_103] : memref<256x64xf32, #tpu.memory_space<vmem>>, vector<32x64xf32>
    %215 = arith.mulf %214, %208 : vector<32x64xf32>
    %216 = arith.index_cast %212 : i32 to index
    %c0_104 = arith.constant 0 : index
    %217 = vector.load %arg24[%216, %c0_104] : memref<256x64xf32, #tpu.memory_space<vmem>>, vector<32x64xf32>
    %218 = arith.addf %215, %217 : vector<32x64xf32>
    %219 = arith.index_cast %212 : i32 to index
    %c0_105 = arith.constant 0 : index
    %220 = vector.load %arg25[%219, %c0_105] : memref<256x64xf32, #tpu.memory_space<vmem>>, vector<32x64xf32>
    tpu.vector_store %arg25[%219, %c0_105], %218 {strides = array<i32>} : memref<256x64xf32, #tpu.memory_space<vmem>>, vector<32x64xf32>,
    %c8_i32_106 = arith.constant 8 : i32
    %c0_107 = arith.constant 0 : index
    %c0_108 = arith.constant 0 : index
    %221 = vector.load %arg25[%c0_107, %c0_108] : memref<256x64xf32, #tpu.memory_space<vmem>>, vector<256x64xf32>
    %222 = vector.broadcast %133 : vector<256x1xf32> to vector<256x64xf32>
    %223 = arith.mulf %221, %222 : vector<256x64xf32>
    %cst_109 = arith.constant dense<0.000000e+00> : vector<16x64xf32>
    %224 = tpu.matmul %121, %223, %cst_109 {dimension_numbers = #tpu.dot_dimension_numbers<[1], [0], [0], [1], [0, 0, 1, 1], [], []>} : vector<16x256xf32>, vector<256x64xf32>, vector<16x64xf32> -> vector<16x64xf32>
    %c0_110 = arith.constant 0 : index
    %c0_111 = arith.constant 0 : index
    %225 = vector.load %arg11[%c0_110, %c0_111] : memref<1x64xf32, #tpu.memory_space<vmem>>, vector<1x64xf32>
    %226 = vector.broadcast %225 : vector<1x64xf32> to vector<16x64xf32>
    %227 = arith.mulf %91, %226 : vector<16x64xf32>
    %228 = arith.addf %224, %227 : vector<16x64xf32>
    %229 = arith.negf %23 : vector<16x64xf32>
    %230 = math.exp %229 : vector<16x64xf32>
    %cst_112 = arith.constant 1.000000e+00 : f32
    %231 = vector.broadcast %cst_112 : f32 to vector<16x64xf32>
    %232 = arith.addf %231, %230 : vector<16x64xf32>
    %233 = arith.divf %231, %232 : vector<16x64xf32>
    %234 = arith.mulf %23, %233 : vector<16x64xf32>
    %235 = arith.mulf %228, %234 : vector<16x64xf32>
    %236 = arith.truncf %235 : vector<16x64xf32> to vector<16x64xbf16>
    %c0_113 = arith.constant 0 : index
    %c0_114 = arith.constant 0 : index
    %237 = vector.load %arg12[%c0_113, %c0_114] : memref<64x32xbf16, #tpu.memory_space<vmem>>, vector<64x32xbf16>
    %cst_115 = arith.constant dense<0.000000e+00> : vector<16x32xf32>
    %238 = tpu.matmul %236, %237, %cst_115 {dimension_numbers = #tpu.dot_dimension_numbers<[1], [0], [0], [1], [0, 0, 1, 1], [], []>} : vector<16x64xbf16>, vector<64x32xbf16>, vector<16x32xf32> -> vector<16x32xf32>
    %239 = arith.addf %238, %18 : vector<16x32xf32>
    %cst_116 = arith.constant dense<0.000000e+00> : vector<16xf32>
    %240 = vector.multi_reduction <add>, %239, %cst_116 [1] : vector<16x32xf32> to vector<16xf32>
    %241 = vector.shape_cast %240 : vector<16xf32> to vector<16x1xf32>
    %cst_117 = arith.constant 3.200000e+01 : f32
    %242 = vector.broadcast %cst_117 : f32 to vector<16x1xf32>
    %243 = arith.divf %241, %242 : vector<16x1xf32>
    %244 = vector.broadcast %243 : vector<16x1xf32> to vector<16x32xf32>
    %245 = arith.subf %239, %244 : vector<16x32xf32>
    %246 = arith.mulf %245, %245 : vector<16x32xf32>
    %cst_118 = arith.constant dense<0.000000e+00> : vector<16xf32>
    %247 = vector.multi_reduction <add>, %246, %cst_118 [1] : vector<16x32xf32> to vector<16xf32>
    %248 = vector.shape_cast %247 : vector<16xf32> to vector<16x1xf32>
    %cst_119 = arith.constant 3.200000e+01 : f32
    %249 = vector.broadcast %cst_119 : f32 to vector<16x1xf32>
    %250 = arith.divf %248, %249 : vector<16x1xf32>
    %251 = vector.broadcast %243 : vector<16x1xf32> to vector<16x32xf32>
    %252 = arith.subf %239, %251 : vector<16x32xf32>
    %cst_120 = arith.constant 9.99999974E-6 : f32
    %253 = vector.broadcast %cst_120 : f32 to vector<16x1xf32>
    %254 = arith.addf %250, %253 : vector<16x1xf32>
    %255 = math.rsqrt %254 : vector<16x1xf32>
    %256 = vector.broadcast %255 : vector<16x1xf32> to vector<16x32xf32>
    %257 = arith.mulf %252, %256 : vector<16x32xf32>
    %258 = arith.truncf %257 : vector<16x32xf32> to vector<16x32xbf16>
    %c0_121 = arith.constant 0 : index
    %c0_122 = arith.constant 0 : index
    %259 = vector.load %arg13[%c0_121, %c0_122] : memref<32x128xbf16, #tpu.memory_space<vmem>>, vector<32x128xbf16>
    %cst_123 = arith.constant dense<0.000000e+00> : vector<16x128xf32>
    %260 = tpu.matmul %258, %259, %cst_123 {dimension_numbers = #tpu.dot_dimension_numbers<[1], [0], [0], [1], [0, 0, 1, 1], [], []>} : vector<16x32xbf16>, vector<32x128xbf16>, vector<16x128xf32> -> vector<16x128xf32>
    %c0_124 = arith.constant 0 : index
    %c0_125 = arith.constant 0 : index
    %261 = vector.load %arg14[%c0_124, %c0_125] : memref<1x128xf32, #tpu.memory_space<vmem>>, vector<1x128xf32>
    %262 = vector.broadcast %261 : vector<1x128xf32> to vector<16x128xf32>
    %263 = arith.addf %260, %262 : vector<16x128xf32>
    %cst_126 = arith.constant 0.000000e+00 : f32
    %264 = vector.broadcast %cst_126 : f32 to vector<16x128xf32>
    %265 = arith.maximumf %263, %264 : vector<16x128xf32>
    %266 = arith.truncf %265 : vector<16x128xf32> to vector<16x128xbf16>
    %c0_127 = arith.constant 0 : index
    %c0_128 = arith.constant 0 : index
    %267 = vector.load %arg15[%c0_127, %c0_128] : memref<128x32xbf16, #tpu.memory_space<vmem>>, vector<128x32xbf16>
    %cst_129 = arith.constant dense<0.000000e+00> : vector<16x32xf32>
    %268 = tpu.matmul %266, %267, %cst_129 {dimension_numbers = #tpu.dot_dimension_numbers<[1], [0], [0], [1], [0, 0, 1, 1], [], []>} : vector<16x128xbf16>, vector<128x32xbf16>, vector<16x32xf32> -> vector<16x32xf32>
    %c0_130 = arith.constant 0 : index
    %c0_131 = arith.constant 0 : index
    %269 = vector.load %arg16[%c0_130, %c0_131] : memref<1x32xf32, #tpu.memory_space<vmem>>, vector<1x32xf32>
    %270 = vector.broadcast %269 : vector<1x32xf32> to vector<16x32xf32>
    %271 = arith.addf %268, %270 : vector<16x32xf32>
    %cst_132 = arith.constant 5.000000e-01 : f32
    %272 = vector.broadcast %cst_132 : f32 to vector<16x32xf32>
    %273 = arith.mulf %271, %272 : vector<16x32xf32>
    %274 = arith.addf %273, %0 : vector<16x32xf32>
    %c0_133 = arith.constant 0 : index
    %c0_134 = arith.constant 0 : index
    %275 = vector.load %arg21[%c0_133, %c0_134] : memref<16x32xf32, #tpu.memory_space<vmem>>, vector<16x32xf32>
    tpu.vector_store %arg21[%c0_133, %c0_134], %274 {strides = array<i32>} : memref<16x32xf32, #tpu.memory_space<vmem>>, vector<16x32xf32>,
    return
  }
  func.func @transform_0(%arg0: i32) -> (i32, i32) {
    %c0_i32 = arith.constant 0 : i32
    %c0_i32_0 = arith.constant 0 : i32
    return %arg0, %c0_i32 : i32, i32
  }
  func.func @transform_1(%arg0: i32) -> (i32, i32) {
    %c0_i32 = arith.constant 0 : i32
    %c0_i32_0 = arith.constant 0 : i32
    %c0_i32_1 = arith.constant 0 : i32
    return %c0_i32, %c0_i32_0 : i32, i32
  }
  func.func @transform_2(%arg0: i32) -> (i32, i32) {
    %c0_i32 = arith.constant 0 : i32
    %c0_i32_0 = arith.constant 0 : i32
    %c0_i32_1 = arith.constant 0 : i32
    return %c0_i32, %c0_i32_0 : i32, i32
  }
  func.func @transform_3(%arg0: i32) -> (i32, i32) {
    %c0_i32 = arith.constant 0 : i32
    %c0_i32_0 = arith.constant 0 : i32
    %c0_i32_1 = arith.constant 0 : i32
    return %c0_i32, %c0_i32_0 : i32, i32
  }
  func.func @transform_4(%arg0: i32) -> (i32, i32) {
    %c0_i32 = arith.constant 0 : i32
    %c0_i32_0 = arith.constant 0 : i32
    %c0_i32_1 = arith.constant 0 : i32
    return %c0_i32, %c0_i32_0 : i32, i32
  }
  func.func @transform_5(%arg0: i32) -> (i32, i32) {
    %c0_i32 = arith.constant 0 : i32
    %c0_i32_0 = arith.constant 0 : i32
    %c0_i32_1 = arith.constant 0 : i32
    return %c0_i32, %c0_i32_0 : i32, i32
  }
  func.func @transform_6(%arg0: i32) -> (i32, i32) {
    %c0_i32 = arith.constant 0 : i32
    %c0_i32_0 = arith.constant 0 : i32
    %c0_i32_1 = arith.constant 0 : i32
    return %c0_i32, %c0_i32_0 : i32, i32
  }
  func.func @transform_7(%arg0: i32) -> (i32, i32) {
    %c0_i32 = arith.constant 0 : i32
    %c0_i32_0 = arith.constant 0 : i32
    %c0_i32_1 = arith.constant 0 : i32
    return %c0_i32, %c0_i32_0 : i32, i32
  }
  func.func @transform_8(%arg0: i32) -> (i32, i32) {
    %c0_i32 = arith.constant 0 : i32
    %c0_i32_0 = arith.constant 0 : i32
    %c0_i32_1 = arith.constant 0 : i32
    return %c0_i32, %c0_i32_0 : i32, i32
  }
  func.func @transform_9(%arg0: i32) -> (i32, i32) {
    %c0_i32 = arith.constant 0 : i32
    %c0_i32_0 = arith.constant 0 : i32
    %c0_i32_1 = arith.constant 0 : i32
    return %c0_i32, %c0_i32_0 : i32, i32
  }
  func.func @transform_10(%arg0: i32) -> (i32, i32) {
    %c0_i32 = arith.constant 0 : i32
    %c0_i32_0 = arith.constant 0 : i32
    %c0_i32_1 = arith.constant 0 : i32
    return %c0_i32, %c0_i32_0 : i32, i32
  }
  func.func @transform_11(%arg0: i32) -> (i32, i32) {
    %c0_i32 = arith.constant 0 : i32
    %c0_i32_0 = arith.constant 0 : i32
    %c0_i32_1 = arith.constant 0 : i32
    return %c0_i32, %c0_i32_0 : i32, i32
  }
  func.func @transform_12(%arg0: i32) -> (i32, i32) {
    %c0_i32 = arith.constant 0 : i32
    %c0_i32_0 = arith.constant 0 : i32
    %c0_i32_1 = arith.constant 0 : i32
    return %c0_i32, %c0_i32_0 : i32, i32
  }
  func.func @transform_13(%arg0: i32) -> (i32, i32) {
    %c0_i32 = arith.constant 0 : i32
    %c0_i32_0 = arith.constant 0 : i32
    %c0_i32_1 = arith.constant 0 : i32
    return %c0_i32, %c0_i32_0 : i32, i32
  }
  func.func @transform_14(%arg0: i32) -> (i32, i32) {
    %c0_i32 = arith.constant 0 : i32
    %c0_i32_0 = arith.constant 0 : i32
    %c0_i32_1 = arith.constant 0 : i32
    return %c0_i32, %c0_i32_0 : i32, i32
  }
  func.func @transform_15(%arg0: i32) -> (i32, i32) {
    %c0_i32 = arith.constant 0 : i32
    %c0_i32_0 = arith.constant 0 : i32
    %c0_i32_1 = arith.constant 0 : i32
    return %c0_i32, %c0_i32_0 : i32, i32
  }
  func.func @transform_16(%arg0: i32) -> (i32, i32) {
    %c0_i32 = arith.constant 0 : i32
    %c0_i32_0 = arith.constant 0 : i32
    %c0_i32_1 = arith.constant 0 : i32
    return %c0_i32, %c0_i32_0 : i32, i32
  }
  func.func @transform_17(%arg0: i32) -> (i32, i32) {
    %c0_i32 = arith.constant 0 : i32
    %c0_i32_0 = arith.constant 0 : i32
    %c0_i32_1 = arith.constant 0 : i32
    return %c0_i32, %c0_i32_0 : i32, i32
  }
  func.func @transform_18(%arg0: i32) -> (i32, i32) {
    %c0_i32 = arith.constant 0 : i32
    %c0_i32_0 = arith.constant 0 : i32
    %c0_i32_1 = arith.constant 0 : i32
    return %c0_i32, %c0_i32_0 : i32, i32
  }
  func.func @transform_19(%arg0: i32) -> (i32, i32) {
    %c0_i32 = arith.constant 0 : i32
    %c0_i32_0 = arith.constant 0 : i32
    %c0_i32_1 = arith.constant 0 : i32
    return %c0_i32, %c0_i32_0 : i32, i32
  }
  func.func @transform_20(%arg0: i32) -> (i32, i32) {
    %c0_i32 = arith.constant 0 : i32
    %c0_i32_0 = arith.constant 0 : i32
    return %arg0, %c0_i32 : i32, i32
  }
}

</mosaic_0001>

<bundles_post_ra>
// kernel: tpu_custom_call.1
= control target key start
LH: loop header
LB: loop body
LE: loop exit
PB: predicated region body
PF: predicated region fallthrough
CT: control target
= control target key end

     0   :  { %s4019_s0 = inlined_call_operand.vmem [shape: f32[16,32], index: 0, kind: input, shape index: {}]   ;;  %s4020_s1 = inlined_call_operand.vmem [shape: bf16[32,64], index: 1, kind: input, shape index: {}]   ;;  %s4021_s2 = inlined_call_operand.vmem [shape: bf16[32,64], index: 2, kind: input, shape index: {}]   ;;  %s4022_s3 = inlined_call_operand.vmem [shape: f32[4,64], index: 3, kind: input, shape index: {}]   ;;  %s4023_s4 = inlined_call_operand.vmem [shape: f32[1,64], index: 4, kind: input, shape index: {}]   ;;  %s4024_s5 = inlined_call_operand.vmem [shape: bf16[64,2], index: 5, kind: input, shape index: {}]   ;;  %s4025_s6 = inlined_call_operand.vmem [shape: bf16[64,16], index: 6, kind: input, shape index: {}]   ;;  %s4026_s7 = inlined_call_operand.vmem [shape: bf16[64,16], index: 7, kind: input, shape index: {}]   ;;  %s4027_s8 = inlined_call_operand.vmem [shape: bf16[2,64], index: 8, kind: input, shape index: {}]   ;;  %s4028_s9 = inlined_call_operand.vmem [shape: f32[1,64], index: 9, kind: input, shape index: {}]   ;;  %s4029_s10 = inlined_call_operand.vmem [shape: f32[1,64], index: 10, kind: input, shape index: {}]   ;;  %s4030_s11 = inlined_call_operand.vmem [shape: bf16[64,32], index: 11, kind: input, shape index: {}]   ;;  %s4031_s12 = inlined_call_operand.vmem [shape: bf16[32,128], index: 12, kind: input, shape index: {}]   ;;  %s4032_s13 = inlined_call_operand.vmem [shape: f32[1,128], index: 13, kind: input, shape index: {}]   ;;  %s4033_s14 = inlined_call_operand.vmem [shape: bf16[128,32], index: 14, kind: input, shape index: {}]   ;;  %s4034_s15 = inlined_call_operand.vmem [shape: f32[1,32], index: 15, kind: input, shape index: {}]   ;;  %s4035_s16 = inlined_call_operand.vmem [shape: f32[256,64], index: 16, kind: input, shape index: {}]   ;;  %s4036_s17 = inlined_call_operand.vmem [shape: f32[256,16], index: 17, kind: input, shape index: {}]   ;;  %s4037_s18 = inlined_call_operand.vmem [shape: f32[256,16], index: 18, kind: input, shape index: {}]   ;;  %s4038_s19 = inlined_call_operand.vmem [shape: f32[16,256], index: 19, kind: input, shape index: {}]   ;;  %s4039_s20 = inlined_call_operand.hbm [shape: f32[16,32], index: 20, kind: output, shape index: {}]  }
   0x1   :  { %4044 = sst [smem:[#allocation9_spill]] %s4019_s0 }
   0x2   :  { %4045 = sst [smem:[#allocation10_spill]] %s4020_s1 }
   0x3   :  { %4046 = sst [smem:[#allocation11_spill]] %s4021_s2 }
   0x4   :  { %4047 = sst [smem:[#allocation12_spill]] %s4022_s3 }
   0x5   :  { %4048 = sst [smem:[#allocation13_spill]] %s4023_s4 }
   0x6   :  { %s4049_s23 = sld [smem:[#allocation9_spill]]  ;;  %vm69_vm0 = vcmask 261120  }
   0xc   :  { %v67_v0 = vld [vmem:[%s4049_s23] sm:$0xff]  ;;  %v68_v2 = vld [vmem:[%s4049_s23 + $0x8] sm:$0xff] }
   0xd   :  { %v70_v1 = vsel %vm69_vm0, %v67_v0, 0.0 }
   0xe   :  { %71 = vadd.xlane.f32.xlu0 %v70_v1 }
   0xf   :  { %25 = vsyncpa [#allocation7], 0  ;;  %v73_v3 = vsel %vm69_vm0, %v68_v2, 0.0  ;;  %v2639_v4 = vmov 32.0   ;;  %s4050_s26 = sld [smem:[#allocation10_spill]]  ;;  %vm185_vm8 = vcmask 523264   ;;  %v189_v49 = vlaneseq }
  0x10   :  { %2507 = vrcp.f32 %v2639_v4  ;;  %s4051_s4 = sld [smem:[#allocation11_spill]]  ;;  %v2640_v48 = vmov 0.0   ;;  %v2470_v53 = vld [vmem:[%s4024_s5 + $0x18] sm:$0xff]  ;;  %v2469_v58 = vld [vmem:[%s4024_s5 + $0x10] sm:$0xff] }
  0x11   :  { %186 = vst.msk [vmem:[#allocation2] sm:$0xff] %vm185_vm8, %v2640_v48  ;;  %v190_v50 = vshrl.u32 %v189_v49, 7  ;;  %v2478_v54 = vld [vmem:[%s4026_s7 + $0x18] sm:$0xff]  ;;  %358 = vmatpush.bf16.msra.mxu3 %v2470_v53  ;;  %v2477_v59 = vld [vmem:[%s4026_s7 + $0x10] sm:$0xff]  ;;  %s4053_s21 = sld [smem:[#allocation13_spill]]  ;;  %v2471_v49 = vld [vmem:[%s4025_s6] sm:$0xff] }
  0x13   :  { %v196_v52 = vand.u32 7, %v190_v50  ;;  %v191_v55 = vadd.s32 8, %v190_v50 }
  0x15   :  { %v2464_v21 = vld [vmem:[%s4050_s26 + $0x8] sm:$0xff]  ;;  %v2463_v23 = vld [vmem:[%s4050_s26] sm:$0xff]  ;;  %vm218_vm9 = vcmp.ge.s32.totalorder %v196_v52, 3  ;;  %s4052_s26 = sld [smem:[#allocation12_spill]]  ;;  %vm234_vm10 = vcmp.ge.s32.totalorder %v196_v52, 2  ;;  %vm250_vm11 = vcmp.ge.s32.totalorder %v196_v52, 1  ;;  %359 = vmatpush.bf16.msra.mxu3 %v2469_v58 }
  0x16   :  { %74 = vadd.xlane.f32.xlu0 %v73_v3  ;;  %v2508_v5 = vpop.eup %2507  ;;  %v2466_v22 = vld [vmem:[%s4051_s4 + $0x8] sm:$0xff]  ;;  %147 = vmatpush.bf16.msra.mxu0 %v2464_v21  ;;  %v2465_v24 = vld [vmem:[%s4051_s4] sm:$0xff]  ;;  %v203_v3 = vand.u32 7, %v191_v55 }
  0x17   :  { %v77_v6 = vmul.f32 32.0, %v2508_v5  ;;  %vm81_vm1 = vweird.f32 %v2508_v5  ;;  %177 = vmatpush.bf16.msra.mxu1 %v2466_v22 }
  0x18   :  { %vm219_vm12 = vcmp.ge.s32.totalorder %v203_v3, 3  ;;  %vm235_vm13 = vcmp.ge.s32.totalorder %v203_v3, 2  ;;  %vm251_vm14 = vcmp.ge.s32.totalorder %v203_v3, 1 }
  0x19   :  { %v78_v7 = vsub.f32 1.0, %v77_v6 }
  0x1a   :  { %148 = vmatpush.bf16.msra.mxu0 %v2463_v23 }
  0x1b   :  { %v79_v8 = vmul.f32 %v2508_v5, %v78_v7  ;;  %178 = vmatpush.bf16.msra.mxu1 %v2465_v24  ;;  %v2498_v56 = vld [vmem:[%s4052_s26] ss:$0 sm:$0xff]  ;;  %v2499_v57 = vld [vmem:[%s4052_s26 + $0x1] ss:$0 sm:$0xff]  ;;  %v2468_v7 = vld [vmem:[%s4024_s5 + $0x8] sm:$0xff] }
  0x1c   :  { %360 = vmatpush.bf16.msra.mxu3 %v2468_v7  ;;  %v461_v7 = vld [vmem:[%s4027_s8] sm:$0x1] }
  0x1d   :  { %v80_v9 = vadd.f32 %v2508_v5, %v79_v8  ;;  %v2476_v8 = vld [vmem:[%s4026_s7 + $0x8] sm:$0xff] }
  0x1e   :  { %450 = vmatpush.bf16.msrb.mxu0 %v2478_v54 }
  0x1f   :  { %v2757_v10 = vsel %vm81_vm1, %v2508_v5, %v80_v9  ;;  %v2501_v9 = vld [vmem:[%s4052_s26 + $0x3] ss:$0 sm:$0xff] }
  0x22   :  { %451 = vmatpush.bf16.msrb.mxu0 %v2477_v59 }
  0x26   :  { %452 = vmatpush.bf16.msrb.mxu0 %v2476_v8 }
  0x81   :  { %v72_v11 = vpop.xlane.xlu0 %71 }
  0x82   :  { %v83_v12 = vmul.f32 %v2757_v10, %v72_v11 }
  0x84   :  { %v85_v13 = vsub.f32 %v67_v0, %v83_v12 }
  0x86   :  { %v87_v14 = vmul.f32 %v85_v13, %v85_v13 }
  0x88   :  { %v89_v15 = vsel %vm69_vm0, %v87_v14, 0.0  ;;  %v2467_v14 = vld [vmem:[%s4024_s5] sm:$0xff] }
  0x89   :  { %90 = vadd.xlane.f32.xlu1 %v89_v15  ;;  %v75_v16 = vpop.xlane.xlu0 %74  ;;  %v2475_v15 = vld [vmem:[%s4026_s7] sm:$0xff]  ;;  %361 = vmatpush.bf16.msra.mxu3 %v2467_v14 }
  0x8a   :  { %v84_v17 = vmul.f32 %v2757_v10, %v75_v16  ;;  %453 = vmatpush.bf16.msrb.mxu0 %v2475_v15 }
  0x8c   :  { %v86_v18 = vsub.f32 %v68_v2, %v84_v17  ;;  %v2500_v2 = vld [vmem:[%s4052_s26 + $0x2] ss:$0 sm:$0xff]  ;;  %s2642_s26 = smov 128  }
  0x8e   :  { %v88_v19 = vmul.f32 %v86_v18, %v86_v18 }
  0x90   :  { %v92_v20 = vsel %vm69_vm0, %v88_v19, 0.0 }
  0x91   :  { %93 = vadd.xlane.f32.xlu1 %v92_v20 }
  0xfc   :  { %v91_v25 = vpop.xlane.xlu1 %90 }
  0xfd   :  { %v95_v26 = vmul.f32 %v91_v25, %v2757_v10 }
  0xff   :  { %v97_v27 = vadd.f32 1e-05, %v95_v26 }
 0x101   :  { %2509 = vrsqrt.f32 %v97_v27  ;;  %vm105_vm3 = vweird.f32 %v97_v27 }
 0x104   :  { %v94_v28 = vpop.xlane.xlu1 %93 }
 0x105   :  { %v96_v29 = vmul.f32 %v94_v28, %v2757_v10 }
 0x107   :  { %v2510_v30 = vpop.eup %2509  ;;  %v98_v31 = vadd.f32 1e-05, %v96_v29 }
 0x108   :  { %v100_v32 = vmul.f32 %v2510_v30, %v97_v27  ;;  %vm106_vm2 = vweird.f32 %v2510_v30 }
 0x109   :  { %2511 = vrsqrt.f32 %v98_v31  ;;  %vm107_vm5 = vmor %vm105_vm3, %vm106_vm2  ;;  %vm115_vm6 = vweird.f32 %v98_v31 }
 0x10a   :  { %v101_v33 = vmul.f32 %v2510_v30, %v100_v32 }
 0x10c   :  { %v102_v34 = vmul.f32 0.5, %v101_v33 }
 0x10e   :  { %v103_v36 = vsub.f32 1.5, %v102_v34 }
 0x10f   :  { %v2512_v35 = vpop.eup %2511 }
 0x110   :  { %v110_v37 = vmul.f32 %v2512_v35, %v98_v31  ;;  %v104_v39 = vmul.f32 %v2510_v30, %v103_v36  ;;  %vm116_vm4 = vweird.f32 %v2512_v35 }
 0x111   :  { %vm117_vm7 = vmor %vm115_vm6, %vm116_vm4 }
 0x112   :  { %v111_v38 = vmul.f32 %v2512_v35, %v110_v37  ;;  %v108_v43 = vsel %vm107_vm5, %v2510_v30, %v104_v39  ;;  %v2474_v39 = vld [vmem:[%s4025_s6 + $0x18] sm:$0xff] }
 0x113   :  { %v2777_v45 = vmul.f32 %v108_v43, %v85_v13  ;;  %404 = vmatpush.bf16.msrb.mxu3 %v2474_v39 }
 0x114   :  { %v112_v40 = vmul.f32 0.5, %v111_v38 }
 0x116   :  { %v113_v41 = vsub.f32 1.5, %v112_v40 }
 0x118   :  { %v114_v42 = vmul.f32 %v2512_v35, %v113_v41  ;;  %v2473_v41 = vld [vmem:[%s4025_s6 + $0x10] sm:$0xff] }
 0x119   :  { %405 = vmatpush.bf16.msrb.mxu3 %v2473_v41  ;;  %v2999_v41 = vld [vmem:[%s4036_s17 + $0x78] sm:$0xff] }
 0x11a   :  { %v118_v44 = vsel %vm117_vm7, %v2512_v35, %v114_v42  ;;  %v2472_v42 = vld [vmem:[%s4025_s6 + $0x8] sm:$0xff] }
 0x11b   :  { %v2779_v46 = vmul.f32 %v118_v44, %v86_v18  ;;  %v2502_v18 = vld [vmem:[%s4053_s21] ss:$0 sm:$0xff]  ;;  %s2643_s21 = smov 8  }
 0x11d   :  { %v121_v47 = vpack.c.bf16 %v2779_v46, %v2777_v45  ;;  %406 = vmatpush.bf16.msrb.mxu3 %v2472_v42 }
 0x11f   :  { %2211 = vmatmul.msk.bf16.vlgmr.msra.gmra.mxu0 %vm69_vm0, %v121_v47  ;;  %2220 = vmatmul.msk.bf16.vlgmr.msra.gmra.mxu1 %vm69_vm0, %v121_v47 }
 0x121   :  { %407 = vmatpush.bf16.msrb.mxu3 %v2471_v49 }
 0x19c   :  { %v150_v51 = vpop.f32.mrf.mxu0 }
 0x19d   :  { %187 = vst.msk [vmem:[#allocation2 + $0x8] sm:$0xff] %vm185_vm8, %v150_v51 }
 0x1a4   :  { %v152_v60 = vpop.f32.mrf.mxu0  ;;  %v216_v61 = vld [vmem:[#allocation2 + $0x5] sm:$0xff] }
 0x1a5   :  { %v232_v62 = vld [vmem:[#allocation2 + $0x6] sm:$0xff]  ;;  %188 = vst.msk [vmem:[#allocation2 + $0x10] sm:$0xff] %vm185_vm8, %v152_v60  ;;  %v224_v0 = vsel %vm218_vm9, %v216_v61, 0.0  ;;  %vm470_vm9 = vcmask 1040384  }
 0x1a6   :  { %v248_v63 = vld [vmem:[#allocation2 + $0x7] sm:$0xff]  ;;  %v240_v1 = vsel %vm234_vm10, %v232_v62, 0.0  ;;  %v228_v4 = vmul.f32 %v2498_v56, %v224_v0  ;;  %v472_v8 = vsel %vm470_vm9, %v461_v7, 0  ;;  %vm466_vm10 = vcmask 15360  }
 0x1a7   :  { %v244_v5 = vmul.f32 %v2499_v57, %v240_v1  ;;  %v256_v6 = vsel %vm250_vm11, %v248_v63, 0.0  ;;  %v264_v11 = vld [vmem:[#allocation2 + $0x8] sm:$0xff]  ;;  %481 = vmatpush.bf16.msrb.mxu1 %v472_v8  ;;  %vm624_vm11 = vcmask 130048  }
 0x1a8   :  { %v260_v13 = vmul.f32 %v2500_v2, %v256_v6  ;;  %v268_v17 = vmul.f32 %v2501_v9, %v264_v11 }
 0x1a9   :  { %v246_v12 = vadd.f32 %v244_v5, %v228_v4 }
 0x1ab   :  { %v262_v16 = vadd.f32 %v260_v13, %v246_v12 }
 0x1ac   :  { %v217_v19 = vld [vmem:[#allocation2 + $0xd] sm:$0xff] }
 0x1ad   :  { %v233_v20 = vld [vmem:[#allocation2 + $0xe] sm:$0xff]  ;;  %v225_v22 = vsel %vm219_vm12, %v217_v19, 0.0  ;;  %v270_v24 = vadd.f32 %v268_v17, %v262_v16  ;;  %v2854_v17 = vld [vmem:[%s4036_s17] sm:$0xff] }
 0x1ae   :  { %v249_v21 = vld [vmem:[#allocation2 + $0xf] sm:$0xff]  ;;  %v241_v23 = vsel %vm235_vm13, %v233_v20, 0.0  ;;  %v229_v25 = vmul.f32 %v2498_v56, %v225_v22  ;;  %v2881_v20 = vld [vmem:[%s4036_s17 + $0x18] sm:$0xff] }
 0x1af   :  { %v245_v26 = vmul.f32 %v2499_v57, %v241_v23  ;;  %v257_v27 = vsel %vm251_vm14, %v249_v21, 0.0  ;;  %v276_v28 = vadd.f32 %v2502_v18, %v270_v24  ;;  %v265_v29 = vld [vmem:[#allocation2 + $0x10] sm:$0xff]  ;;  %v2890_v21 = vld [vmem:[%s4036_s17 + $0x20] sm:$0xff]  ;;  %v2899_v22 = vld [vmem:[%s4036_s17 + $0x28] sm:$0xff] }
 0x1b0   :  { %v261_v31 = vmul.f32 %v2500_v2, %v257_v27  ;;  %v269_v34 = vmul.f32 %v2501_v9, %v265_v29  ;;  %v2872_v19 = vld [vmem:[%s4036_s17 + $0x10] sm:$0xff]  ;;  %v2917_v24 = vld [vmem:[%s4036_s17 + $0x38] sm:$0xff]  ;;  %v2959_v29 = vpop.f32.mrf.mxu1 }
 0x1b1   :  { %v247_v30 = vadd.f32 %v245_v26, %v229_v25  ;;  %v2221_v32 = vmul.f32 -1.442695, %v276_v28  ;;  %v2908_v23 = vld [vmem:[%s4036_s17 + $0x30] sm:$0xff]  ;;  %v2926_v25 = vld [vmem:[%s4036_s17 + $0x40] sm:$0xff]  ;;  %v2935_v26 = vld [vmem:[%s4036_s17 + $0x48] sm:$0xff] }
 0x1b2   :  { %v2944_v27 = vld [vmem:[%s4036_s17 + $0x50] sm:$0xff] }
 0x1b3   :  { %v263_v33 = vadd.f32 %v261_v31, %v247_v30  ;;  %2513 = vpow2.f32 %v2221_v32  ;;  %v2964_v30 = vld [vmem:[%s4036_s17 + $0x60] sm:$0xff]  ;;  %v2975_v32 = vld [vmem:[%s4036_s17 + $0x68] sm:$0xff] }
 0x1b5   :  { %v271_v35 = vadd.f32 %v269_v34, %v263_v33  ;;  %v2503_v33 = vld [vmem:[%s4028_s9] ss:$0 sm:$0xff] }
 0x1b7   :  { %v277_v36 = vadd.f32 %v2502_v18, %v271_v35  ;;  %v2863_v18 = vld [vmem:[%s4036_s17 + $0x8] sm:$0xff]  ;;  %v2987_v35 = vld [vmem:[%s4036_s17 + $0x70] sm:$0xff] }
 0x1b8   :  { %v2970_v31 = vpop.f32.mrf.mxu1 }
 0x1b9   :  { %v2514_v37 = vpop.eup %2513  ;;  %v2222_v38 = vmul.f32 -1.442695, %v277_v36 }
 0x1ba   :  { %v284_v40 = vadd.f32 1.0, %v2514_v37 }
 0x1bb   :  { %2515 = vpow2.f32 %v2222_v38 }
 0x1bc   :  { %2517 = vrcp.f32 %v284_v40  ;;  %v297_v55 = vand.u32 2147483648, %v284_v40  ;;  %vm291_vm1 = vweird.f32 %v284_v40  ;;  %v295_v56 = vand.u32 2147483647, %v284_v40 }
 0x1be   :  { %v298_v62 = vor.u32 1.1754944e-38, %v297_v55  ;;  %vm296_vm4 = vcmp.eq.f32.partialorder %v295_v56, 8.507059e+37 }
 0x1c1   :  { %v2516_v43 = vpop.eup %2515 }
 0x1c2   :  { %v2518_v44 = vpop.eup %2517  ;;  %v285_v47 = vadd.f32 1.0, %v2516_v43 }
 0x1c3   :  { %v287_v48 = vmul.f32 %v2518_v44, %v284_v40  ;;  %vm292_vm15 = vweird.f32 %v2518_v44 }
 0x1c4   :  { %2519 = vrcp.f32 %v285_v47  ;;  %vm293_vm2 = vmor %vm291_vm1, %vm292_vm15  ;;  %v312_v58 = vand.u32 2147483648, %v285_v47  ;;  %v310_v61 = vand.u32 2147483647, %v285_v47  ;;  %vm306_vm5 = vweird.f32 %v285_v47 }
 0x1c5   :  { %v288_v50 = vsub.f32 1.0, %v287_v48 }
 0x1c6   :  { %v313_v1 = vor.u32 1.1754944e-38, %v312_v58  ;;  %vm311_vm7 = vcmp.eq.f32.partialorder %v310_v61, 8.507059e+37 }
 0x1c7   :  { %v289_v51 = vmul.f32 %v2518_v44, %v288_v50  ;;  %v3010_v50 = vld [vmem:[%s4036_s17 + $0x80] sm:$0xff] }
 0x1c9   :  { %v290_v53 = vadd.f32 %v2518_v44, %v289_v51 }
 0x1ca   :  { %v2520_v52 = vpop.eup %2519 }
 0x1cb   :  { %v302_v54 = vmul.f32 %v2520_v52, %v285_v47  ;;  %v294_v59 = vsel %vm293_vm2, %v2518_v44, %v290_v53  ;;  %vm307_vm3 = vweird.f32 %v2520_v52 }
 0x1cc   :  { %v299_v0 = vsel %vm296_vm4, %v298_v62, %v294_v59  ;;  %vm308_vm6 = vmor %vm306_vm5, %vm307_vm3  ;;  %v556_v62 = vld [vmem:[%s4037_s18] sm:$0xff] }
 0x1cd   :  { %v303_v57 = vsub.f32 1.0, %v302_v54  ;;  %v2839_v4 = vmul.f32 %v299_v0, %v276_v28  ;;  %v2953_v28 = vld [vmem:[%s4036_s17 + $0x58] sm:$0xff] }
 0x1cf   :  { %v304_v60 = vmul.f32 %v2520_v52, %v303_v57  ;;  %v3021_v57 = vld [vmem:[%s4036_s17 + $0x88] sm:$0xff] }
 0x1d1   :  { %v305_v63 = vadd.f32 %v2520_v52, %v304_v60 }
 0x1d3   :  { %v309_v2 = vsel %vm308_vm6, %v2520_v52, %v305_v63 }
 0x1d4   :  { %v314_v3 = vsel %vm311_vm7, %v313_v1, %v309_v2 }
 0x1d5   :  { %v2841_v5 = vmul.f32 %v314_v3, %v277_v36 }
 0x1d7   :  { %v318_v6 = vpack.c.bf16 %v2841_v5, %v2839_v4 }
 0x1d9   :  { %2239 = vmatmul.msk.bf16.vlgmr.msra.gmra.mxu3 %vm185_vm8, %v318_v6  ;;  %2273 = vmatmul.msk.bf16.vlgmr.msrb.gmra.mxu0 %vm185_vm8, %v318_v6 }
 0x1e9   :  { %2256 = vmatmul.msk.bf16.vlgmr.msrb.gmra.mxu3 %vm185_vm8, %v318_v6 }
 0x256   :  { %v455_v9 = vpop.f32.mrf.mxu0 }
 0x25c   :  { %v363_v11 = vpop.f32.mrf.mxu3 }
 0x25e   :  { %v457_v12 = vpop.f32.mrf.mxu0 }
 0x25f   :  { %1204 = vmatpush.msra.mxu1 %v457_v12 }
 0x261   :  { %1205 = vmatpush.msra.mxu1 %v455_v9 }
 0x264   :  { %v365_v13 = vpop.f32.mrf.mxu3 }
 0x265   :  { %v460_v14 = vpack.c.bf16 %v365_v13, %v363_v11  ;;  %v557_v11 = vld [vmem:[%s4037_s18 + $0x8] sm:$0xff]  ;;  %v3039_v13 = vld [vmem:[%s4036_s17 + $0x90] sm:$0xff] }
 0x267   :  { %2274 = vmatmul.msk.bf16.vlgmr.msrb.gmra.mxu1 %vm466_vm10, %v460_v14 }
 0x26c   :  { %v409_v15 = vpop.f32.mrf.mxu3 }
 0x274   :  { %v411_v16 = vpop.f32.mrf.mxu3 }
 0x275   :  { %963 = vmatpush.msra.mxu0 %v411_v16 }
 0x277   :  { %964 = vmatpush.msra.mxu0 %v409_v15  ;;  %2371 = vmatmul.msk.f32.vlgmr.msra.gmra.mxu1 %vm624_vm11, %v2854_v17 }
 0x278   :  { %2339 = vmatmul.msk.f32.vlgmr.msra.gmra.mxu0 %vm624_vm11, %v2854_v17 }
 0x27f   :  { %2372 = vmatmul.msk.f32.gmra.mxu1 %vm624_vm11, %v2863_v18 }
 0x280   :  { %2340 = vmatmul.msk.f32.gmra.mxu0 %vm624_vm11, %v2863_v18 }
 0x287   :  { %2373 = vmatmul.msk.f32.gmra.mxu1 %vm624_vm11, %v2872_v19 }
 0x288   :  { %2341 = vmatmul.msk.f32.gmra.mxu0 %vm624_vm11, %v2872_v19 }
 0x28f   :  { %2374 = vmatmul.msk.f32.gmra.mxu1 %vm624_vm11, %v2881_v20 }
 0x290   :  { %2342 = vmatmul.msk.f32.gmra.mxu0 %vm624_vm11, %v2881_v20 }
 0x297   :  { %2375 = vmatmul.msk.f32.gmra.mxu1 %vm624_vm11, %v2890_v21 }
 0x298   :  { %2343 = vmatmul.msk.f32.gmra.mxu0 %vm624_vm11, %v2890_v21 }
 0x29f   :  { %2376 = vmatmul.msk.f32.gmra.mxu1 %vm624_vm11, %v2899_v22 }
 0x2a0   :  { %2344 = vmatmul.msk.f32.gmra.mxu0 %vm624_vm11, %v2899_v22 }
 0x2a7   :  { %2377 = vmatmul.msk.f32.gmra.mxu1 %vm624_vm11, %v2908_v23 }
 0x2a8   :  { %2345 = vmatmul.msk.f32.gmra.mxu0 %vm624_vm11, %v2908_v23 }
 0x2af   :  { %2378 = vmatmul.msk.f32.gmra.mxu1 %vm624_vm11, %v2917_v24 }
 0x2b0   :  { %2346 = vmatmul.msk.f32.gmra.mxu0 %vm624_vm11, %v2917_v24 }
 0x2b7   :  { %2379 = vmatmul.msk.f32.gmra.mxu1 %vm624_vm11, %v2926_v25 }
 0x2b8   :  { %2347 = vmatmul.msk.f32.gmra.mxu0 %vm624_vm11, %v2926_v25 }
 0x2bf   :  { %2380 = vmatmul.msk.f32.gmra.mxu1 %vm624_vm11, %v2935_v26 }
 0x2c0   :  { %2348 = vmatmul.msk.f32.gmra.mxu0 %vm624_vm11, %v2935_v26 }
 0x2c7   :  { %2381 = vmatmul.msk.f32.gmra.mxu1 %vm624_vm11, %v2944_v27 }
 0x2c8   :  { %2349 = vmatmul.msk.f32.gmra.mxu0 %vm624_vm11, %v2944_v27 }
 0x2cf   :  { %2382 = vmatmul.msk.f32.gmra.mxu1 %vm624_vm11, %v2953_v28 }
 0x2d0   :  { %2350 = vmatmul.msk.f32.gmra.mxu0 %vm624_vm11, %v2953_v28 }
 0x2d7   :  { %2383 = vmatmul.msk.f32.gmra.mxu1 %vm624_vm11, %v2964_v30 }
 0x2d8   :  { %2351 = vmatmul.msk.f32.gmra.mxu0 %vm624_vm11, %v2964_v30 }
 0x2df   :  { %2384 = vmatmul.msk.f32.gmra.mxu1 %vm624_vm11, %v2975_v32 }
 0x2e0   :  { %2352 = vmatmul.msk.f32.gmra.mxu0 %vm624_vm11, %v2975_v32 }
 0x2e4   :  { %v483_v34 = vpop.f32.mrf.mxu1 }
 0x2e5   :  { %v2989_v36 = vadd.f32 %v2503_v33, %v483_v34 }
 0x2e7   :  { %v494_v37 = vand.u32 2147483647, %v2989_v36  ;;  %2385 = vmatmul.msk.f32.gmra.mxu1 %vm624_vm11, %v2987_v35  ;;  %v488_v14 = vmax.f32 %v2989_v36, 0.0  ;;  %vm490_vm15 = vcmp.ne.f32.partialorder %v2989_v36, %v2989_v36 }
 0x2e8   :  { %2353 = vmatmul.msk.f32.gmra.mxu0 %vm624_vm11, %v2987_v35 }
 0x2e9   :  { %v496_v38 = vsub.f32 0.0, %v494_v37 }
 0x2eb   :  { %v498_v39 = vmul.f32 1.442695, %v496_v38 }
 0x2ec   :  { %v485_v40 = vpop.f32.mrf.mxu1 }
 0x2ed   :  { %2521 = vpow2.f32 %v498_v39  ;;  %v486_v42 = vadd.f32 %v2503_v33, %v485_v40 }
 0x2ef   :  { %v495_v43 = vand.u32 2147483647, %v486_v42  ;;  %2386 = vmatmul.msk.f32.gmra.mxu1 %vm624_vm11, %v2999_v41  ;;  %v489_v34 = vmax.f32 %v486_v42, 0.0  ;;  %vm491_vm14 = vcmp.ne.f32.partialorder %v486_v42, %v486_v42 }
 0x2f0   :  { %2354 = vmatmul.msk.f32.gmra.mxu0 %vm624_vm11, %v2999_v41 }
 0x2f1   :  { %v497_v44 = vsub.f32 0.0, %v495_v43 }
 0x2f3   :  { %v2522_v47 = vpop.eup %2521  ;;  %v500_v48 = vmul.f32 1.442695, %v497_v44 }
 0x2f4   :  { %v3005_v49 = vpop.f32.mrf.mxu1  ;;  %v502_v51 = vadd.f32 1.0, %v2522_v47  ;;  %v505_v53 = vmul.f32 -0.5, %v2522_v47  ;;  %v508_v63 = vand.u32 2147483647, %v2522_v47 }
 0x2f5   :  { %2523 = vpow2.f32 %v500_v48  ;;  %v966_v52 = vpop.f32.mrf.mxu0 }
 0x2f6   :  { %2525 = vlog2.f32 %v502_v51  ;;  %v506_v61 = vadd.f32 1.0, %v505_v53  ;;  %v1062_v3 = vmul.f32 %v966_v52, %v556_v62  ;;  %vm509_vm12 = vcmp.lt.f32.partialorder %v508_v63, 0.0004427343  ;;  %v558_v51 = vld [vmem:[%s4037_s18 + $0x10] sm:$0xff]  ;;  %v3059_v53 = vld [vmem:[%s4036_s17 + $0x98] sm:$0xff]  ;;  %v560_v63 = vld [vmem:[%s4037_s18 + $0x20] sm:$0xff] }
 0x2f7   :  { %2387 = vmatmul.msk.f32.gmra.mxu1 %vm624_vm11, %v3010_v50 }
 0x2f8   :  { %2355 = vmatmul.msk.f32.gmra.mxu0 %vm624_vm11, %v3010_v50  ;;  %v507_v2 = vmul.f32 %v2522_v47, %v506_v61  ;;  %v1094_v8 = vsel %vm624_vm11, %v1062_v3, 0.0 }
 0x2f9   :  { %1095 = vadd.xlane.f32.xlu2 %v1094_v8  ;;  %v3117_v8 = vld [vmem:[%s4036_s17 + $0xb0] sm:$0xff] }
 0x2fb   :  { %v2524_v54 = vpop.eup %2523 }
 0x2fc   :  { %v2526_v55 = vpop.eup %2525  ;;  %v3016_v56 = vpop.f32.mrf.mxu1  ;;  %v511_v58 = vadd.f32 1.0, %v2524_v54  ;;  %v514_v60 = vmul.f32 -0.5, %v2524_v54  ;;  %v517_v6 = vand.u32 2147483647, %v2524_v54 }
 0x2fd   :  { %v969_v59 = vpop.f32.mrf.mxu0  ;;  %v504_v0 = vmul.f32 0.6931472, %v2526_v55 }
 0x2fe   :  { %2527 = vlog2.f32 %v511_v58  ;;  %v515_v1 = vadd.f32 1.0, %v514_v60  ;;  %vm518_vm13 = vcmp.lt.f32.partialorder %v517_v6, 0.0004427343  ;;  %v1063_v38 = vmul.f32 %v969_v59, %v557_v11  ;;  %v559_v58 = vld [vmem:[%s4037_s18 + $0x18] sm:$0xff]  ;;  %v3079_v60 = vld [vmem:[%s4036_s17 + $0xa0] sm:$0xff]  ;;  %v561_v6 = vld [vmem:[%s4037_s18 + $0x28] sm:$0xff] }
 0x2ff   :  { %2388 = vmatmul.msk.f32.gmra.mxu1 %vm624_vm11, %v3021_v57  ;;  %v510_v7 = vsel %vm509_vm12, %v507_v2, %v504_v0 }
 0x300   :  { %2356 = vmatmul.msk.f32.gmra.mxu0 %vm624_vm11, %v3021_v57  ;;  %v516_v33 = vmul.f32 %v2524_v54, %v515_v1  ;;  %v520_v37 = vadd.f32 %v510_v7, %v488_v14  ;;  %v1097_v48 = vsel %vm624_vm11, %v1063_v38, 0.0  ;;  %v3098_v1 = vld [vmem:[%s4036_s17 + $0xa8] sm:$0xff]  ;;  %v3131_v14 = vld [vmem:[%s4037_s18 + $0x30] sm:$0xff]  ;;  %v3156_v38 = vld [vmem:[%s4037_s18 + $0x38] sm:$0xff] }
 0x301   :  { %1098 = vadd.xlane.f32.xlu0 %v1097_v48  ;;  %v565_v48 = vld [vmem:[%s4037_s18 + $0x48] sm:$0xff] }
 0x302   :  { %v522_v44 = vsel %vm490_vm15, %v2989_v36, %v520_v37 }
 0x303   :  { %v834_v36 = vmul.f32 %v522_v44, %v2839_v4 }
 0x304   :  { %v2528_v9 = vpop.eup %2527  ;;  %v3034_v12 = vpop.f32.mrf.mxu1 }
 0x305   :  { %v972_v15 = vpop.f32.mrf.mxu0  ;;  %v513_v16 = vmul.f32 0.6931472, %v2528_v9 }
 0x306   :  { %v1064_v54 = vmul.f32 %v972_v15, %v558_v51 }
 0x307   :  { %2389 = vmatmul.msk.f32.gmra.mxu1 %vm624_vm11, %v3039_v13  ;;  %v519_v39 = vsel %vm518_vm13, %v516_v33, %v513_v16  ;;  %v3138_v16 = vld [vmem:[%s4036_s17 + $0xb8] sm:$0xff] }
 0x308   :  { %2357 = vmatmul.msk.f32.gmra.mxu0 %vm624_vm11, %v3039_v13  ;;  %v521_v40 = vadd.f32 %v519_v39, %v489_v34  ;;  %v1100_v55 = vsel %vm624_vm11, %v1064_v54, 0.0  ;;  %v564_v34 = vld [vmem:[%s4037_s18 + $0x40] sm:$0xff] }
 0x309   :  { %1101 = vadd.xlane.f32.xlu2 %v1100_v55 }
 0x30a   :  { %v523_v43 = vsel %vm491_vm14, %v486_v42, %v521_v40  ;;  %v3161_v40 = vld [vmem:[%s4036_s17 + $0xc0] sm:$0xff] }
 0x30b   :  { %735 = vmatpush.msra.mxu2 %v523_v43  ;;  %v835_v47 = vmul.f32 %v523_v43, %v2841_v5 }
 0x30c   :  { %v3054_v52 = vpop.f32.mrf.mxu1 }
 0x30d   :  { %736 = vmatpush.msra.mxu2 %v522_v44  ;;  %850 = vmatpush.msra.mxu3 %v835_v47  ;;  %v975_v42 = vpop.f32.mrf.mxu0 }
 0x30e   :  { %2275 = vmatmul.msk.f32.vlgmr.msra.gmra.mxu2 %vm624_vm11, %v2854_v17  ;;  %v1065_v62 = vmul.f32 %v975_v42, %v559_v58 }
 0x30f   :  { %851 = vmatpush.msra.mxu3 %v834_v36  ;;  %2390 = vmatmul.msk.f32.gmra.mxu1 %vm624_vm11, %v3059_v53  ;;  %v3181_v36 = vld [vmem:[%s4036_s17 + $0xc8] sm:$0xff] }
 0x310   :  { %2358 = vmatmul.msk.f32.gmra.mxu0 %vm624_vm11, %v3059_v53  ;;  %2307 = vmatmul.msk.f32.vlgmr.msra.gmra.mxu3 %vm624_vm11, %v2854_v17  ;;  %v1103_v17 = vsel %vm624_vm11, %v1065_v62, 0.0  ;;  %v3196_v62 = vld [vmem:[%s4036_s17 + $0xd0] sm:$0xff] }
 0x311   :  { %1104 = vadd.xlane.f32.xlu2 %v1103_v17 }
 0x314   :  { %v3074_v59 = vpop.f32.mrf.mxu1 }
 0x315   :  { %v978_v61 = vpop.f32.mrf.mxu0 }
 0x316   :  { %2276 = vmatmul.msk.f32.gmra.mxu2 %vm624_vm11, %v2863_v18  ;;  %v1066_v3 = vmul.f32 %v978_v61, %v560_v63 }
 0x317   :  { %2391 = vmatmul.msk.f32.gmra.mxu1 %vm624_vm11, %v3079_v60 }
 0x318   :  { %2359 = vmatmul.msk.f32.gmra.mxu0 %vm624_vm11, %v3079_v60  ;;  %2308 = vmatmul.msk.f32.gmra.mxu3 %vm624_vm11, %v2863_v18  ;;  %v1106_v18 = vsel %vm624_vm11, %v1066_v3, 0.0  ;;  %v567_v3 = vld [vmem:[%s4037_s18 + $0x58] sm:$0xff] }
 0x319   :  { %1107 = vadd.xlane.f32.xlu0 %v1106_v18 }
 0x31c   :  { %v3093_v0 = vpop.f32.mrf.mxu1 }
 0x31d   :  { %v981_v2 = vpop.f32.mrf.mxu0 }
 0x31e   :  { %2277 = vmatmul.msk.f32.gmra.mxu2 %vm624_vm11, %v2872_v19  ;;  %v1067_v11 = vmul.f32 %v981_v2, %v561_v6  ;;  %v566_v2 = vld [vmem:[%s4037_s18 + $0x50] sm:$0xff]  ;;  %v3216_v6 = vld [vmem:[%s4036_s17 + $0xd8] sm:$0xff] }
 0x31f   :  { %2392 = vmatmul.msk.f32.gmra.mxu1 %vm624_vm11, %v3098_v1 }
 0x320   :  { %2360 = vmatmul.msk.f32.gmra.mxu0 %vm624_vm11, %v3098_v1  ;;  %2309 = vmatmul.msk.f32.gmra.mxu3 %vm624_vm11, %v2872_v19  ;;  %v1109_v19 = vsel %vm624_vm11, %v1067_v11, 0.0 }
 0x321   :  { %1110 = vadd.xlane.f32.xlu1 %v1109_v19 }
 0x324   :  { %v3112_v7 = vpop.f32.mrf.mxu1 }
 0x325   :  { %v984_v9 = vpop.f32.mrf.mxu0 }
 0x326   :  { %2278 = vmatmul.msk.f32.gmra.mxu2 %vm624_vm11, %v2881_v20 }
 0x327   :  { %2393 = vmatmul.msk.f32.gmra.mxu1 %vm624_vm11, %v3117_v8 }
 0x328   :  { %2361 = vmatmul.msk.f32.gmra.mxu0 %vm624_vm11, %v3117_v8  ;;  %2310 = vmatmul.msk.f32.gmra.mxu3 %vm624_vm11, %v2881_v20  ;;  %v1068_v20 = vmul.f32 %v984_v9, %v3131_v14 }
 0x32a   :  { %v1112_v37 = vsel %vm624_vm11, %v1068_v20, 0.0 }
 0x32b   :  { %1113 = vadd.xlane.f32.xlu0 %v1112_v37  ;;  %v568_v37 = vld [vmem:[%s4037_s18 + $0x60] sm:$0xff] }
 0x32c   :  { %v3133_v15 = vpop.f32.mrf.mxu1 }
 0x32d   :  { %v987_v33 = vpop.f32.mrf.mxu0 }
 0x32e   :  { %2279 = vmatmul.msk.f32.gmra.mxu2 %vm624_vm11, %v2890_v21  ;;  %v1069_v44 = vmul.f32 %v987_v33, %v3156_v38 }
 0x32f   :  { %2394 = vmatmul.msk.f32.gmra.mxu1 %vm624_vm11, %v3138_v16 }
 0x330   :  { %2362 = vmatmul.msk.f32.gmra.mxu0 %vm624_vm11, %v3138_v16  ;;  %2311 = vmatmul.msk.f32.gmra.mxu3 %vm624_vm11, %v2890_v21  ;;  %v1115_v47 = vsel %vm624_vm11, %v1069_v44, 0.0 }
 0x331   :  { %1116 = vadd.xlane.f32.xlu1 %v1115_v47 }
 0x334   :  { %v1231_v39 = vpop.f32.mrf.mxu1 }
 0x335   :  { %v3163_v43 = vmul.f32 %v1231_v39, %v564_v34  ;;  %v990_v21 = vpop.f32.mrf.mxu0 }
 0x336   :  { %2280 = vmatmul.msk.f32.gmra.mxu2 %vm624_vm11, %v2899_v22  ;;  %v1070_v54 = vmul.f32 %v990_v21, %v564_v34  ;;  %v3235_v21 = vld [vmem:[%s4036_s17 + $0xe0] sm:$0xff] }
 0x337   :  { %2395 = vmatmul.msk.f32.gmra.mxu1 %vm624_vm11, %v3161_v40 }
 0x338   :  { %2363 = vmatmul.msk.f32.gmra.mxu0 %vm624_vm11, %v3161_v40  ;;  %2312 = vmatmul.msk.f32.gmra.mxu3 %vm624_vm11, %v2899_v22  ;;  %v1118_v58 = vsel %vm624_vm11, %v1070_v54, 0.0 }
 0x339   :  { %1119 = vadd.xlane.f32.xlu1 %v1118_v58 }
 0x33c   :  { %v1234_v51 = vpop.f32.mrf.mxu1 }
 0x33d   :  { %v993_v42 = vpop.f32.mrf.mxu0  ;;  %v1312_v55 = vmul.f32 %v1234_v51, %v565_v48 }
 0x33e   :  { %2281 = vmatmul.msk.f32.gmra.mxu2 %vm624_vm11, %v2908_v23  ;;  %v1071_v63 = vmul.f32 %v993_v42, %v565_v48  ;;  %v569_v42 = vld [vmem:[%s4037_s18 + $0x68] sm:$0xff] }
 0x33f   :  { %2396 = vmatmul.msk.f32.gmra.mxu1 %vm624_vm11, %v3181_v36  ;;  %v1362_v22 = vsel %vm624_vm11, %v1312_v55, 0.0  ;;  %v3253_v55 = vld [vmem:[%s4036_s17 + $0xe8] sm:$0xff] }
 0x340   :  { %2364 = vmatmul.msk.f32.gmra.mxu0 %vm624_vm11, %v3181_v36  ;;  %2313 = vmatmul.msk.f32.gmra.mxu3 %vm624_vm11, %v2908_v23  ;;  %v1121_v23 = vsel %vm624_vm11, %v1071_v63, 0.0 }
 0x341   :  { %1363 = vadd.xlane.f32.xlu2 %v1362_v22 }
 0x344   :  { %v1237_v61 = vpop.f32.mrf.mxu1 }
 0x345   :  { %v996_v17 = vpop.f32.mrf.mxu0 }
 0x346   :  { %2282 = vmatmul.msk.f32.gmra.mxu2 %vm624_vm11, %v2917_v24  ;;  %v1072_v11 = vmul.f32 %v996_v17, %v566_v2 }
 0x347   :  { %2397 = vmatmul.msk.f32.gmra.mxu1 %vm624_vm11, %v3196_v62 }
 0x348   :  { %2365 = vmatmul.msk.f32.gmra.mxu0 %vm624_vm11, %v3196_v62  ;;  %2314 = vmatmul.msk.f32.gmra.mxu3 %vm624_vm11, %v2917_v24  ;;  %v1313_v24 = vmul.f32 %v1237_v61, %v566_v2  ;;  %v1124_v20 = vsel %vm624_vm11, %v1072_v11, 0.0  ;;  %v3288_v11 = vld [vmem:[%s4036_s17 + $0xf8] sm:$0xff] }
 0x349   :  { %1122 = vadd.xlane.f32.xlu2 %v1121_v23  ;;  %1125 = vadd.xlane.f32.xlu1 %v1124_v20  ;;  %v3268_v23 = vld [vmem:[%s4036_s17 + $0xf0] sm:$0xff]  ;;  %s2191_s17 = sshll.u32 %s4039_s20, 4  ;;  %s2192_s17 = int_to_ptr.hbm [resolvable:$true] %s2191_s17 }
 0x34a   :  { %v1365_v33 = vsel %vm624_vm11, %v1313_v24, 0.0 }
 0x34b   :  { %1366 = vadd.xlane.f32.xlu0 %v1365_v33 }
 0x34c   :  { %v1240_v18 = vpop.f32.mrf.mxu1 }
 0x34d   :  { %v999_v9 = vpop.f32.mrf.mxu0 }
 0x34e   :  { %2283 = vmatmul.msk.f32.gmra.mxu2 %vm624_vm11, %v2926_v25  ;;  %v1073_v19 = vmul.f32 %v999_v9, %v567_v3  ;;  %v571_v9 = vld [vmem:[%s4037_s18 + $0x78] sm:$0xff] }
 0x34f   :  { %2398 = vmatmul.msk.f32.gmra.mxu1 %vm624_vm11, %v3216_v6 }
 0x350   :  { %2366 = vmatmul.msk.f32.gmra.mxu0 %vm624_vm11, %v3216_v6  ;;  %2315 = vmatmul.msk.f32.gmra.mxu3 %vm624_vm11, %v2926_v25  ;;  %v1127_v34 = vsel %vm624_vm11, %v1073_v19, 0.0  ;;  %v1314_v25 = vmul.f32 %v1240_v18, %v567_v3  ;;  %v570_v18 = vld [vmem:[%s4037_s18 + $0x70] sm:$0xff] }
 0x351   :  { %1128 = vadd.xlane.f32.xlu2 %v1127_v34  ;;  %v572_v34 = vld [vmem:[%s4037_s18 + $0x80] sm:$0xff] }
 0x352   :  { %v1368_v48 = vsel %vm624_vm11, %v1314_v25, 0.0 }
 0x353   :  { %1369 = vadd.xlane.f32.xlu1 %v1368_v48 }
 0x354   :  { %v1243_v39 = vpop.f32.mrf.mxu1 }
 0x355   :  { %v1002_v44 = vpop.f32.mrf.mxu0  ;;  %v1315_v47 = vmul.f32 %v1243_v39, %v568_v37 }
 0x356   :  { %2284 = vmatmul.msk.f32.gmra.mxu2 %vm624_vm11, %v2935_v26 }
 0x357   :  { %2399 = vmatmul.msk.f32.gmra.mxu1 %vm624_vm11, %v3235_v21  ;;  %v1371_v51 = vsel %vm624_vm11, %v1315_v47, 0.0 }
 0x358   :  { %2367 = vmatmul.msk.f32.gmra.mxu0 %vm624_vm11, %v3235_v21  ;;  %2316 = vmatmul.msk.f32.gmra.mxu3 %vm624_vm11, %v2935_v26  ;;  %v1074_v26 = vmul.f32 %v1002_v44, %v568_v37 }
 0x359   :  { %1372 = vadd.xlane.f32.xlu2 %v1371_v51  ;;  %v573_v51 = vld [vmem:[%s4037_s18 + $0x88] sm:$0xff] }
 0x35a   :  { %v1130_v17 = vsel %vm624_vm11, %v1074_v26, 0.0 }
 0x35c   :  { %v1246_v54 = vpop.f32.mrf.mxu1 }
 0x35d   :  { %v1005_v22 = vpop.f32.mrf.mxu0  ;;  %v1316_v58 = vmul.f32 %v1246_v54, %v569_v42 }
 0x35e   :  { %2285 = vmatmul.msk.f32.gmra.mxu2 %vm624_vm11, %v2944_v27  ;;  %v1075_v3 = vmul.f32 %v1005_v22, %v569_v42 }
 0x35f   :  { %2400 = vmatmul.msk.f32.gmra.mxu1 %vm624_vm11, %v3253_v55  ;;  %v1374_v61 = vsel %vm624_vm11, %v1316_v58, 0.0 }
 0x360   :  { %2368 = vmatmul.msk.f32.gmra.mxu0 %vm624_vm11, %v3253_v55  ;;  %2317 = vmatmul.msk.f32.gmra.mxu3 %vm624_vm11, %v2944_v27  ;;  %v1133_v27 = vsel %vm624_vm11, %v1075_v3, 0.0 }
 0x361   :  { %1375 = vadd.xlane.f32.xlu0 %v1374_v61  ;;  %1131 = vadd.xlane.f32.xlu2 %v1130_v17 }
 0x364   :  { %v1249_v63 = vpop.f32.mrf.mxu1 }
 0x365   :  { %v1008_v2 = vpop.f32.mrf.mxu0 }
 0x366   :  { %2286 = vmatmul.msk.f32.gmra.mxu2 %vm624_vm11, %v2953_v28  ;;  %v1076_v33 = vmul.f32 %v1008_v2, %v570_v18 }
 0x367   :  { %2401 = vmatmul.msk.f32.gmra.mxu1 %vm624_vm11, %v3268_v23 }
 0x368   :  { %2369 = vmatmul.msk.f32.gmra.mxu0 %vm624_vm11, %v3268_v23  ;;  %2318 = vmatmul.msk.f32.gmra.mxu3 %vm624_vm11, %v2953_v28  ;;  %v1317_v28 = vmul.f32 %v1249_v63, %v570_v18  ;;  %v1136_v44 = vsel %vm624_vm11, %v1076_v33, 0.0 }
 0x369   :  { %1134 = vadd.xlane.f32.xlu0 %v1133_v27  ;;  %1137 = vadd.xlane.f32.xlu2 %v1136_v44 }
 0x36a   :  { %v1377_v37 = vsel %vm624_vm11, %v1317_v28, 0.0  ;;  %v592_v28 = vld [vmem:[%s4035_s16] sm:$0xff] }
 0x36b   :  { %1378 = vadd.xlane.f32.xlu1 %v1377_v37 }
 0x36c   :  { %v1252_v24 = vpop.f32.mrf.mxu1  ;;  %v1096_v33 = vpop.xlane.xlu2 %1095 }
 0x36d   :  { %v1011_v19 = vpop.f32.mrf.mxu0  ;;  %v1318_v20 = vmul.f32 %v1252_v24, %v571_v9 }
 0x36e   :  { %2287 = vmatmul.msk.f32.gmra.mxu2 %vm624_vm11, %v2964_v30 }
 0x36f   :  { %2402 = vmatmul.msk.f32.gmra.mxu1 %vm624_vm11, %v3288_v11  ;;  %v1380_v39 = vsel %vm624_vm11, %v1318_v20, 0.0 }
 0x370   :  { %2370 = vmatmul.msk.f32.gmra.mxu0 %vm624_vm11, %v3288_v11  ;;  %2319 = vmatmul.msk.f32.gmra.mxu3 %vm624_vm11, %v2964_v30  ;;  %v1077_v30 = vmul.f32 %v1011_v19, %v571_v9 }
 0x371   :  { %1381 = vadd.xlane.f32.xlu0 %v1380_v39 }
 0x372   :  { %v1139_v42 = vsel %vm624_vm11, %v1077_v30, 0.0 }
 0x374   :  { %v1255_v25 = vpop.f32.mrf.mxu1 }
 0x375   :  { %v3304_v47 = vmul.f32 %v1255_v25, %v572_v34  ;;  %v1014_v48 = vpop.f32.mrf.mxu0 }
 0x376   :  { %2288 = vmatmul.msk.f32.gmra.mxu2 %vm624_vm11, %v2975_v32  ;;  %v1078_v58 = vmul.f32 %v1014_v48, %v572_v34  ;;  %v576_v34 = vld [vmem:[%s4037_s18 + $0xa0] sm:$0xff] }
 0x378   :  { %2320 = vmatmul.msk.f32.gmra.mxu3 %vm624_vm11, %v2975_v32  ;;  %v574_v32 = vld [vmem:[%s4037_s18 + $0x90] sm:$0xff]  ;;  %v1142_v61 = vsel %vm624_vm11, %v1078_v58, 0.0 }
 0x379   :  { %1140 = vadd.xlane.f32.xlu0 %v1139_v42  ;;  %v593_v42 = vld [vmem:[%s4035_s16 + $0x8] sm:$0xff] }
 0x37c   :  { %v1258_v54 = vpop.f32.mrf.mxu1 }
 0x37d   :  { %v3314_v22 = vmul.f32 %v1258_v54, %v573_v51  ;;  %v1017_v26 = vpop.f32.mrf.mxu0 }
 0x37e   :  { %2289 = vmatmul.msk.f32.gmra.mxu2 %vm624_vm11, %v2987_v35  ;;  %v1079_v3 = vmul.f32 %v1017_v26, %v573_v51  ;;  %v1099_v26 = vpop.xlane.xlu0 %1098 }
 0x380   :  { %2321 = vmatmul.msk.f32.gmra.mxu3 %vm624_vm11, %v2987_v35  ;;  %v575_v35 = vld [vmem:[%s4037_s18 + $0x98] sm:$0xff]  ;;  %v1145_v27 = vsel %vm624_vm11, %v1079_v3, 0.0 }
 0x381   :  { %1143 = vadd.xlane.f32.xlu0 %v1142_v61  ;;  %1146 = vadd.xlane.f32.xlu1 %v1145_v27 }
 0x384   :  { %v1261_v17 = vpop.f32.mrf.mxu1 }
 0x385   :  { %v3324_v63 = vmul.f32 %v1261_v17, %v574_v32  ;;  %v1020_v2 = vpop.f32.mrf.mxu0 }
 0x386   :  { %2290 = vmatmul.msk.f32.gmra.mxu2 %vm624_vm11, %v2999_v41  ;;  %v1080_v19 = vmul.f32 %v1020_v2, %v574_v32  ;;  %v577_v32 = vld [vmem:[%s4037_s18 + $0xa8] sm:$0xff] }
 0x388   :  { %2322 = vmatmul.msk.f32.gmra.mxu3 %vm624_vm11, %v2999_v41  ;;  %v1148_v39 = vsel %vm624_vm11, %v1080_v19, 0.0 }
 0x389   :  { %1149 = vadd.xlane.f32.xlu0 %v1148_v39 }
 0x38c   :  { %v1264_v18 = vpop.f32.mrf.mxu1 }
 0x38d   :  { %v3334_v9 = vmul.f32 %v1264_v18, %v575_v35  ;;  %v1023_v24 = vpop.f32.mrf.mxu0 }
 0x38e   :  { %2291 = vmatmul.msk.f32.gmra.mxu2 %vm624_vm11, %v3010_v50 }
 0x390   :  { %2323 = vmatmul.msk.f32.gmra.mxu3 %vm624_vm11, %v3010_v50  ;;  %v1081_v50 = vmul.f32 %v1023_v24, %v575_v35 }
 0x391   :  { %v738_v41 = vpop.f32.mrf.mxu2 }
 0x392   :  { %v1431_v20 = vmul.f32 %v738_v41, %v592_v28  ;;  %v1151_v17 = vsel %vm624_vm11, %v1081_v50, 0.0  ;;  %v594_v28 = vld [vmem:[%s4035_s16 + $0x10] sm:$0xff]  ;;  %v1102_v41 = vpop.xlane.xlu2 %1101 }
 0x393   :  { %v853_v37 = vpop.f32.mrf.mxu3  ;;  %1152 = vadd.xlane.f32.xlu1 %v1151_v17 }
 0x394   :  { %v1463_v44 = vmul.f32 1.442695, %v1431_v20  ;;  %v1267_v25 = vpop.f32.mrf.mxu1  ;;  %v1559_v48 = vmul.f32 %v1096_v33, %v853_v37 }
 0x395   :  { %v3347_v30 = vmul.f32 %v1267_v25, %v576_v34  ;;  %v1026_v51 = vpop.f32.mrf.mxu0 }
 0x396   :  { %2529 = vpow2.f32 %v1463_v44  ;;  %2292 = vmatmul.msk.f32.gmra.mxu2 %vm624_vm11, %v3021_v57  ;;  %1591 = vst.msk [vmem:[#allocation4] sm:$0xff] %vm185_vm8, %v1559_v48  ;;  %v1082_v19 = vmul.f32 %v1026_v51, %v576_v34  ;;  %v578_v34 = vld [vmem:[%s4037_s18 + $0xb0] sm:$0xff] }
 0x398   :  { %2324 = vmatmul.msk.f32.gmra.mxu3 %vm624_vm11, %v3021_v57  ;;  %v1154_v44 = vsel %vm624_vm11, %v1082_v19, 0.0 }
 0x399   :  { %v741_v54 = vpop.f32.mrf.mxu2 }
 0x39a   :  { %v1432_v58 = vmul.f32 %v741_v54, %v593_v42 }
 0x39b   :  { %v856_v61 = vpop.f32.mrf.mxu3  ;;  %1155 = vadd.xlane.f32.xlu1 %v1154_v44 }
 0x39c   :  { %v2530_v2 = vpop.eup %2529  ;;  %v1465_v3 = vmul.f32 1.442695, %v1432_v58  ;;  %v1270_v35 = vpop.f32.mrf.mxu1  ;;  %v1560_v27 = vmul.f32 %v1099_v26, %v856_v61  ;;  %v595_v61 = vld [vmem:[%s4035_s16 + $0x18] sm:$0xff] }
 0x39d   :  { %1527 = vst.msk [vmem:[#allocation3] sm:$0xff] %vm185_vm8, %v2530_v2  ;;  %v3362_v18 = vmul.f32 %v1270_v35, %v577_v32  ;;  %v1029_v57 = vpop.f32.mrf.mxu0  ;;  %v1631_v58 = vld [vmem:[#allocation4] sm:$0xff]  ;;  %v1105_v2 = vpop.xlane.xlu2 %1104 }
 0x39e   :  { %2531 = vpow2.f32 %v1465_v3  ;;  %v1083_v24 = vmul.f32 %v1029_v57, %v577_v32  ;;  %2293 = vmatmul.msk.f32.gmra.mxu2 %vm624_vm11, %v3039_v13  ;;  %1592 = vst.msk [vmem:[#allocation4 + $0x8] sm:$0xff] %vm185_vm8, %v1560_v27  ;;  %v579_v35 = vld [vmem:[%s4037_s18 + $0xb8] sm:$0xff] }
 0x3a0   :  { %2325 = vmatmul.msk.f32.gmra.mxu3 %vm624_vm11, %v3039_v13  ;;  %v1157_v33 = vsel %vm624_vm11, %v1083_v24, 0.0 }
 0x3a1   :  { %v744_v20 = vpop.f32.mrf.mxu2  ;;  %1158 = vadd.xlane.f32.xlu2 %v1157_v33 }
 0x3a2   :  { %v1433_v37 = vmul.f32 %v744_v20, %v594_v28 }
 0x3a3   :  { %v859_v39 = vpop.f32.mrf.mxu3 }
 0x3a4   :  { %v2532_v25 = vpop.eup %2531  ;;  %v1623_v48 = vld [vmem:[#allocation3] sm:$0xff]  ;;  %v1467_v50 = vmul.f32 1.442695, %v1433_v37  ;;  %v1273_v51 = vpop.f32.mrf.mxu1  ;;  %v1561_v42 = vmul.f32 %v1102_v41, %v859_v39 }
 0x3a5   :  { %1528 = vst.msk [vmem:[#allocation3 + $0x8] sm:$0xff] %vm185_vm8, %v2532_v25  ;;  %v1627_v13 = vmul.f32 0.0, %v1623_v48  ;;  %v3378_v54 = vmul.f32 %v1273_v51, %v578_v34  ;;  %v1032_v26 = vpop.f32.mrf.mxu0  ;;  %v1632_v39 = vld [vmem:[#allocation4 + $0x8] sm:$0xff]  ;;  %v1108_v51 = vpop.xlane.xlu0 %1107 }
 0x3a6   :  { %2533 = vpow2.f32 %v1467_v50  ;;  %2294 = vmatmul.msk.f32.gmra.mxu2 %vm624_vm11, %v3059_v53  ;;  %1593 = vst.msk [vmem:[#allocation4 + $0x10] sm:$0xff] %vm185_vm8, %v1561_v42  ;;  %v596_v48 = vld [vmem:[%s4035_s16 + $0x20] sm:$0xff] }
 0x3a7   :  { %v3383_v32 = vadd.f32 %v1631_v58, %v1627_v13 }
 0x3a8   :  { %2326 = vmatmul.msk.f32.gmra.mxu3 %vm624_vm11, %v3059_v53  ;;  %v1084_v53 = vmul.f32 %v1032_v26, %v578_v34  ;;  %v580_v26 = vld [vmem:[%s4037_s18 + $0xc0] sm:$0xff] }
 0x3a9   :  { %1639 = vst.msk [vmem:[#allocation5] sm:$0xff] %vm185_vm8, %v3383_v32  ;;  %v747_v17 = vpop.f32.mrf.mxu2 }
 0x3aa   :  { %v1434_v3 = vmul.f32 %v747_v17, %v595_v61  ;;  %v1160_v42 = vsel %vm624_vm11, %v1084_v53, 0.0 }
 0x3ab   :  { %v862_v27 = vpop.f32.mrf.mxu3  ;;  %1161 = vadd.xlane.f32.xlu1 %v1160_v42 }
 0x3ac   :  { %v2534_v57 = vpop.eup %2533  ;;  %v1624_v24 = vld [vmem:[#allocation3 + $0x8] sm:$0xff]  ;;  %v1469_v19 = vmul.f32 1.442695, %v1434_v3  ;;  %v1276_v28 = vpop.f32.mrf.mxu1  ;;  %v1562_v41 = vmul.f32 %v1105_v2, %v862_v27 }
 0x3ad   :  { %1529 = vst.msk [vmem:[#allocation3 + $0x10] sm:$0xff] %vm185_vm8, %v2534_v57  ;;  %v1628_v33 = vmul.f32 0.0, %v1624_v24  ;;  %v3396_v20 = vmul.f32 %v1276_v28, %v579_v35  ;;  %v1035_v37 = vpop.f32.mrf.mxu0  ;;  %v1633_v24 = vld [vmem:[#allocation4 + $0x10] sm:$0xff] }
 0x3ae   :  { %2535 = vpow2.f32 %v1469_v19  ;;  %v1085_v44 = vmul.f32 %v1035_v37, %v579_v35  ;;  %2295 = vmatmul.msk.f32.gmra.mxu2 %vm624_vm11, %v3079_v60  ;;  %1594 = vst.msk [vmem:[#allocation4 + $0x18] sm:$0xff] %vm185_vm8, %v1562_v41  ;;  %v597_v41 = vld [vmem:[%s4035_s16 + $0x28] sm:$0xff]  ;;  %v1111_v37 = vpop.xlane.xlu1 %1110 }
 0x3af   :  { %v3401_v25 = vadd.f32 %v1632_v39, %v1628_v33 }
 0x3b0   :  { %2327 = vmatmul.msk.f32.gmra.mxu3 %vm624_vm11, %v3079_v60  ;;  %v1163_v50 = vsel %vm624_vm11, %v1085_v44, 0.0  ;;  %v3434_v44 = vld [vmem:[%s4037_s18 + $0xc8] sm:$0xff] }
 0x3b1   :  { %1640 = vst.msk [vmem:[#allocation5 + $0x8] sm:$0xff] %vm185_vm8, %v3401_v25  ;;  %v750_v34 = vpop.f32.mrf.mxu2  ;;  %1164 = vadd.xlane.f32.xlu2 %v1163_v50 }
 0x3b2   :  { %v1435_v13 = vmul.f32 %v750_v34, %v596_v48 }
 0x3b3   :  { %v865_v58 = vpop.f32.mrf.mxu3 }
 0x3b4   :  { %v2536_v61 = vpop.eup %2535  ;;  %v1625_v17 = vld [vmem:[#allocation3 + $0x10] sm:$0xff]  ;;  %v1471_v60 = vmul.f32 1.442695, %v1435_v13  ;;  %v1279_v2 = vpop.f32.mrf.mxu1  ;;  %v1563_v3 = vmul.f32 %v1108_v51, %v865_v58 }
 0x3b5   :  { %1530 = vst.msk [vmem:[#allocation3 + $0x18] sm:$0xff] %vm185_vm8, %v2536_v61  ;;  %v1629_v35 = vmul.f32 0.0, %v1625_v17  ;;  %v3416_v27 = vmul.f32 %v1279_v2, %v580_v26  ;;  %v1038_v57 = vpop.f32.mrf.mxu0  ;;  %v1634_v58 = vld [vmem:[#allocation4 + $0x18] sm:$0xff] }
 0x3b6   :  { %2537 = vpow2.f32 %v1471_v60  ;;  %v1086_v19 = vmul.f32 %v1038_v57, %v580_v26  ;;  %2296 = vmatmul.msk.f32.gmra.mxu2 %vm624_vm11, %v3098_v1  ;;  %1595 = vst.msk [vmem:[#allocation4 + $0x20] sm:$0xff] %vm185_vm8, %v1563_v3  ;;  %v598_v60 = vld [vmem:[%s4035_s16 + $0x30] sm:$0xff] }
 0x3b7   :  { %v3421_v28 = vadd.f32 %v1633_v24, %v1629_v35  ;;  %v1114_v35 = vpop.xlane.xlu0 %1113  ;;  %v582_v24 = vld [vmem:[%s4037_s18 + $0xd0] sm:$0xff] }
 0x3b8   :  { %2328 = vmatmul.msk.f32.gmra.mxu3 %vm624_vm11, %v3098_v1  ;;  %v1166_v33 = vsel %vm624_vm11, %v1086_v19, 0.0 }
 0x3b9   :  { %1641 = vst.msk [vmem:[#allocation5 + $0x10] sm:$0xff] %vm185_vm8, %v3421_v28  ;;  %v753_v53 = vpop.f32.mrf.mxu2  ;;  %1167 = vadd.xlane.f32.xlu2 %v1166_v33 }
 0x3ba   :  { %v1436_v39 = vmul.f32 %v753_v53, %v597_v41 }
 0x3bb   :  { %v868_v48 = vpop.f32.mrf.mxu3 }
 0x3bc   :  { %v2538_v50 = vpop.eup %2537  ;;  %v1626_v34 = vld [vmem:[#allocation3 + $0x18] sm:$0xff]  ;;  %v1473_v51 = vmul.f32 1.442695, %v1436_v39  ;;  %v3436_v42 = vpop.f32.mrf.mxu1  ;;  %v1564_v1 = vmul.f32 %v1111_v37, %v868_v48 }
 0x3bd   :  { %1531 = vst.msk [vmem:[#allocation3 + $0x20] sm:$0xff] %vm185_vm8, %v2538_v50  ;;  %v1630_v13 = vmul.f32 0.0, %v1626_v34  ;;  %v1041_v26 = vpop.f32.mrf.mxu0  ;;  %v1653_v34 = vld [vmem:[#allocation4 + $0x20] sm:$0xff] }
 0x3be   :  { %2539 = vpow2.f32 %v1473_v51  ;;  %v1087_v61 = vmul.f32 %v1041_v26, %v3434_v44  ;;  %2297 = vmatmul.msk.f32.gmra.mxu2 %vm624_vm11, %v3117_v8  ;;  %1596 = vst.msk [vmem:[#allocation4 + $0x28] sm:$0xff] %vm185_vm8, %v1564_v1 }
 0x3bf   :  { %v3443_v17 = vadd.f32 %v1634_v58, %v1630_v13  ;;  %v599_v13 = vld [vmem:[%s4035_s16 + $0x38] sm:$0xff]  ;;  %v1117_v58 = vpop.xlane.xlu1 %1116 }
 0x3c0   :  { %2329 = vmatmul.msk.f32.gmra.mxu3 %vm624_vm11, %v3117_v8  ;;  %v1169_v2 = vsel %vm624_vm11, %v1087_v61, 0.0 }
 0x3c1   :  { %1642 = vst.msk [vmem:[#allocation5 + $0x18] sm:$0xff] %vm185_vm8, %v3443_v17  ;;  %v756_v3 = vpop.f32.mrf.mxu2  ;;  %1170 = vadd.xlane.f32.xlu0 %v1169_v2 }
 0x3c2   :  { %v1437_v57 = vmul.f32 %v756_v3, %v598_v60  ;;  %v3472_v60 = vpop.xlane.xlu2 %1363  ;;  %v583_v3 = vld [vmem:[%s4037_s18 + $0xd8] sm:$0xff] }
 0x3c3   :  { %v871_v19 = vpop.f32.mrf.mxu3 }
 0x3c4   :  { %v2540_v41 = vpop.eup %2539  ;;  %v1644_v33 = vld [vmem:[#allocation3 + $0x20] sm:$0xff]  ;;  %v1475_v53 = vmul.f32 1.442695, %v1437_v57  ;;  %v1285_v37 = vpop.f32.mrf.mxu1  ;;  %v1565_v39 = vmul.f32 %v1114_v35, %v871_v19 }
 0x3c5   :  { %1532 = vst.msk [vmem:[#allocation3 + $0x28] sm:$0xff] %vm185_vm8, %v2540_v41  ;;  %v1648_v8 = vmul.f32 %v1644_v33, %v3383_v32  ;;  %v1329_v48 = vmul.f32 %v1285_v37, %v582_v24  ;;  %v1044_v50 = vpop.f32.mrf.mxu0 }
 0x3c6   :  { %2541 = vpow2.f32 %v1475_v53  ;;  %v1088_v51 = vmul.f32 %v1044_v50, %v582_v24  ;;  %2298 = vmatmul.msk.f32.gmra.mxu2 %vm624_vm11, %v3138_v16  ;;  %1597 = vst.msk [vmem:[#allocation4 + $0x30] sm:$0xff] %vm185_vm8, %v1565_v39  ;;  %v1654_v39 = vld [vmem:[#allocation4 + $0x28] sm:$0xff] }
 0x3c7   :  { %v3461_v1 = vadd.f32 %v1653_v34, %v1648_v8  ;;  %v1413_v26 = vsel %vm624_vm11, %v1329_v48, 0.0  ;;  %v600_v50 = vld [vmem:[%s4035_s16 + $0x40] sm:$0xff] }
 0x3c8   :  { %2330 = vmatmul.msk.f32.gmra.mxu3 %vm624_vm11, %v3138_v16  ;;  %v1172_v32 = vsel %vm624_vm11, %v1088_v51, 0.0 }
 0x3c9   :  { %1662 = vst.msk [vmem:[#allocation5 + $0x20] sm:$0xff] %vm185_vm8, %v3461_v1  ;;  %v759_v61 = vpop.f32.mrf.mxu2  ;;  %1414 = vadd.xlane.f32.xlu0 %v1413_v26  ;;  %1173 = vadd.xlane.f32.xlu2 %v1172_v32 }
 0x3ca   :  { %v1438_v2 = vmul.f32 %v759_v61, %v599_v13  ;;  %v1120_v13 = vpop.xlane.xlu1 %1119  ;;  %v1123_v61 = vpop.xlane.xlu2 %1122 }
 0x3cb   :  { %v874_v35 = vpop.f32.mrf.mxu3 }
 0x3cc   :  { %v2542_v57 = vpop.eup %2541  ;;  %v1645_v24 = vld [vmem:[#allocation3 + $0x28] sm:$0xff]  ;;  %v1477_v19 = vmul.f32 1.442695, %v1438_v2  ;;  %v1288_v16 = vpop.f32.mrf.mxu1  ;;  %v1566_v41 = vmul.f32 %v1117_v58, %v874_v35 }
 0x3cd   :  { %1533 = vst.msk [vmem:[#allocation3 + $0x30] sm:$0xff] %vm185_vm8, %v2542_v57  ;;  %v1649_v33 = vmul.f32 %v1645_v24, %v3401_v25  ;;  %v1330_v53 = vmul.f32 %v1288_v16, %v583_v3  ;;  %v1047_v37 = vpop.f32.mrf.mxu0  ;;  %v584_v58 = vld [vmem:[%s4037_s18 + $0xe0] sm:$0xff] }
 0x3ce   :  { %2543 = vpow2.f32 %v1477_v19  ;;  %v1089_v8 = vmul.f32 %v1047_v37, %v583_v3  ;;  %2299 = vmatmul.msk.f32.gmra.mxu2 %vm624_vm11, %v3161_v40  ;;  %1598 = vst.msk [vmem:[#allocation4 + $0x38] sm:$0xff] %vm185_vm8, %v1566_v41  ;;  %v1655_v41 = vld [vmem:[#allocation4 + $0x30] sm:$0xff] }
 0x3cf   :  { %v3482_v48 = vadd.f32 %v1654_v39, %v1649_v33  ;;  %v1416_v34 = vsel %vm624_vm11, %v1330_v53, 0.0  ;;  %v601_v53 = vld [vmem:[%s4035_s16 + $0x48] sm:$0xff] }
 0x3d0   :  { %1417 = vadd.xlane.f32.xlu1 %v1416_v34  ;;  %v1175_v25 = vsel %vm624_vm11, %v1089_v8, 0.0  ;;  %2331 = vmatmul.msk.f32.gmra.mxu3 %vm624_vm11, %v3161_v40 }
 0x3d1   :  { %1663 = vst.msk [vmem:[#allocation5 + $0x28] sm:$0xff] %vm185_vm8, %v3482_v48  ;;  %v762_v51 = vpop.f32.mrf.mxu2  ;;  %1176 = vadd.xlane.f32.xlu0 %v1175_v25 }
 0x3d2   :  { %v1439_v26 = vmul.f32 %v762_v51, %v600_v50  ;;  %v585_v50 = vld [vmem:[%s4037_s18 + $0xe8] sm:$0xff] }
 0x3d3   :  { %v877_v32 = vpop.f32.mrf.mxu3 }
 0x3d4   :  { %v2544_v2 = vpop.eup %2543  ;;  %v1646_v3 = vld [vmem:[#allocation3 + $0x30] sm:$0xff]  ;;  %v1479_v35 = vmul.f32 1.442695, %v1439_v26  ;;  %v1291_v57 = vpop.f32.mrf.mxu1  ;;  %v1567_v24 = vmul.f32 %v1120_v13, %v877_v32 }
 0x3d5   :  { %1534 = vst.msk [vmem:[#allocation3 + $0x38] sm:$0xff] %vm185_vm8, %v2544_v2  ;;  %v1650_v40 = vmul.f32 %v1646_v3, %v3421_v28  ;;  %v1331_v19 = vmul.f32 %v1291_v57, %v584_v58  ;;  %v1050_v16 = vpop.f32.mrf.mxu0  ;;  %v1656_v57 = vld [vmem:[#allocation4 + $0x38] sm:$0xff] }
 0x3d6   :  { %2545 = vpow2.f32 %v1479_v35  ;;  %2300 = vmatmul.msk.f32.gmra.mxu2 %vm624_vm11, %v3181_v36  ;;  %1599 = vst.msk [vmem:[#allocation4 + $0x40] sm:$0xff] %vm185_vm8, %v1567_v24  ;;  %v1090_v28 = vmul.f32 %v1050_v16, %v584_v58  ;;  %v1129_v35 = vpop.xlane.xlu2 %1128  ;;  %v3527_v16 = vpop.xlane.xlu0 %1366 }
 0x3d7   :  { %v3501_v33 = vadd.f32 %v1655_v41, %v1650_v40  ;;  %v1419_v37 = vsel %vm624_vm11, %v1331_v19, 0.0 }
 0x3d8   :  { %1420 = vadd.xlane.f32.xlu2 %v1419_v37  ;;  %2332 = vmatmul.msk.f32.gmra.mxu3 %vm624_vm11, %v3181_v36  ;;  %v1178_v58 = vsel %vm624_vm11, %v1090_v28, 0.0  ;;  %v586_v28 = vld [vmem:[%s4037_s18 + $0xf0] sm:$0xff] }
 0x3d9   :  { %1664 = vst.msk [vmem:[#allocation5 + $0x30] sm:$0xff] %vm185_vm8, %v3501_v33  ;;  %v765_v39 = vpop.f32.mrf.mxu2 }
 0x3da   :  { %v1440_v8 = vmul.f32 %v765_v39, %v601_v53  ;;  %v1126_v53 = vpop.xlane.xlu1 %1125 }
 0x3db   :  { %v880_v34 = vpop.f32.mrf.mxu3 }
 0x3dc   :  { %v2546_v25 = vpop.eup %2545  ;;  %v1647_v51 = vld [vmem:[#allocation3 + $0x38] sm:$0xff]  ;;  %v1481_v13 = vmul.f32 1.442695, %v1440_v8  ;;  %v1294_v26 = vpop.f32.mrf.mxu1  ;;  %v1568_v32 = vmul.f32 %v1123_v61, %v880_v34 }
 0x3dd   :  { %1535 = vst.msk [vmem:[#allocation3 + $0x40] sm:$0xff] %vm185_vm8, %v2546_v25  ;;  %v1651_v36 = vmul.f32 %v1647_v51, %v3443_v17  ;;  %v1332_v2 = vmul.f32 %v1294_v26, %v585_v50  ;;  %v1053_v3 = vpop.f32.mrf.mxu0  ;;  %v602_v61 = vld [vmem:[%s4035_s16 + $0x50] sm:$0xff] }
 0x3de   :  { %2547 = vpow2.f32 %v1481_v13  ;;  %v1091_v24 = vmul.f32 %v1053_v3, %v585_v50  ;;  %2301 = vmatmul.msk.f32.gmra.mxu2 %vm624_vm11, %v3196_v62  ;;  %1600 = vst.msk [vmem:[#allocation4 + $0x48] sm:$0xff] %vm185_vm8, %v1568_v32  ;;  %v603_v3 = vld [vmem:[%s4035_s16 + $0x58] sm:$0xff] }
 0x3df   :  { %v3520_v40 = vadd.f32 %v1656_v57, %v1651_v36  ;;  %v1422_v17 = vsel %vm624_vm11, %v1332_v2, 0.0  ;;  %v1676_v36 = vld [vmem:[#allocation4 + $0x40] sm:$0xff]  ;;  %v3547_v57 = vpop.xlane.xlu2 %1372 }
 0x3e0   :  { %1423 = vadd.xlane.f32.xlu0 %v1422_v17  ;;  %v1181_v19 = vsel %vm624_vm11, %v1091_v24, 0.0  ;;  %1179 = vadd.xlane.f32.xlu2 %v1178_v58 }
 0x3e1   :  { %1665 = vst.msk [vmem:[#allocation5 + $0x38] sm:$0xff] %vm185_vm8, %v3520_v40  ;;  %v768_v41 = vpop.f32.mrf.mxu2  ;;  %1182 = vadd.xlane.f32.xlu1 %v1181_v19  ;;  %2333 = vmatmul.msk.f32.gmra.mxu3 %vm624_vm11, %v3196_v62  ;;  %v587_v19 = vld [vmem:[%s4037_s18 + $0xf8] sm:$0xff] }
 0x3e2   :  { %v1441_v37 = vmul.f32 %v768_v41, %v602_v61  ;;  %v3552_v61 = vpop.xlane.xlu0 %1375 }
 0x3e3   :  { %v883_v39 = vpop.f32.mrf.mxu3 }
 0x3e4   :  { %v2548_v8 = vpop.eup %2547  ;;  %v1667_v50 = vld [vmem:[#allocation3 + $0x40] sm:$0xff]  ;;  %v1483_v34 = vmul.f32 1.442695, %v1441_v37  ;;  %v1297_v25 = vpop.f32.mrf.mxu1  ;;  %v1569_v51 = vmul.f32 %v1126_v53, %v883_v39  ;;  %v1310_v37 = vmul.f32 %v3133_v15, %v3156_v38  ;;  %v604_v38 = vld [vmem:[%s4035_s16 + $0x60] sm:$0xff] }
 0x3e5   :  { %1536 = vst.msk [vmem:[#allocation3 + $0x48] sm:$0xff] %vm185_vm8, %v2548_v8  ;;  %v1671_v13 = vmul.f32 %v1667_v50, %v3461_v1  ;;  %v1333_v26 = vmul.f32 %v1297_v25, %v586_v28  ;;  %v1056_v32 = vpop.f32.mrf.mxu0 }
 0x3e6   :  { %2549 = vpow2.f32 %v1483_v34  ;;  %v1092_v62 = vmul.f32 %v1056_v32, %v586_v28  ;;  %2302 = vmatmul.msk.f32.gmra.mxu2 %vm624_vm11, %v3216_v6  ;;  %1601 = vst.msk [vmem:[#allocation4 + $0x50] sm:$0xff] %vm185_vm8, %v1569_v51 }
 0x3e7   :  { %v3541_v2 = vadd.f32 %v1676_v36, %v1671_v13  ;;  %v1425_v58 = vsel %vm624_vm11, %v1333_v26, 0.0  ;;  %v1677_v13 = vld [vmem:[#allocation4 + $0x48] sm:$0xff]  ;;  %v1132_v36 = vpop.xlane.xlu2 %1131 }
 0x3e8   :  { %v1184_v1 = vsel %vm624_vm11, %v1092_v62, 0.0 }
 0x3e9   :  { %1685 = vst.msk [vmem:[#allocation5 + $0x40] sm:$0xff] %vm185_vm8, %v3541_v2  ;;  %v771_v24 = vpop.f32.mrf.mxu2  ;;  %1426 = vadd.xlane.f32.xlu1 %v1425_v58  ;;  %1185 = vadd.xlane.f32.xlu0 %v1184_v1 }
 0x3ea   :  { %v1442_v17 = vmul.f32 %v771_v24, %v603_v3  ;;  %2334 = vmatmul.msk.f32.gmra.mxu3 %vm624_vm11, %v3216_v6  ;;  %v1328_v3 = vmul.f32 %v3436_v42, %v3434_v44  ;;  %v1135_v1 = vpop.xlane.xlu0 %1134  ;;  %v605_v42 = vld [vmem:[%s4035_s16 + $0x68] sm:$0xff] }
 0x3eb   :  { %v886_v41 = vpop.f32.mrf.mxu3 }
 0x3ec   :  { %v2550_v53 = vpop.eup %2549  ;;  %v1668_v28 = vld [vmem:[#allocation3 + $0x48] sm:$0xff]  ;;  %v1485_v39 = vmul.f32 1.442695, %v1442_v17  ;;  %v1300_v8 = vpop.f32.mrf.mxu1  ;;  %v1570_v50 = vmul.f32 %v1129_v35, %v886_v41  ;;  %v1410_v44 = vsel %vm624_vm11, %v1328_v3, 0.0 }
 0x3ed   :  { %1537 = vst.msk [vmem:[#allocation3 + $0x50] sm:$0xff] %vm185_vm8, %v2550_v53  ;;  %v1672_v34 = vmul.f32 %v1668_v28, %v3482_v48  ;;  %v1334_v25 = vmul.f32 %v1300_v8, %v587_v19  ;;  %v1059_v51 = vpop.f32.mrf.mxu0  ;;  %v1356_v48 = vsel %vm624_vm11, %v1310_v37, 0.0  ;;  %v1678_v37 = vld [vmem:[#allocation4 + $0x50] sm:$0xff]  ;;  %v1404_v28 = vsel %vm624_vm11, %v3396_v20, 0.0  ;;  %v2605_v20 = vld [vmem:[%s4037_s18 + $0x20] sm:$0xff] }
 0x3ee   :  { %2551 = vpow2.f32 %v1485_v39  ;;  %v1093_v26 = vmul.f32 %v1059_v51, %v587_v19  ;;  %2303 = vmatmul.msk.f32.gmra.mxu2 %vm624_vm11, %v3235_v21  ;;  %1602 = vst.msk [vmem:[#allocation4 + $0x58] sm:$0xff] %vm185_vm8, %v1570_v50  ;;  %v1309_v50 = vmul.f32 %v3112_v7, %v3131_v14  ;;  %v606_v14 = vld [vmem:[%s4035_s16 + $0x70] sm:$0xff] }
 0x3ef   :  { %v3566_v6 = vadd.f32 %v1677_v13, %v1672_v34  ;;  %v1428_v15 = vsel %vm624_vm11, %v1334_v25, 0.0 }
 0x3f0   :  { %1429 = vadd.xlane.f32.xlu2 %v1428_v15  ;;  %v1187_v35 = vsel %vm624_vm11, %v1093_v26, 0.0 }
 0x3f1   :  { %1686 = vst.msk [vmem:[#allocation5 + $0x48] sm:$0xff] %vm185_vm8, %v3566_v6  ;;  %v774_v32 = vpop.f32.mrf.mxu2  ;;  %1357 = vadd.xlane.f32.xlu0 %v1356_v48  ;;  %1188 = vadd.xlane.f32.xlu1 %v1187_v35  ;;  %v1407_v48 = vsel %vm624_vm11, %v3416_v27, 0.0 }
 0x3f2   :  { %v1443_v62 = vmul.f32 %v774_v32, %v604_v38  ;;  %2335 = vmatmul.msk.f32.gmra.mxu3 %vm624_vm11, %v3235_v21  ;;  %v3607_v38 = vpop.xlane.xlu0 %1381  ;;  %v1138_v32 = vpop.xlane.xlu2 %1137 }
 0x3f3   :  { %v889_v58 = vpop.f32.mrf.mxu3 }
 0x3f4   :  { %v2552_v24 = vpop.eup %2551  ;;  %v1669_v17 = vld [vmem:[#allocation3 + $0x50] sm:$0xff]  ;;  %v1487_v19 = vmul.f32 1.442695, %v1443_v62  ;;  %v1571_v41 = vmul.f32 %v1132_v36, %v889_v58 }
 0x3f5   :  { %1538 = vst.msk [vmem:[#allocation3 + $0x58] sm:$0xff] %vm185_vm8, %v2552_v24  ;;  %v1673_v53 = vmul.f32 %v1669_v17, %v3501_v33  ;;  %v1359_v33 = vsel %vm624_vm11, %v3163_v43, 0.0  ;;  %v1307_v43 = vmul.f32 %v2605_v20, %v3074_v59  ;;  %v1353_v59 = vsel %vm624_vm11, %v1309_v50, 0.0  ;;  %v2606_v58 = vld [vmem:[%s4037_s18 + $0x28] sm:$0xff] }
 0x3f6   :  { %2553 = vpow2.f32 %v1487_v19  ;;  %2304 = vmatmul.msk.f32.gmra.mxu2 %vm624_vm11, %v3253_v55  ;;  %1603 = vst.msk [vmem:[#allocation4 + $0x60] sm:$0xff] %vm185_vm8, %v1571_v41  ;;  %v2608_v50 = vld [vmem:[%s4037_s18 + $0x8] sm:$0xff] }
 0x3f7   :  { %v3585_v21 = vadd.f32 %v1678_v37, %v1673_v53  ;;  %v1401_v53 = vsel %vm624_vm11, %v3378_v54, 0.0 }
 0x3f8   :  { %1411 = vadd.xlane.f32.xlu2 %v1410_v44  ;;  %v3641_v44 = vpop.xlane.xlu1 %1369 }
 0x3f9   :  { %1687 = vst.msk [vmem:[#allocation5 + $0x50] sm:$0xff] %vm185_vm8, %v3585_v21  ;;  %v777_v39 = vpop.f32.mrf.mxu2  ;;  %1405 = vadd.xlane.f32.xlu0 %v1404_v28  ;;  %1360 = vadd.xlane.f32.xlu1 %v1359_v33  ;;  %v2607_v33 = vld [vmem:[%s4037_s18 + $0x18] sm:$0xff] }
 0x3fa   :  { %v1444_v8 = vmul.f32 %v777_v39, %v605_v42  ;;  %2336 = vmatmul.msk.f32.gmra.mxu3 %vm624_vm11, %v3253_v55  ;;  %v1679_v55 = vld [vmem:[#allocation4 + $0x58] sm:$0xff]  ;;  %v1141_v37 = vpop.xlane.xlu0 %1140  ;;  %v1306_v39 = vmul.f32 %v2607_v33, %v3054_v52 }
 0x3fb   :  { %v892_v34 = vpop.f32.mrf.mxu3 }
 0x3fc   :  { %v2554_v25 = vpop.eup %2553  ;;  %v1670_v51 = vld [vmem:[#allocation3 + $0x58] sm:$0xff]  ;;  %v1489_v13 = vmul.f32 1.442695, %v1444_v8  ;;  %v1572_v26 = vmul.f32 %v1135_v1, %v892_v34  ;;  %v1308_v1 = vmul.f32 %v2606_v58, %v3093_v0  ;;  %v607_v0 = vld [vmem:[%s4035_s16 + $0x78] sm:$0xff]  ;;  %v1304_v34 = vmul.f32 %v2608_v50, %v3016_v56 }
 0x3fd   :  { %1539 = vst.msk [vmem:[#allocation3 + $0x60] sm:$0xff] %vm185_vm8, %v2554_v25  ;;  %v1674_v15 = vmul.f32 %v1670_v51, %v3520_v40  ;;  %v1347_v40 = vsel %vm624_vm11, %v1307_v43, 0.0  ;;  %v1699_v41 = vld [vmem:[#allocation4 + $0x60] sm:$0xff] }
 0x3fe   :  { %2555 = vpow2.f32 %v1489_v13  ;;  %2305 = vmatmul.msk.f32.gmra.mxu2 %vm624_vm11, %v3268_v23  ;;  %1604 = vst.msk [vmem:[#allocation4 + $0x68] sm:$0xff] %vm185_vm8, %v1572_v26  ;;  %v1350_v42 = vsel %vm624_vm11, %v1308_v1, 0.0  ;;  %v1344_v13 = vsel %vm624_vm11, %v1306_v39, 0.0  ;;  %v608_v26 = vld [vmem:[%s4035_s16 + $0x80] sm:$0xff] }
 0x3ff   :  { %v3612_v7 = vadd.f32 %v1679_v55, %v1674_v15  ;;  %v1338_v15 = vsel %vm624_vm11, %v1304_v34, 0.0 }
 0x400   :  { %1354 = vadd.xlane.f32.xlu2 %v1353_v59  ;;  %v3667_v56 = vpop.xlane.xlu1 %1378 }
 0x401   :  { %1688 = vst.msk [vmem:[#allocation5 + $0x58] sm:$0xff] %vm185_vm8, %v3612_v7  ;;  %v780_v35 = vpop.f32.mrf.mxu2  ;;  %1348 = vadd.xlane.f32.xlu0 %v1347_v40  ;;  %1408 = vadd.xlane.f32.xlu1 %v1407_v48 }
 0x402   :  { %v1445_v36 = vmul.f32 %v780_v35, %v606_v14  ;;  %2337 = vmatmul.msk.f32.gmra.mxu3 %vm624_vm11, %v3268_v23  ;;  %v1144_v59 = vpop.xlane.xlu0 %1143  ;;  %v2609_v35 = vld [vmem:[%s4037_s18 + $0x10] sm:$0xff] }
 0x403   :  { %v895_v62 = vpop.f32.mrf.mxu3 }
 0x404   :  { %v2556_v3 = vpop.eup %2555  ;;  %v1690_v27 = vld [vmem:[#allocation3 + $0x60] sm:$0xff]  ;;  %v1491_v24 = vmul.f32 1.442695, %v1445_v36  ;;  %v1573_v17 = vmul.f32 %v1138_v32, %v895_v62  ;;  %v1305_v32 = vmul.f32 %v2609_v35, %v3034_v12  ;;  %v609_v12 = vld [vmem:[%s4035_s16 + $0x88] sm:$0xff] }
 0x405   :  { %1540 = vst.msk [vmem:[#allocation3 + $0x68] sm:$0xff] %vm185_vm8, %v2556_v3  ;;  %v1694_v19 = vmul.f32 %v1690_v27, %v3541_v2  ;;  %v1395_v2 = vsel %vm624_vm11, %v3347_v30, 0.0  ;;  %v1700_v51 = vld [vmem:[#allocation4 + $0x68] sm:$0xff]  ;;  %v1392_v27 = vsel %vm624_vm11, %v3334_v9, 0.0 }
 0x406   :  { %2557 = vpow2.f32 %v1491_v24  ;;  %2306 = vmatmul.msk.f32.gmra.mxu2 %vm624_vm11, %v3288_v11  ;;  %1605 = vst.msk [vmem:[#allocation4 + $0x70] sm:$0xff] %vm185_vm8, %v1573_v17  ;;  %v1386_v24 = vsel %vm624_vm11, %v3314_v22, 0.0  ;;  %v1341_v17 = vsel %vm624_vm11, %v1305_v32, 0.0  ;;  %v2610_v9 = vld [vmem:[%s4037_s18] sm:$0xff] }
 0x407   :  { %v3634_v23 = vadd.f32 %v1699_v41, %v1694_v19 }
 0x408   :  { %1402 = vadd.xlane.f32.xlu2 %v1401_v53  ;;  %v1147_v19 = vpop.xlane.xlu1 %1146  ;;  %v1303_v53 = vmul.f32 %v2610_v9, %v3005_v49  ;;  %v610_v49 = vld [vmem:[%s4035_s16 + $0x90] sm:$0xff] }
 0x409   :  { %1708 = vst.msk [vmem:[#allocation5 + $0x60] sm:$0xff] %vm185_vm8, %v3634_v23  ;;  %v783_v28 = vpop.f32.mrf.mxu2  ;;  %1396 = vadd.xlane.f32.xlu0 %v1395_v2  ;;  %1351 = vadd.xlane.f32.xlu1 %v1350_v42 }
 0x40a   :  { %v1446_v54 = vmul.f32 %v783_v28, %v607_v0  ;;  %2338 = vmatmul.msk.f32.gmra.mxu3 %vm624_vm11, %v3288_v11  ;;  %v1335_v39 = vsel %vm624_vm11, %v1303_v53, 0.0 }
 0x40b   :  { %v898_v8 = vpop.f32.mrf.mxu3 }
 0x40c   :  { %v2558_v30 = vpop.eup %2557  ;;  %v1691_v25 = vld [vmem:[#allocation3 + $0x68] sm:$0xff]  ;;  %v1493_v20 = vmul.f32 1.442695, %v1446_v54  ;;  %v1574_v43 = vmul.f32 %v1141_v37, %v898_v8  ;;  %v1389_v8 = vsel %vm624_vm11, %v3324_v63, 0.0 }
 0x40d   :  { %1541 = vst.msk [vmem:[#allocation3 + $0x70] sm:$0xff] %vm185_vm8, %v2558_v30  ;;  %v1695_v11 = vmul.f32 %v1691_v25, %v3566_v6  ;;  %v1398_v6 = vsel %vm624_vm11, %v3362_v18, 0.0  ;;  %v1701_v58 = vld [vmem:[#allocation4 + $0x70] sm:$0xff]  ;;  %v1150_v30 = vpop.xlane.xlu0 %1149 }
 0x40e   :  { %2559 = vpow2.f32 %v1493_v20  ;;  %1606 = vst.msk [vmem:[#allocation4 + $0x78] sm:$0xff] %vm185_vm8, %v1574_v43 }
 0x40f   :  { %v3661_v52 = vadd.f32 %v1700_v51, %v1695_v11 }
 0x410   :  { %1345 = vadd.xlane.f32.xlu2 %v1344_v13  ;;  %v1153_v63 = vpop.xlane.xlu1 %1152 }
 0x411   :  { %1709 = vst.msk [vmem:[#allocation5 + $0x68] sm:$0xff] %vm185_vm8, %v3661_v52  ;;  %v786_v55 = vpop.f32.mrf.mxu2  ;;  %1339 = vadd.xlane.f32.xlu0 %v1338_v15  ;;  %1399 = vadd.xlane.f32.xlu1 %v1398_v6  ;;  %v611_v15 = vld [vmem:[%s4035_s16 + $0x98] sm:$0xff] }
 0x412   :  { %v1447_v14 = vmul.f32 %v786_v55, %v608_v26  ;;  %v1383_v55 = vsel %vm624_vm11, %v3304_v47, 0.0 }
 0x413   :  { %v901_v40 = vpop.f32.mrf.mxu3 }
 0x414   :  { %v2560_v48 = vpop.eup %2559  ;;  %v1692_v36 = vld [vmem:[#allocation3 + $0x70] sm:$0xff]  ;;  %v1495_v62 = vmul.f32 1.442695, %v1447_v14  ;;  %v1575_v3 = vmul.f32 %v1144_v59, %v901_v40  ;;  %v3718_v6 = vpop.xlane.xlu2 %1158 }
 0x415   :  { %1542 = vst.msk [vmem:[#allocation3 + $0x78] sm:$0xff] %vm185_vm8, %v2560_v48  ;;  %v1696_v18 = vmul.f32 %v1692_v36, %v3585_v21  ;;  %v1702_v54 = vld [vmem:[#allocation4 + $0x78] sm:$0xff] }
 0x416   :  { %2561 = vpow2.f32 %v1495_v62  ;;  %1607 = vst.msk [vmem:[#allocation4 + $0x80] sm:$0xff] %vm185_vm8, %v1575_v3 }
 0x417   :  { %v3681_v1 = vadd.f32 %v1701_v58, %v1696_v18  ;;  %v1816_v58 = vld [vmem:[#allocation5 + $0x60] sm:$0xff] }
 0x418   :  { %1393 = vadd.xlane.f32.xlu2 %v1392_v27  ;;  %v1817_v35 = vld [vmem:[#allocation5 + $0x68] sm:$0xff] }
 0x419   :  { %1710 = vst.msk [vmem:[#allocation5 + $0x70] sm:$0xff] %vm185_vm8, %v3681_v1  ;;  %v789_v21 = vpop.f32.mrf.mxu2  ;;  %1387 = vadd.xlane.f32.xlu0 %v1386_v24  ;;  %1342 = vadd.xlane.f32.xlu1 %v1341_v17 }
 0x41a   :  { %v1448_v41 = vmul.f32 %v789_v21, %v609_v12  ;;  %v1849_v12 = vmul.f32 %v1817_v35, %v3552_v61  ;;  %v1848_v21 = vmul.f32 %v1816_v58, %v3547_v57 }
 0x41b   :  { %v904_v0 = vpop.f32.mrf.mxu3 }
 0x41c   :  { %v2562_v37 = vpop.eup %2561  ;;  %v1693_v2 = vld [vmem:[#allocation3 + $0x78] sm:$0xff]  ;;  %v1497_v22 = vmul.f32 1.442695, %v1448_v41  ;;  %v1576_v42 = vmul.f32 %v1147_v19, %v904_v0  ;;  %v1814_v19 = vld [vmem:[#allocation5 + $0x50] sm:$0xff]  ;;  %v1156_v41 = vpop.xlane.xlu1 %1155  ;;  %v1813_v0 = vld [vmem:[#allocation5 + $0x48] sm:$0xff] }
 0x41d   :  { %1543 = vst.msk [vmem:[#allocation3 + $0x80] sm:$0xff] %vm185_vm8, %v2562_v37  ;;  %v1697_v28 = vmul.f32 %v1693_v2, %v3612_v7  ;;  %v1722_v13 = vld [vmem:[#allocation4 + $0x80] sm:$0xff]  ;;  %v1846_v37 = vmul.f32 %v1814_v19, %v3527_v16  ;;  %v613_v16 = vld [vmem:[%s4035_s16 + $0xa8] sm:$0xff] }
 0x41e   :  { %2563 = vpow2.f32 %v1497_v22  ;;  %1608 = vst.msk [vmem:[#allocation4 + $0x88] sm:$0xff] %vm185_vm8, %v1576_v42 }
 0x41f   :  { %v3700_v33 = vadd.f32 %v1702_v54, %v1697_v28 }
 0x420   :  { %1336 = vadd.xlane.f32.xlu2 %v1335_v39  ;;  %v1818_v14 = vld [vmem:[#allocation5 + $0x70] sm:$0xff]  ;;  %v1845_v39 = vmul.f32 %v1813_v0, %v3472_v60 }
 0x421   :  { %1711 = vst.msk [vmem:[#allocation5 + $0x78] sm:$0xff] %vm185_vm8, %v3700_v33  ;;  %v792_v7 = vpop.f32.mrf.mxu2  ;;  %1390 = vadd.xlane.f32.xlu1 %v1389_v8  ;;  %v1850_v32 = vmul.f32 %v1818_v14, %v3667_v56  ;;  %v612_v56 = vld [vmem:[%s4035_s16 + $0xa0] sm:$0xff] }
 0x422   :  { %v1449_v50 = vmul.f32 %v792_v7, %v610_v49 }
 0x423   :  { %v907_v34 = vpop.f32.mrf.mxu3 }
 0x424   :  { %v2564_v25 = vpop.eup %2563  ;;  %v1713_v20 = vld [vmem:[#allocation3 + $0x80] sm:$0xff]  ;;  %v1499_v43 = vmul.f32 1.442695, %v1449_v50  ;;  %v1577_v11 = vmul.f32 %v1150_v30, %v907_v34  ;;  %v3739_v9 = vpop.xlane.xlu2 %1164 }
 0x425   :  { %1544 = vst.msk [vmem:[#allocation3 + $0x88] sm:$0xff] %vm185_vm8, %v2564_v25  ;;  %v1717_v51 = vmul.f32 %v1713_v20, %v3634_v23  ;;  %v1723_v24 = vld [vmem:[#allocation4 + $0x88] sm:$0xff] }
 0x426   :  { %2565 = vpow2.f32 %v1499_v43  ;;  %1609 = vst.msk [vmem:[#allocation4 + $0x90] sm:$0xff] %vm185_vm8, %v1577_v11 }
 0x427   :  { %v3713_v26 = vadd.f32 %v1722_v13, %v1717_v51  ;;  %v614_v13 = vld [vmem:[%s4035_s16 + $0xb0] sm:$0xff] }
 0x428   :  { %v1819_v59 = vld [vmem:[#allocation5 + $0x78] sm:$0xff] }
 0x429   :  { %1731 = vst.msk [vmem:[#allocation5 + $0x80] sm:$0xff] %vm185_vm8, %v3713_v26  ;;  %v795_v23 = vpop.f32.mrf.mxu2  ;;  %1384 = vadd.xlane.f32.xlu1 %v1383_v55  ;;  %v1851_v40 = vmul.f32 %v1819_v59, %v3607_v38  ;;  %v1815_v38 = vld [vmem:[#allocation5 + $0x58] sm:$0xff] }
 0x42a   :  { %v1450_v48 = vmul.f32 %v795_v23, %v611_v15  ;;  %v1162_v15 = vpop.xlane.xlu1 %1161 }
 0x42b   :  { %1874 = vmatpush.msrb.mxu2 %v1851_v40  ;;  %v910_v36 = vpop.f32.mrf.mxu3 }
 0x42c   :  { %v2566_v62 = vpop.eup %2565  ;;  %v1714_v3 = vld [vmem:[#allocation3 + $0x88] sm:$0xff]  ;;  %v1501_v18 = vmul.f32 1.442695, %v1450_v48  ;;  %v1578_v47 = vmul.f32 %v1153_v63, %v910_v36  ;;  %v1168_v30 = vpop.xlane.xlu2 %1167 }
 0x42d   :  { %1545 = vst.msk [vmem:[#allocation3 + $0x90] sm:$0xff] %vm185_vm8, %v2566_v62  ;;  %v1718_v27 = vmul.f32 %v1714_v3, %v3661_v52  ;;  %1875 = vmatpush.msrb.mxu2 %v1850_v32  ;;  %v1847_v52 = vmul.f32 %v1815_v38, %v3641_v44  ;;  %v1724_v49 = vld [vmem:[#allocation4 + $0x90] sm:$0xff]  ;;  %v615_v62 = vld [vmem:[%s4035_s16 + $0xb8] sm:$0xff] }
 0x42e   :  { %2567 = vpow2.f32 %v1501_v18  ;;  %1610 = vst.msk [vmem:[#allocation4 + $0x98] sm:$0xff] %vm185_vm8, %v1578_v47 }
 0x42f   :  { %v3730_v17 = vadd.f32 %v1723_v24, %v1718_v27  ;;  %1876 = vmatpush.msrb.mxu2 %v1849_v12 }
 0x431   :  { %1732 = vst.msk [vmem:[#allocation5 + $0x88] sm:$0xff] %vm185_vm8, %v3730_v17  ;;  %v798_v61 = vpop.f32.mrf.mxu2  ;;  %1877 = vmatpush.msrb.mxu2 %v1848_v21 }
 0x432   :  { %v1451_v53 = vmul.f32 %v798_v61, %v612_v56 }
 0x433   :  { %1878 = vmatpush.msrb.mxu2 %v1847_v52  ;;  %v913_v2 = vpop.f32.mrf.mxu3 }
 0x434   :  { %v2568_v22 = vpop.eup %2567  ;;  %v1715_v42 = vld [vmem:[#allocation3 + $0x90] sm:$0xff]  ;;  %v1503_v57 = vmul.f32 1.442695, %v1451_v53  ;;  %v1579_v28 = vmul.f32 %v1156_v41, %v913_v2  ;;  %v3745_v44 = vpop.xlane.xlu0 %1170  ;;  %v616_v41 = vld [vmem:[%s4035_s16 + $0xc0] sm:$0xff] }
 0x435   :  { %1546 = vst.msk [vmem:[#allocation3 + $0x98] sm:$0xff] %vm185_vm8, %v2568_v22  ;;  %v1719_v54 = vmul.f32 %v1715_v42, %v3681_v1  ;;  %1879 = vmatpush.msrb.mxu2 %v1846_v37  ;;  %v1725_v11 = vld [vmem:[#allocation4 + $0x98] sm:$0xff] }
 0x436   :  { %2569 = vpow2.f32 %v1503_v57  ;;  %1611 = vst.msk [vmem:[#allocation4 + $0xa0] sm:$0xff] %vm185_vm8, %v1579_v28 }
 0x437   :  { %v3748_v8 = vadd.f32 %v1724_v49, %v1719_v54  ;;  %1880 = vmatpush.msrb.mxu2 %v1845_v39  ;;  %v617_v39 = vld [vmem:[%s4035_s16 + $0xc8] sm:$0xff] }
 0x439   :  { %1733 = vst.msk [vmem:[#allocation5 + $0x90] sm:$0xff] %vm185_vm8, %v3748_v8  ;;  %v801_v1 = vpop.f32.mrf.mxu2 }
 0x43a   :  { %v1452_v7 = vmul.f32 %v801_v1, %v613_v16 }
 0x43b   :  { %v916_v60 = vpop.f32.mrf.mxu3 }
 0x43c   :  { %v2570_v50 = vpop.eup %2569  ;;  %v1716_v34 = vld [vmem:[#allocation3 + $0x98] sm:$0xff]  ;;  %v1505_v25 = vmul.f32 1.442695, %v1452_v7  ;;  %v1580_v20 = vmul.f32 %v3718_v6, %v916_v60  ;;  %v3764_v63 = vpop.xlane.xlu0 %1414 }
 0x43d   :  { %1547 = vst.msk [vmem:[#allocation3 + $0xa0] sm:$0xff] %vm185_vm8, %v2570_v50  ;;  %v1720_v43 = vmul.f32 %v1716_v34, %v3700_v33  ;;  %v3770_v35 = vpop.xlane.xlu2 %1173  ;;  %v1745_v32 = vld [vmem:[#allocation4 + $0xa0] sm:$0xff] }
 0x43e   :  { %2571 = vpow2.f32 %v1505_v25  ;;  %1612 = vst.msk [vmem:[#allocation4 + $0xa8] sm:$0xff] %vm185_vm8, %v1580_v20 }
 0x43f   :  { %v3759_v51 = vadd.f32 %v1725_v11, %v1720_v43  ;;  %v618_v11 = vld [vmem:[%s4035_s16 + $0xd0] sm:$0xff] }
 0x441   :  { %1734 = vst.msk [vmem:[#allocation5 + $0x98] sm:$0xff] %vm185_vm8, %v3759_v51  ;;  %v804_v6 = vpop.f32.mrf.mxu2 }
 0x442   :  { %v1453_v55 = vmul.f32 %v804_v6, %v614_v13 }
 0x443   :  { %v919_v59 = vpop.f32.mrf.mxu3 }
 0x444   :  { %v2572_v33 = vpop.eup %2571  ;;  %v1736_v14 = vld [vmem:[#allocation3 + $0xa0] sm:$0xff]  ;;  %v1507_v23 = vmul.f32 1.442695, %v1453_v55  ;;  %v1581_v40 = vmul.f32 %v1162_v15, %v919_v59  ;;  %v3780_v18 = vpop.xlane.xlu0 %1176 }
 0x445   :  { %1548 = vst.msk [vmem:[#allocation3 + $0xa8] sm:$0xff] %vm185_vm8, %v2572_v33  ;;  %v1740_v48 = vmul.f32 %v1736_v14, %v3713_v26  ;;  %v3782_v26 = vpop.xlane.xlu1 %1417  ;;  %v1746_v21 = vld [vmem:[#allocation4 + $0xa8] sm:$0xff] }
 0x446   :  { %2573 = vpow2.f32 %v1507_v23  ;;  %1613 = vst.msk [vmem:[#allocation4 + $0xb0] sm:$0xff] %vm185_vm8, %v1581_v40 }
 0x447   :  { %v3773_v36 = vadd.f32 %v1745_v32, %v1740_v48 }
 0x449   :  { %1754 = vst.msk [vmem:[#allocation5 + $0xa0] sm:$0xff] %vm185_vm8, %v3773_v36  ;;  %v807_v3 = vpop.f32.mrf.mxu2 }
 0x44a   :  { %v1454_v58 = vmul.f32 %v807_v3, %v615_v62  ;;  %v619_v62 = vld [vmem:[%s4035_s16 + $0xd8] sm:$0xff] }
 0x44b   :  { %v922_v47 = vpop.f32.mrf.mxu3  ;;  %v3793_v61 = vpop.xlane.xlu2 %1420 }
 0x44c   :  { %v2574_v27 = vpop.eup %2573  ;;  %v1737_v12 = vld [vmem:[#allocation3 + $0xa8] sm:$0xff]  ;;  %v1509_v24 = vmul.f32 1.442695, %v1454_v58  ;;  %v1582_v38 = vmul.f32 %v3739_v9, %v922_v47 }
 0x44d   :  { %1549 = vst.msk [vmem:[#allocation3 + $0xb0] sm:$0xff] %vm185_vm8, %v2574_v27  ;;  %v1741_v56 = vmul.f32 %v1737_v12, %v3730_v17  ;;  %v1747_v28 = vld [vmem:[#allocation4 + $0xb0] sm:$0xff] }
 0x44e   :  { %2575 = vpow2.f32 %v1509_v24  ;;  %1614 = vst.msk [vmem:[#allocation4 + $0xb8] sm:$0xff] %vm185_vm8, %v1582_v38 }
 0x44f   :  { %v3788_v19 = vadd.f32 %v1746_v21, %v1741_v56 }
 0x451   :  { %1755 = vst.msk [vmem:[#allocation5 + $0xa8] sm:$0xff] %vm185_vm8, %v3788_v19  ;;  %v810_v52 = vpop.f32.mrf.mxu2 }
 0x452   :  { %v1455_v9 = vmul.f32 %v810_v52, %v616_v41  ;;  %v1811_v52 = vld [vmem:[#allocation5 + $0x38] sm:$0xff] }
 0x453   :  { %v3797_v53 = vpop.xlane.xlu0 %1423  ;;  %v925_v22 = vpop.f32.mrf.mxu3 }
 0x454   :  { %v2576_v17 = vpop.eup %2575  ;;  %v1738_v0 = vld [vmem:[#allocation3 + $0xb0] sm:$0xff]  ;;  %v1511_v37 = vmul.f32 1.442695, %v1455_v9  ;;  %v3799_v2 = vpop.xlane.xlu1 %1182  ;;  %v1583_v57 = vmul.f32 %v1168_v30, %v925_v22 }
 0x455   :  { %1550 = vst.msk [vmem:[#allocation3 + $0xb8] sm:$0xff] %vm185_vm8, %v2576_v17  ;;  %v1742_v42 = vmul.f32 %v1738_v0, %v3748_v8  ;;  %v3811_v16 = vpop.xlane.xlu2 %1179  ;;  %v1748_v20 = vld [vmem:[#allocation4 + $0xb8] sm:$0xff] }
 0x456   :  { %2577 = vpow2.f32 %v1511_v37  ;;  %1615 = vst.msk [vmem:[#allocation4 + $0xc0] sm:$0xff] %vm185_vm8, %v1583_v57 }
 0x457   :  { %v3803_v54 = vadd.f32 %v1747_v28, %v1742_v42  ;;  %v620_v42 = vld [vmem:[%s4035_s16 + $0xe0] sm:$0xff] }
 0x459   :  { %1756 = vst.msk [vmem:[#allocation5 + $0xb0] sm:$0xff] %vm185_vm8, %v3803_v54  ;;  %v813_v49 = vpop.f32.mrf.mxu2 }
 0x45a   :  { %v1456_v1 = vmul.f32 %v813_v49, %v617_v39  ;;  %v1810_v39 = vld [vmem:[#allocation5 + $0x30] sm:$0xff] }
 0x45b   :  { %v928_v34 = vpop.f32.mrf.mxu3 }
 0x45c   :  { %v2578_v7 = vpop.eup %2577  ;;  %v1513_v8 = vmul.f32 1.442695, %v1456_v1  ;;  %v3813_v30 = vpop.xlane.xlu1 %1426  ;;  %v1739_v50 = vld [vmem:[#allocation3 + $0xb8] sm:$0xff]  ;;  %v1584_v43 = vmul.f32 %v3745_v44, %v928_v34 }
 0x45d   :  { %v3815_v60 = vpop.xlane.xlu0 %1185  ;;  %1551 = vst.msk [vmem:[#allocation3 + $0xc0] sm:$0xff] %vm185_vm8, %v2578_v7  ;;  %v1743_v25 = vmul.f32 %v1739_v50, %v3759_v51  ;;  %v1768_v48 = vld [vmem:[#allocation4 + $0xc0] sm:$0xff] }
 0x45e   :  { %2579 = vpow2.f32 %v1513_v8  ;;  %1616 = vst.msk [vmem:[#allocation4 + $0xc8] sm:$0xff] %vm185_vm8, %v1584_v43 }
 0x45f   :  { %v3823_v13 = vadd.f32 %v1748_v20, %v1743_v25 }
 0x461   :  { %v816_v15 = vpop.f32.mrf.mxu2  ;;  %1757 = vst.msk [vmem:[#allocation5 + $0xb8] sm:$0xff] %vm185_vm8, %v3823_v13 }
 0x462   :  { %v1457_v6 = vmul.f32 %v816_v15, %v618_v11  ;;  %v621_v11 = vld [vmem:[%s4035_s16 + $0xe8] sm:$0xff] }
 0x463   :  { %v3828_v55 = vpop.xlane.xlu2 %1429 }
 0x464   :  { %v2580_v51 = vpop.eup %2579  ;;  %v1515_v59 = vmul.f32 1.442695, %v1457_v6  ;;  %v3830_v14 = vpop.xlane.xlu1 %1188  ;;  %v1759_v44 = vld [vmem:[#allocation3 + $0xc0] sm:$0xff] }
 0x465   :  { %v1358_v33 = vpop.xlane.xlu0 %1357  ;;  %1552 = vst.msk [vmem:[#allocation3 + $0xc8] sm:$0xff] %vm185_vm8, %v2580_v51  ;;  %v931_v23 = vpop.f32.mrf.mxu3  ;;  %v1763_v40 = vmul.f32 %v1759_v44, %v3773_v36  ;;  %v1769_v9 = vld [vmem:[#allocation4 + $0xc8] sm:$0xff] }
 0x466   :  { %2581 = vpow2.f32 %v1515_v59  ;;  %v1585_v32 = vmul.f32 %v3770_v35, %v931_v23  ;;  %v1812_v35 = vld [vmem:[#allocation5 + $0x40] sm:$0xff]  ;;  %v1843_v37 = vmul.f32 %v1811_v52, %v1358_v33  ;;  %v1809_v23 = vld [vmem:[#allocation5 + $0x28] sm:$0xff] }
 0x467   :  { %v3838_v3 = vadd.f32 %v1768_v48, %v1763_v40 }
 0x468   :  { %1617 = vst.msk [vmem:[#allocation4 + $0xd0] sm:$0xff] %vm185_vm8, %v1585_v32 }
 0x469   :  { %v819_v58 = vpop.f32.mrf.mxu2  ;;  %1777 = vst.msk [vmem:[#allocation5 + $0xc0] sm:$0xff] %vm185_vm8, %v3838_v3 }
 0x46a   :  { %v1458_v47 = vmul.f32 %v819_v58, %v619_v62  ;;  %v1808_v62 = vld [vmem:[#allocation5 + $0x20] sm:$0xff] }
 0x46b   :  { %v3843_v27 = vpop.xlane.xlu2 %1411 }
 0x46c   :  { %v2582_v36 = vpop.eup %2581  ;;  %v1517_v12 = vmul.f32 1.442695, %v1458_v47  ;;  %v1760_v24 = vld [vmem:[#allocation3 + $0xc8] sm:$0xff]  ;;  %v1361_v38 = vpop.xlane.xlu1 %1360 }
 0x46d   :  { %1553 = vst.msk [vmem:[#allocation3 + $0xd0] sm:$0xff] %vm185_vm8, %v2582_v36  ;;  %v1764_v56 = vmul.f32 %v1760_v24, %v3788_v19  ;;  %v1844_v21 = vmul.f32 %v1812_v35, %v1361_v38  ;;  %v934_v41 = vpop.f32.mrf.mxu3  ;;  %v3847_v17 = vpop.xlane.xlu0 %1405  ;;  %v622_v24 = vld [vmem:[%s4035_s16 + $0xf0] sm:$0xff] }
 0x46e   :  { %2583 = vpow2.f32 %v1517_v12  ;;  %v1586_v0 = vmul.f32 %v3780_v18, %v934_v41 }
 0x46f   :  { %v3850_v22 = vadd.f32 %v1769_v9, %v1764_v56  ;;  %1881 = vmatpush.msrb.mxu2 %v1844_v21  ;;  %v1770_v25 = vld [vmem:[#allocation4 + $0xd0] sm:$0xff] }
 0x470   :  { %1618 = vst.msk [vmem:[#allocation4 + $0xd8] sm:$0xff] %vm185_vm8, %v1586_v0 }
 0x471   :  { %1778 = vst.msk [vmem:[#allocation5 + $0xc8] sm:$0xff] %vm185_vm8, %v3850_v22  ;;  %v822_v19 = vpop.f32.mrf.mxu2  ;;  %1882 = vmatpush.msrb.mxu2 %v1843_v37 }
 0x472   :  { %v1459_v57 = vmul.f32 %v822_v19, %v620_v42 }
 0x473   :  { %v1355_v28 = vpop.xlane.xlu2 %1354 }
 0x474   :  { %v2584_v49 = vpop.eup %2583  ;;  %v1761_v18 = vld [vmem:[#allocation3 + $0xd0] sm:$0xff]  ;;  %v1519_v1 = vmul.f32 1.442695, %v1459_v57  ;;  %v1842_v7 = vmul.f32 %v1810_v39, %v1355_v28  ;;  %v3858_v8 = vpop.xlane.xlu1 %1408  ;;  %v623_v39 = vld [vmem:[%s4035_s16 + $0xf8] sm:$0xff] }
 0x475   :  { %1554 = vst.msk [vmem:[#allocation3 + $0xd8] sm:$0xff] %vm185_vm8, %v2584_v49  ;;  %v1765_v50 = vmul.f32 %v1761_v18, %v3803_v54  ;;  %v937_v34 = vpop.f32.mrf.mxu3  ;;  %v1349_v15 = vpop.xlane.xlu0 %1348 }
 0x476   :  { %2585 = vpow2.f32 %v1519_v1  ;;  %1883 = vmatpush.msrb.mxu2 %v1842_v7  ;;  %v1587_v20 = vmul.f32 %v3811_v16, %v937_v34  ;;  %v1840_v36 = vmul.f32 %v1808_v62, %v1349_v15 }
 0x477   :  { %v3863_v43 = vadd.f32 %v1770_v25, %v1765_v50  ;;  %v1771_v58 = vld [vmem:[#allocation4 + $0xd8] sm:$0xff] }
 0x478   :  { %1619 = vst.msk [vmem:[#allocation4 + $0xe0] sm:$0xff] %vm185_vm8, %v1587_v20  ;;  %v1806_v20 = vld [vmem:[#allocation5 + $0x10] sm:$0xff] }
 0x479   :  { %1779 = vst.msk [vmem:[#allocation5 + $0xd0] sm:$0xff] %vm185_vm8, %v3863_v43  ;;  %v825_v6 = vpop.f32.mrf.mxu2 }
 0x47a   :  { %v1460_v54 = vmul.f32 %v825_v6, %v621_v11  ;;  %v1805_v6 = vld [vmem:[#allocation5 + $0x8] sm:$0xff] }
 0x47b   :  { %v3871_v51 = vpop.xlane.xlu2 %1402 }
 0x47c   :  { %v2586_v59 = vpop.eup %2585  ;;  %v1762_v33 = vld [vmem:[#allocation3 + $0xd8] sm:$0xff]  ;;  %v1521_v44 = vmul.f32 1.442695, %v1460_v54  ;;  %v1352_v16 = vpop.xlane.xlu1 %1351 }
 0x47d   :  { %1555 = vst.msk [vmem:[#allocation3 + $0xe0] sm:$0xff] %vm185_vm8, %v2586_v59  ;;  %v1766_v40 = vmul.f32 %v1762_v33, %v3823_v13  ;;  %v1841_v48 = vmul.f32 %v1809_v23, %v1352_v16  ;;  %v940_v32 = vpop.f32.mrf.mxu3  ;;  %v3884_v38 = vpop.xlane.xlu0 %1396  ;;  %v1804_v23 = vld [vmem:[#allocation5] sm:$0xff] }
 0x47e   :  { %2587 = vpow2.f32 %v1521_v44  ;;  %v1588_v47 = vmul.f32 %v3799_v2, %v940_v32  ;;  %v1807_v2 = vld [vmem:[#allocation5 + $0x18] sm:$0xff]  ;;  %v588_v32 = vld [vmem:[%s4038_s19] sm:$0xff] }
 0x47f   :  { %v3876_v12 = vadd.f32 %v1771_v58, %v1766_v40  ;;  %1884 = vmatpush.msrb.mxu2 %v1841_v48  ;;  %v1791_v19 = vld [vmem:[#allocation4 + $0xe0] sm:$0xff] }
 0x480   :  { %1620 = vst.msk [vmem:[#allocation4 + $0xe8] sm:$0xff] %vm185_vm8, %v1588_v47 }
 0x481   :  { %1780 = vst.msk [vmem:[#allocation5 + $0xd8] sm:$0xff] %vm185_vm8, %v3876_v12  ;;  %v828_v13 = vpop.f32.mrf.mxu2  ;;  %1885 = vmatpush.msrb.mxu2 %v1840_v36  ;;  %v590_v36 = vld [vmem:[%s4038_s19 + $0x10] sm:$0xff] }
 0x482   :  { %v1461_v35 = vmul.f32 %v828_v13, %v622_v24 }
 0x483   :  { %v1346_v56 = vpop.xlane.xlu2 %1345 }
 0x484   :  { %v2588_v21 = vpop.eup %2587  ;;  %v1782_v41 = vld [vmem:[#allocation3 + $0xe0] sm:$0xff]  ;;  %v1523_v52 = vmul.f32 1.442695, %v1461_v35  ;;  %v1839_v9 = vmul.f32 %v1807_v2, %v1346_v56  ;;  %v3886_v0 = vpop.xlane.xlu1 %1399 }
 0x485   :  { %1556 = vst.msk [vmem:[#allocation3 + $0xe8] sm:$0xff] %vm185_vm8, %v2588_v21  ;;  %v1786_v37 = vmul.f32 %v1782_v41, %v3838_v3  ;;  %v943_v42 = vpop.f32.mrf.mxu3  ;;  %v1340_v7 = vpop.xlane.xlu0 %1339 }
 0x486   :  { %2589 = vpow2.f32 %v1523_v52  ;;  %1886 = vmatpush.msrb.mxu2 %v1839_v9  ;;  %v1589_v57 = vmul.f32 %v3815_v60, %v943_v42  ;;  %v1837_v33 = vmul.f32 %v1805_v6, %v1340_v7  ;;  %v1830_v42 = vld [vmem:[#allocation5 + $0xd0] sm:$0xff]  ;;  %v2403_v6 = vmul.f32 -1.442695, %v2959_v29 }
 0x487   :  { %v1795_v28 = vadd.f32 %v1791_v19, %v1786_v37  ;;  %v1792_v54 = vld [vmem:[#allocation4 + $0xe8] sm:$0xff] }
 0x488   :  { %1621 = vst.msk [vmem:[#allocation4 + $0xf0] sm:$0xff] %vm185_vm8, %v1589_v57  ;;  %v1831_v37 = vld [vmem:[#allocation5 + $0xd8] sm:$0xff]  ;;  %v1829_v57 = vld [vmem:[#allocation5 + $0xc8] sm:$0xff] }
 0x489   :  { %1800 = vst.msk [vmem:[#allocation5 + $0xe0] sm:$0xff] %vm185_vm8, %v1795_v28  ;;  %v831_v49 = vpop.f32.mrf.mxu2  ;;  %v1863_v19 = vmul.f32 %v1831_v37, %v3782_v26  ;;  %v1861_v28 = vmul.f32 %v1829_v57, %v3843_v27  ;;  %v1825_v26 = vld [vmem:[#allocation5 + $0xa8] sm:$0xff] }
 0x48a   :  { %v1462_v18 = vmul.f32 %v831_v49, %v623_v39  ;;  %v1857_v7 = vmul.f32 %v1825_v26, %v3886_v0  ;;  %v591_v0 = vld [vmem:[%s4038_s19 + $0x18] sm:$0xff] }
 0x48b   :  { %v3896_v1 = vpop.xlane.xlu2 %1393 }
 0x48c   :  { %v2590_v3 = vpop.eup %2589  ;;  %v1783_v50 = vld [vmem:[#allocation3 + $0xe8] sm:$0xff]  ;;  %v1525_v34 = vmul.f32 1.442695, %v1462_v18  ;;  %v1343_v25 = vpop.xlane.xlu1 %1342 }
 0x48d   :  { %1557 = vst.msk [vmem:[#allocation3 + $0xf0] sm:$0xff] %vm185_vm8, %v2590_v3  ;;  %v1787_v60 = vmul.f32 %v1783_v50, %v3850_v22  ;;  %v1838_v11 = vmul.f32 %v1806_v20, %v1343_v25  ;;  %v946_v15 = vpop.f32.mrf.mxu3  ;;  %v1823_v50 = vld [vmem:[#allocation5 + $0x98] sm:$0xff]  ;;  %v1821_v20 = vld [vmem:[#allocation5 + $0x88] sm:$0xff] }
 0x48e   :  { %2591 = vpow2.f32 %v1525_v34  ;;  %v1590_v59 = vmul.f32 %v3830_v14, %v946_v15  ;;  %v1388_v34 = vpop.xlane.xlu0 %1387 }
 0x48f   :  { %v1796_v44 = vadd.f32 %v1792_v54, %v1787_v60  ;;  %1887 = vmatpush.msrb.mxu2 %v1838_v11  ;;  %v1793_v62 = vld [vmem:[#allocation4 + $0xf0] sm:$0xff]  ;;  %v1820_v11 = vld [vmem:[#allocation5 + $0x80] sm:$0xff]  ;;  %v2404_v54 = vmul.f32 -1.442695, %v2970_v31  ;;  %2593 = vpow2.f32 %v2403_v6  ;;  %v2483_v6 = vld [vmem:[%s4031_s12] sm:$0xff] }
 0x490   :  { %1622 = vst.msk [vmem:[#allocation4 + $0xf8] sm:$0xff] %vm185_vm8, %v1590_v59  ;;  %v1832_v52 = vld [vmem:[#allocation5 + $0xe0] sm:$0xff] }
 0x491   :  { %1801 = vst.msk [vmem:[#allocation5 + $0xe8] sm:$0xff] %vm185_vm8, %v1796_v44  ;;  %1888 = vmatpush.msrb.mxu2 %v1837_v33  ;;  %2595 = vpow2.f32 %v2404_v54  ;;  %v2481_v44 = vld [vmem:[%s4030_s11 + $0x10] sm:$0xff] }
 0x493   :  { %v1337_v16 = vpop.xlane.xlu2 %1336 }
 0x494   :  { %v2592_v40 = vpop.eup %2591  ;;  %v1784_v48 = vld [vmem:[#allocation3 + $0xf0] sm:$0xff]  ;;  %v1836_v22 = vmul.f32 %v1804_v23, %v1337_v16  ;;  %v1391_v18 = vpop.xlane.xlu1 %1390 }
 0x495   :  { %1558 = vst.msk [vmem:[#allocation3 + $0xf8] sm:$0xff] %vm185_vm8, %v2592_v40  ;;  %v1788_v14 = vmul.f32 %v1784_v48, %v3863_v43  ;;  %v2594_v59 = vpop.eup %2593  ;;  %v2480_v40 = vld [vmem:[%s4030_s11 + $0x8] sm:$0xff]  ;;  %v2479_v48 = vld [vmem:[%s4030_s11] sm:$0xff] }
 0x496   :  { %1889 = vmatpush.msrb.mxu2 %v1836_v22  ;;  %v1926_v16 = vadd.f32 1.0, %v2594_v59 }
 0x497   :  { %v1797_v58 = vadd.f32 %v1793_v62, %v1788_v14  ;;  %1890 = vmatmul.f32.vlgmr.msrb.gmra.mxu2 %v588_v32  ;;  %v1794_v13 = vld [vmem:[#allocation4 + $0xf8] sm:$0xff]  ;;  %v2596_v33 = vpop.eup %2595 }
 0x498   :  { %v1833_v21 = vld [vmem:[#allocation5 + $0xe8] sm:$0xff]  ;;  %v1927_v23 = vadd.f32 1.0, %v2596_v33  ;;  %2597 = vrcp.f32 %v1926_v16  ;;  %vm1933_vm3 = vweird.f32 %v1926_v16 }
 0x499   :  { %1802 = vst.msk [vmem:[#allocation5 + $0xf0] sm:$0xff] %vm185_vm8, %v1797_v58  ;;  %v1865_v9 = vmul.f32 %v1833_v21, %v3797_v53  ;;  %v1827_v53 = vld [vmem:[#allocation5 + $0xb8] sm:$0xff] }
 0x49a   :  { %v1859_v49 = vmul.f32 %v1827_v53, %v3847_v17  ;;  %v1822_v17 = vld [vmem:[#allocation5 + $0x90] sm:$0xff]  ;;  %2599 = vrcp.f32 %v1927_v23  ;;  %v1954_v21 = vand.u32 2147483648, %v1927_v23  ;;  %vm1948_vm5 = vweird.f32 %v1927_v23 }
 0x49b   :  { %v1854_v25 = vmul.f32 %v1822_v17, %v1391_v18  ;;  %v1952_v37 = vand.u32 2147483647, %v1927_v23 }
 0x49c   :  { %v1785_v47 = vld [vmem:[#allocation3 + $0xf8] sm:$0xff]  ;;  %v1385_v60 = vpop.xlane.xlu1 %1384 }
 0x49d   :  { %v1789_v24 = vmul.f32 %v1785_v47, %v3876_v12  ;;  %v1864_v12 = vmul.f32 %v1832_v52, %v3793_v61  ;;  %v1826_v61 = vld [vmem:[#allocation5 + $0xb0] sm:$0xff]  ;;  %v1852_v15 = vmul.f32 %v1820_v11, %v1385_v60  ;;  %vm1953_vm9 = vcmp.eq.f32.partialorder %v1952_v37, 8.507059e+37 }
 0x49e   :  { %v1858_v3 = vmul.f32 %v1826_v61, %v3871_v51  ;;  %v1853_v51 = vmul.f32 %v1821_v20, %v1388_v34  ;;  %v2598_v22 = vpop.eup %2597 }
 0x49f   :  { %v1798_v35 = vadd.f32 %v1794_v13, %v1789_v24  ;;  %1893 = vmatmul.f32.gmra.mxu2 %v590_v36  ;;  %v1929_v14 = vmul.f32 %v2598_v22, %v1926_v16  ;;  %vm1934_vm1 = vweird.f32 %v2598_v22 }
 0x4a0   :  { %v1834_v43 = vld [vmem:[#allocation5 + $0xf0] sm:$0xff]  ;;  %v2600_v32 = vpop.eup %2599  ;;  %vm3950_vm4 = vmor %vm1933_vm3, %vm1934_vm1 }
 0x4a1   :  { %1803 = vst.msk [vmem:[#allocation5 + $0xf8] sm:$0xff] %vm185_vm8, %v1798_v35  ;;  %v1866_v41 = vmul.f32 %v1834_v43, %v3813_v30  ;;  %v1828_v30 = vld [vmem:[#allocation5 + $0xc0] sm:$0xff]  ;;  %v1944_v62 = vmul.f32 %v2600_v32, %v1927_v23  ;;  %v1930_v58 = vsub.f32 1.0, %v1929_v14  ;;  %vm1949_vm2 = vweird.f32 %v2600_v32  ;;  %v2504_v43 = vld [vmem:[%s4029_s10] ss:$0 sm:$0xff] }
 0x4a2   :  { %v1860_v39 = vmul.f32 %v1828_v30, %v3858_v8  ;;  %v1855_v8 = vmul.f32 %v1823_v50, %v3896_v1  ;;  %v2482_v1 = vld [vmem:[%s4030_s11 + $0x18] sm:$0xff]  ;;  %vm1950_vm6 = vmor %vm1948_vm5, %vm1949_vm2 }
 0x4a3   :  { %2002 = vmatpush.bf16.msrb.mxu0 %v2482_v1  ;;  %v1945_v47 = vsub.f32 1.0, %v1944_v62  ;;  %v1931_v24 = vmul.f32 %v2598_v22, %v1930_v58  ;;  %v2489_v62 = vld [vmem:[%s4033_s14 + $0x20] sm:$0xff] }
 0x4a5   :  { %v1946_v13 = vmul.f32 %v2600_v32, %v1945_v47  ;;  %v1932_v35 = vadd.f32 %v2598_v22, %v1931_v24 }
 0x4a7   :  { %2003 = vmatpush.bf16.msrb.mxu0 %v2481_v44  ;;  %v2492_v44 = vld [vmem:[%s4033_s14 + $0x38] sm:$0xff] }
 0x4a8   :  { %v1835_v56 = vld [vmem:[#allocation5 + $0xf8] sm:$0xff]  ;;  %2165 = vmatpush.bf16.msra.mxu2 %v2492_v44 }
 0x4a9   :  { %v1867_v2 = vmul.f32 %v1835_v56, %v3828_v55  ;;  %v1862_v55 = vmul.f32 %v1830_v42, %v3764_v63  ;;  %v1824_v63 = vld [vmem:[#allocation5 + $0xa0] sm:$0xff]  ;;  %v1947_v56 = vadd.f32 %v2600_v32, %v1946_v13 }
 0x4aa   :  { %v1856_v27 = vmul.f32 %v1824_v63, %v3884_v38  ;;  %v589_v38 = vld [vmem:[%s4038_s19 + $0x8] sm:$0xff] }
 0x4ab   :  { %1897 = vmatpush.msrb.mxu3 %v1867_v2  ;;  %2004 = vmatpush.bf16.msrb.mxu0 %v2480_v40  ;;  %v1939_v2 = vand.u32 2147483648, %v1926_v16  ;;  %v1951_v42 = vsel %vm1950_vm6, %v2600_v32, %v1947_v56 }
 0x4ad   :  { %1898 = vmatpush.msrb.mxu3 %v1866_v41  ;;  %v1940_v57 = vor.u32 1.1754944e-38, %v1939_v2 }
 0x4af   :  { %1899 = vmatpush.msrb.mxu3 %v1865_v9  ;;  %2005 = vmatpush.bf16.msrb.mxu0 %v2479_v48  ;;  %v1937_v9 = vand.u32 2147483647, %v1926_v16  ;;  %v2491_v16 = vld [vmem:[%s4033_s14 + $0x30] sm:$0xff]  ;;  %v2490_v48 = vld [vmem:[%s4033_s14 + $0x28] sm:$0xff] }
 0x4b0   :  { %2166 = vmatpush.bf16.msra.mxu2 %v2491_v16 }
 0x4b1   :  { %1900 = vmatpush.msrb.mxu3 %v1864_v12  ;;  %v1936_v12 = vsel %vm3950_vm4, %v2598_v22, %v1932_v35  ;;  %vm1938_vm7 = vcmp.eq.f32.partialorder %v1937_v9, 8.507059e+37 }
 0x4b2   :  { %v1941_v53 = vsel %vm1938_vm7, %v1940_v57, %v1936_v12  ;;  %v2488_v12 = vld [vmem:[%s4033_s14 + $0x18] sm:$0xff]  ;;  %v2485_v57 = vld [vmem:[%s4033_s14] sm:$0xff] }
 0x4b3   :  { %1901 = vmatpush.msrb.mxu3 %v1863_v19  ;;  %v1872_v19 = vmul.f32 %v2504_v43, %v2839_v4  ;;  %v1958_v26 = vmul.f32 %v1941_v53, %v2959_v29 }
 0x4b4   :  { %2167 = vmatpush.bf16.msra.mxu2 %v2490_v48 }
 0x4b5   :  { %1902 = vmatpush.msrb.mxu3 %v1862_v55  ;;  %v1955_v55 = vor.u32 1.1754944e-38, %v1954_v21 }
 0x4b7   :  { %1903 = vmatpush.msrb.mxu3 %v1861_v28 }
 0x4b8   :  { %2168 = vmatpush.bf16.msra.mxu2 %v2489_v62 }
 0x4b9   :  { %1904 = vmatpush.msrb.mxu3 %v1860_v39  ;;  %v1873_v39 = vmul.f32 %v2504_v43, %v2841_v5 }
 0x4bb   :  { %1905 = vmatpush.msrb.mxu3 %v1859_v49  ;;  %v1956_v49 = vsel %vm1953_vm9, %v1955_v55, %v1951_v42  ;;  %v2487_v42 = vld [vmem:[%s4033_s14 + $0x10] sm:$0xff] }
 0x4bc   :  { %2169 = vmatpush.bf16.msra.mxu2 %v2488_v12 }
 0x4bd   :  { %1906 = vmatpush.msrb.mxu3 %v1858_v3 }
 0x4bf   :  { %1907 = vmatpush.msrb.mxu3 %v1857_v7  ;;  %v1959_v7 = vmul.f32 %v1956_v49, %v2970_v31 }
 0x4c0   :  { %2170 = vmatpush.bf16.msra.mxu2 %v2487_v42 }
 0x4c1   :  { %1908 = vmatpush.msrb.mxu3 %v1856_v27 }
 0x4c3   :  { %1909 = vmatpush.msrb.mxu3 %v1855_v8 }
 0x4c5   :  { %1910 = vmatpush.msrb.mxu3 %v1854_v25 }
 0x4c7   :  { %1911 = vmatpush.msrb.mxu3 %v1853_v51 }
 0x4c9   :  { %1912 = vmatpush.msrb.mxu3 %v1852_v15 }
 0x4ca   :  { %1913 = vmatmul.f32.vlgmr.msrb.gmra.mxu3 %v589_v38 }
 0x4d2   :  { %1916 = vmatmul.f32.gmra.mxu3 %v591_v0 }
 0x51a   :  { %v1891_v36 = vpop.f32.mrf.mxu2 }
 0x51b   :  { %v1892_v30 = vadd.f32 %v1891_v36, %v1872_v19  ;;  %v2486_v19 = vld [vmem:[%s4033_s14 + $0x8] sm:$0xff] }
 0x51c   :  { %2171 = vmatpush.bf16.msra.mxu2 %v2486_v19 }
 0x520   :  { %2172 = vmatpush.bf16.msra.mxu2 %v2485_v57 }
 0x522   :  { %v1894_v28 = vpop.f32.mrf.mxu2 }
 0x523   :  { %v1895_v61 = vadd.f32 %v1894_v28, %v1873_v39  ;;  %v2505_v28 = vld [vmem:[%s4032_s13] ss:$0 sm:$0xff]  ;;  %s2641_s13 = smov [#allocation6]  }
 0x524   :  { %s2189_s30 = sshll.u32 %s2641_s13, 4  ;;  %s2190_s30 = int_to_ptr.vmem [resolvable:$true] %s2189_s30 }
 0x54d   :  { %v1914_v41 = vpop.f32.mrf.mxu3 }
 0x54e   :  { %v1915_v18 = vadd.f32 %v1914_v41, %v1892_v30 }
 0x550   :  { %v1960_v27 = vmul.f32 %v1958_v26, %v1915_v18 }
 0x555   :  { %v1917_v3 = vpop.f32.mrf.mxu3 }
 0x556   :  { %v1918_v63 = vadd.f32 %v1917_v3, %v1895_v61  ;;  %v2506_v3 = vld [vmem:[%s4034_s15] ss:$0 sm:$0xff] }
 0x558   :  { %v1961_v4 = vmul.f32 %v1959_v7, %v1918_v63 }
 0x55a   :  { %v1962_v50 = vpack.c.bf16 %v1961_v4, %v1960_v27  ;;  %v2611_v27 = vld [vmem:[%s4049_s23] sm:$0xff] }
 0x55c   :  { %2421 = vmatmul.msk.bf16.vlgmr.msrb.gmra.mxu0 %vm185_vm8, %v1962_v50 }
 0x5d9   :  { %v2007_v8 = vpop.f32.mrf.mxu0 }
 0x5da   :  { %v2008_v34 = vadd.f32 %v2007_v8, %v2777_v45 }
 0x5dc   :  { %v2012_v5 = vsel %vm69_vm0, %v2008_v34, 0.0 }
 0x5dd   :  { %2013 = vadd.xlane.f32.xlu2 %v2012_v5  ;;  %v2612_v5 = vld [vmem:[%s4049_s23 + $0x8] sm:$0xff] }
 0x5e1   :  { %v2009_v17 = vpop.f32.mrf.mxu0 }
 0x5e2   :  { %v2010_v25 = vadd.f32 %v2009_v17, %v2779_v46  ;;  %v2484_v46 = vld [vmem:[%s4031_s12 + $0x8] sm:$0xff] }
 0x5e3   :  { %2086 = vmatpush.bf16.msrb.mxu1 %v2484_v46 }
 0x5e4   :  { %v2015_v20 = vsel %vm69_vm0, %v2010_v25, 0.0 }
 0x5e5   :  { %2016 = vadd.xlane.f32.xlu0 %v2015_v20 }
 0x5e7   :  { %2087 = vmatpush.bf16.msrb.mxu1 %v2483_v6 }
 0x650   :  { %v2014_v29 = vpop.xlane.xlu2 %2013 }
 0x651   :  { %v2018_v31 = vmul.f32 %v2014_v29, %v2757_v10 }
 0x653   :  { %v2020_v60 = vsub.f32 %v2008_v34, %v2018_v31 }
 0x655   :  { %v2022_v51 = vmul.f32 %v2020_v60, %v2020_v60 }
 0x657   :  { %v2024_v11 = vsel %vm69_vm0, %v2022_v51, 0.0 }
 0x658   :  { %v2017_v15 = vpop.xlane.xlu0 %2016  ;;  %2025 = vadd.xlane.f32.xlu1 %v2024_v11 }
 0x659   :  { %v2019_v45 = vmul.f32 %v2017_v15, %v2757_v10 }
 0x65b   :  { %v2021_v38 = vsub.f32 %v2010_v25, %v2019_v45 }
 0x65d   :  { %v2023_v0 = vmul.f32 %v2021_v38, %v2021_v38 }
 0x65f   :  { %v2027_v1 = vsel %vm69_vm0, %v2023_v0, 0.0 }
 0x660   :  { %2028 = vadd.xlane.f32.xlu2 %v2027_v1 }
 0x6cb   :  { %v2026_v54 = vpop.xlane.xlu1 %2025 }
 0x6cc   :  { %v2030_v59 = vmul.f32 %v2026_v54, %v2757_v10 }
 0x6ce   :  { %v2032_v33 = vadd.f32 1e-05, %v2030_v59 }
 0x6d0   :  { %2601 = vrsqrt.f32 %v2032_v33  ;;  %vm2040_vm10 = vweird.f32 %v2032_v33 }
 0x6d3   :  { %v2029_v23 = vpop.xlane.xlu2 %2028 }
 0x6d4   :  { %v2031_v40 = vmul.f32 %v2029_v23, %v2757_v10 }
 0x6d6   :  { %v2602_v22 = vpop.eup %2601  ;;  %v2033_v32 = vadd.f32 1e-05, %v2031_v40 }
 0x6d7   :  { %v2035_v14 = vmul.f32 %v2602_v22, %v2032_v33  ;;  %vm2041_vm8 = vweird.f32 %v2602_v22 }
 0x6d8   :  { %2603 = vrsqrt.f32 %v2033_v32  ;;  %vm2042_vm12 = vmor %vm2040_vm10, %vm2041_vm8  ;;  %vm2050_vm13 = vweird.f32 %v2033_v32 }
 0x6d9   :  { %v2036_v58 = vmul.f32 %v2602_v22, %v2035_v14 }
 0x6db   :  { %v2037_v47 = vmul.f32 0.5, %v2036_v58 }
 0x6dd   :  { %v2038_v24 = vsub.f32 1.5, %v2037_v47 }
 0x6de   :  { %v2604_v36 = vpop.eup %2603 }
 0x6df   :  { %v2045_v10 = vmul.f32 %v2604_v36, %v2033_v32  ;;  %v2039_v35 = vmul.f32 %v2602_v22, %v2038_v24  ;;  %vm2051_vm11 = vweird.f32 %v2604_v36 }
 0x6e0   :  { %vm2052_vm14 = vmor %vm2050_vm13, %vm2051_vm11 }
 0x6e1   :  { %v2046_v13 = vmul.f32 %v2604_v36, %v2045_v10  ;;  %v2043_v2 = vsel %vm2042_vm12, %v2602_v22, %v2039_v35 }
 0x6e2   :  { %v2054_v52 = vmul.f32 %v2043_v2, %v2020_v60 }
 0x6e3   :  { %v2047_v56 = vmul.f32 0.5, %v2046_v13 }
 0x6e5   :  { %v2048_v43 = vsub.f32 1.5, %v2047_v56 }
 0x6e7   :  { %v2049_v21 = vmul.f32 %v2604_v36, %v2048_v43 }
 0x6e9   :  { %v2053_v41 = vsel %vm2052_vm14, %v2604_v36, %v2049_v21 }
 0x6ea   :  { %v2055_v9 = vmul.f32 %v2053_v41, %v2021_v38 }
 0x6ec   :  { %v2056_v37 = vpack.c.bf16 %v2055_v9, %v2054_v52 }
 0x6ee   :  { %2430 = vmatmul.msk.bf16.vlgmr.msrb.gmra.mxu1 %vm69_vm0, %v2056_v37 }
 0x76b   :  { %v2089_v55 = vpop.f32.mrf.mxu1 }
 0x76c   :  { %v2090_v30 = vadd.f32 %v2505_v28, %v2089_v55 }
 0x76e   :  { %v2094_v49 = vmax.f32 %v2090_v30, 0.0 }
 0x773   :  { %v2091_v39 = vpop.f32.mrf.mxu1 }
 0x774   :  { %v2092_v53 = vadd.f32 %v2505_v28, %v2091_v39 }
 0x776   :  { %v2095_v61 = vmax.f32 %v2092_v53, 0.0 }
 0x778   :  { %v2096_v18 = vpack.c.bf16 %v2095_v61, %v2094_v49 }
 0x77a   :  { %2173 = vmatmul.bf16.vlgmr.msra.gmra.mxu2 %v2096_v18 }
 0x7fd   :  { %v2174_v26 = vpop.f32.mrf.mxu2 }
 0x7fe   :  { %v2175_v7 = vadd.f32 %v2506_v3, %v2174_v26 }
 0x800   :  { %v2179_v63 = vmul.f32 0.5, %v2175_v7 }
 0x802   :  { %v2181_v4 = vadd.f32 %v2611_v27, %v2179_v63 }
 0x804   :  { %2183 = vst.msk [vmem:[#allocation6] sm:$0xff] %vm69_vm0, %v2181_v4 }
 0x805   :  { %v2176_v50 = vpop.f32.mrf.mxu2 }
 0x806   :  { %v2177_v8 = vadd.f32 %v2506_v3, %v2176_v50 }
 0x808   :  { %v2180_v34 = vmul.f32 0.5, %v2177_v8 }
 0x80a   :  { %v2182_v17 = vadd.f32 %v2612_v5, %v2180_v34 }
 0x80c   :  { %2184 = vst.msk [vmem:[#allocation6 + $0x8] sm:$0xff] %vm69_vm0, %v2182_v17 }
 0x80d   :  { %2197 = dma.vmem_to_hbm [thread:$0]  %s2190_s30, 256, %s2192_s17, [#allocation7], %s2642_s26, %s2642_s26, %s2643_s21  }
 0x80e   :  { %2637 = dma.done.wait [#allocation7], 256  }
 0x80f   :  { %2638 = vsyncadd [#allocation7], 4294967040 }
 0x810   :  { %2202 = vsyncpa [#allocation7], 1 }

</bundles_post_ra>
